<compile_context>
chip_gen: v6e
topology: v6e:2x2x1
jax: 0.10.0
libtpu: 0.0.40
codegen_flags: <defaults>
</compile_context>

<pallas_src>
import math

import jax
import jax.numpy as jnp
from jax.experimental import pallas as pl
from jax.experimental.pallas import tpu as pltpu

# ---- small synthetic "BERT" config (scaled down from hidden=768 / mid=512) ----
VOCAB      = 100
MAX_POS    = 32
TYPE_VOCAB = 2
HIDDEN     = 32
NUM_HEADS  = 2
HEAD_DIM   = HIDDEN // NUM_HEADS
FFN        = 64
NUM_LAYERS = 2
MID        = 48
NUM_CLS    = 2
LN_EPS     = 1e-12
BN_EPS     = 1e-5


# ----------------------------- kernel -----------------------------------------
def _ln(x, g, b):
    mean = jnp.mean(x, axis=-1, keepdims=True)
    var = jnp.mean(jnp.square(x - mean), axis=-1, keepdims=True)
    return (x - mean) * jax.lax.rsqrt(var + LN_EPS) * g + b


def sbert_kernel(src_ids_ref, tgt_ids_ref, ids_col_ref,
                 wemb_ref, pt_ref, embln_ref,
                 wqkv_ref, bqkv_ref, wo_ref,
                 w1_ref, b1_ref, w2_ref, vech_ref,
                 pw_ref, pb_ref,
                 cw1_ref, cb1_ref, bng_ref, bnb_ref, cw2_ref, cb2_ref,
                 logits_ref, prob_ref):
    """Whole model in one invocation: embedding (one-hot gather) -> emb LN ->
    NUM_LAYERS transformer layers -> pooler -> classifier -> softmax."""
    B, S = src_ids_ref.shape
    TWO_B = 2 * B
    TOT = TWO_B * S                       # merged source+target token count
    H = wemb_ref.shape[1]

    # ---- embeddings: token gather as a one-hot MXU matmul (no XLA gather) ----
    ids_col = ids_col_ref[...]                                            # (TOT, 1) int32
    onehot = (jax.lax.broadcasted_iota(jnp.int32, (TOT, VOCAB), 1)
              == ids_col).astype(jnp.float32)                             # (TOT, VOCAB)
    emb = jnp.dot(onehot, wemb_ref[...], preferred_element_type=jnp.float32)   # (TOT, H)
    emb = (emb.reshape(TWO_B, S, H) + pt_ref[0:S, :][None, :, :]).reshape(TOT, H)

    # additive key mask, HF-BERT style: 0 for real tokens, -10000 for [PAD]=0
    def _bias(ids):                                                       # (B, S) -> (B, 1, S)
        return jnp.where(ids != 0, 0.0, -10000.0).astype(jnp.float32).reshape(B, 1, S)
    bias3 = jnp.concatenate([_bias(src_ids_ref[...]), _bias(tgt_ids_ref[...])],
                            axis=0)                                       # (2B, 1, S)

    # embedding LayerNorm
    h = _ln(emb, embln_ref[0:1, :], embln_ref[1:2, :])
    # TODO(synk): dropout (active in torch training mode) is not modeled.

    scale = 1.0 / math.sqrt(HEAD_DIM)
    for l in range(NUM_LAYERS):                                           # static, unrolled
        vl = vech_ref[l]                                                  # (6, H) packed vectors
        # fused QKV projection over the whole 32-row slab: (TOT,H)@(H,3H)
        qkv = jnp.dot(h, wqkv_ref[l], preferred_element_type=jnp.float32) + bqkv_ref[l]
        q = qkv[:, 0:H]
        k = qkv[:, H:2 * H]
        v = qkv[:, 2 * H:3 * H]

        ctx = []
        for hd in range(NUM_HEADS):                                       # static, unrolled
            sl = slice(hd * HEAD_DIM, (hd + 1) * HEAD_DIM)
            q3 = q[:, sl].reshape(TWO_B, S, HEAD_DIM)                     # sublane split only
            k3 = k[:, sl].reshape(TWO_B, S, HEAD_DIM)
            v3 = v[:, sl].reshape(TWO_B, S, HEAD_DIM)
            s = jnp.einsum('bqd,bkd->bqk', q3, k3,
                           preferred_element_type=jnp.float32) * scale + bias3
            s = s - jnp.max(s, axis=-1, keepdims=True)
            p = jnp.exp(s)
            p = p * pl.reciprocal(jnp.sum(p, axis=-1, keepdims=True), approx=True)
            c3 = jnp.einsum('bqk,bkd->bqd', p, v3, preferred_element_type=jnp.float32)
            ctx.append(c3.reshape(TOT, HEAD_DIM))
        ctx = jnp.concatenate(ctx, axis=-1)                               # (TOT, H), head-major
        # single out-projection matmul over the whole slab
        attn = jnp.dot(ctx, wo_ref[l], preferred_element_type=jnp.float32) + vl[0:1, :]
        h1 = _ln(h + attn, vl[1:2, :], vl[2:3, :])                        # ln1

        inter = jnp.dot(h1, w1_ref[l], preferred_element_type=jnp.float32) + b1_ref[l]
        # TODO(synk): HF BERT default activation is exact (erf) gelu; tanh approx used here.
        inter = jax.nn.gelu(inter, approximate=True)
        ffn = jnp.dot(inter, w2_ref[l], preferred_element_type=jnp.float32) + vl[5:6, :]
        h = _ln(h1 + ffn, vl[3:4, :], vl[4:5, :])                         # ln2

    # ---- pooler: tanh(Linear(CLS token)) == BertModel output[1]; stays in VMEM ----
    cls = h.reshape(TWO_B, S, H)[:, 0:1, :].reshape(TWO_B, H)
    pooled = jnp.tanh(jnp.dot(cls, pw_ref[...], preferred_element_type=jnp.float32)
                      + pb_ref[...])                                      # (2B, H)

    # ---- classifier, fused into the same kernel (pooled never leaves VMEM) ----
    se = pooled[0:B, :]
    te = pooled[B:TWO_B, :]
    ab = jnp.abs(se - te)
    # context = concat([s, t, |s-t|], -1) @ W1, folded into static row-blocks of
    # the (3H, MID) weight -- mathematically identical, avoids a lane-axis concat.
    x = (jnp.dot(se, cw1_ref[0:H, :], preferred_element_type=jnp.float32)
         + jnp.dot(te, cw1_ref[H:2 * H, :], preferred_element_type=jnp.float32)
         + jnp.dot(ab, cw1_ref[2 * H:3 * H, :], preferred_element_type=jnp.float32)
         + cb1_ref[...])
    # nn.BatchNorm1d in the module's default training mode: batch statistics,
    # biased variance, eps=1e-5.
    # TODO(synk): eval-mode running statistics are not modeled.
    mean = jnp.mean(x, axis=0, keepdims=True)
    var = jnp.mean(jnp.square(x - mean), axis=0, keepdims=True)
    x = (x - mean) * jax.lax.rsqrt(var + BN_EPS) * bng_ref[...] + bnb_ref[...]
    x = jnp.maximum(x, 0.0)                                               # ReLU
    logits = jnp.dot(x, cw2_ref[...], preferred_element_type=jnp.float32) + cb2_ref[...]
    logits_ref[...] = logits.astype(logits_ref.dtype)
    # exact softmax for the returned probabilities (so they sum to 1)
    m = jnp.max(logits, axis=-1, keepdims=True)
    e = jnp.exp(logits - m)
    prob_ref[...] = (e / jnp.sum(e, axis=-1, keepdims=True)).astype(prob_ref.dtype)


# ----------------------------- params ------------------------------------------
def init_params(seed=0):
    keys = iter(jax.random.split(jax.random.PRNGKey(seed), 64))

    def nrm(shape, scale=0.02):
        return scale * jax.random.normal(next(keys), shape, dtype=jnp.float32)

    zeros = lambda shape: jnp.zeros(shape, jnp.float32)
    ones = lambda shape: jnp.ones(shape, jnp.float32)

    params = {
        "word_emb": nrm((VOCAB, HIDDEN)),
        "pos_emb": nrm((MAX_POS, HIDDEN)),
        "type_emb": nrm((TYPE_VOCAB, HIDDEN)),
        "emb_ln_g": ones((HIDDEN,)), "emb_ln_b": zeros((HIDDEN,)),
        "layers": [],
        "pooler_w": nrm((HIDDEN, HIDDEN)), "pooler_b": zeros((HIDDEN,)),
        "cls_w1": nrm((3 * HIDDEN, MID)), "cls_b1": zeros((MID,)),
        "bn_g": ones((MID,)), "bn_b": zeros((MID,)),
        "cls_w2": nrm((MID, NUM_CLS)), "cls_b2": zeros((NUM_CLS,)),
    }
    for _ in range(NUM_LAYERS):
        params["layers"].append({
            "wq": nrm((HIDDEN, HIDDEN)), "bq": zeros((HIDDEN,)),
            "wk": nrm((HIDDEN, HIDDEN)), "bk": zeros((HIDDEN,)),
            "wv": nrm((HIDDEN, HIDDEN)), "bv": zeros((HIDDEN,)),
            "wo": nrm((HIDDEN, HIDDEN)), "bo": zeros((HIDDEN,)),
            "ln1_g": ones((HIDDEN,)), "ln1_b": zeros((HIDDEN,)),
            "w1": nrm((HIDDEN, FFN)), "b1": zeros((FFN,)),
            "w2": nrm((FFN, HIDDEN)), "b2": zeros((HIDDEN,)),
            "ln2_g": ones((HIDDEN,)), "ln2_b": zeros((HIDDEN,)),
        })
    return params


def pack_params(p):
    """Stack per-layer weights on a leading axis, fuse Q|K|V column-wise, and
    pre-add position + token-type embeddings; done once, outside jit."""
    H = HIDDEN
    layers = p["layers"]
    wqkv = jnp.stack([jnp.concatenate([lp["wq"], lp["wk"], lp["wv"]], axis=1)
                      for lp in layers])                                   # (L, H, 3H)
    bqkv = jnp.stack([jnp.concatenate([lp["bq"], lp["bk"], lp["bv"]]).reshape(1, 3 * H)
                      for lp in layers])                                   # (L, 1, 3H)
    vech = jnp.stack([jnp.stack([lp["bo"], lp["ln1_g"], lp["ln1_b"],
                                 lp["ln2_g"], lp["ln2_b"], lp["b2"]])
                      for lp in layers])                                   # (L, 6, H)
    return {
        "word_emb": p["word_emb"],                                         # (VOCAB, H)
        "pos_type": p["pos_emb"] + p["type_emb"][0:1, :],                  # (MAX_POS, H)
        "emb_ln": jnp.stack([p["emb_ln_g"], p["emb_ln_b"]]),               # (2, H)
        "wqkv": wqkv, "bqkv": bqkv,
        "wo": jnp.stack([lp["wo"] for lp in layers]),                      # (L, H, H)
        "w1": jnp.stack([lp["w1"] for lp in layers]),                      # (L, H, FFN)
        "b1": jnp.stack([lp["b1"].reshape(1, FFN) for lp in layers]),      # (L, 1, FFN)
        "w2": jnp.stack([lp["w2"] for lp in layers]),                      # (L, FFN, H)
        "vech": vech,
        "pooler_w": p["pooler_w"], "pooler_b": p["pooler_b"].reshape(1, H),
        "cls_w1": p["cls_w1"], "cls_b1": p["cls_b1"].reshape(1, MID),
        "bn_g": p["bn_g"].reshape(1, MID), "bn_b": p["bn_b"].reshape(1, MID),
        "cls_w2": p["cls_w2"], "cls_b2": p["cls_b2"].reshape(1, NUM_CLS),
    }


# ----------------------------- model -------------------------------------------
@jax.jit
def sbert_forward(params, source_input_ids, target_input_ids):
    B, S = source_input_ids.shape
    # token-column view for the in-kernel one-hot embedding gather (128 B; the
    # heavy XLA gather/add/mask/slice/concat glue and the pooled round-trip are gone)
    ids_col = jnp.concatenate([source_input_ids, target_input_ids],
                              axis=0).reshape(2 * B * S, 1)
    logits, probability = pl.pallas_call(
        sbert_kernel,
        out_shape=(jax.ShapeDtypeStruct((B, NUM_CLS), jnp.float32),
                   jax.ShapeDtypeStruct((B, NUM_CLS), jnp.float32)),
        compiler_params=pltpu.CompilerParams(vmem_limit_bytes=4 * 1024 * 1024),
    )(source_input_ids, target_input_ids, ids_col,
      params["word_emb"], params["pos_type"], params["emb_ln"],
      params["wqkv"], params["bqkv"], params["wo"],
      params["w1"], params["b1"], params["w2"], params["vech"],
      params["pooler_w"], params["pooler_b"],
      params["cls_w1"], params["cls_b1"], params["bn_g"], params["bn_b"],
      params["cls_w2"], params["cls_b2"])
    return logits, probability


# ----------------------------- main --------------------------------------------
if __name__ == "__main__":
    B, S = 2, 8
    key = jax.random.PRNGKey(0)
    k1, k2 = jax.random.split(key)
    source_ids = jax.random.randint(k1, (B, S), 1, VOCAB, dtype=jnp.int32)
    target_ids = jax.random.randint(k2, (B, S), 1, VOCAB, dtype=jnp.int32)
    # add some [PAD]=0 tokens so the attention-mask path is exercised
    target_ids = target_ids.at[:, -2:].set(0)

    params = pack_params(init_params(0))
    logits, probability = sbert_forward(params, source_ids, target_ids)
    jax.block_until_ready((logits, probability))
    assert logits.shape == (B, NUM_CLS) and probability.shape == (B, NUM_CLS)
    assert bool(jnp.all(jnp.isfinite(logits)))
    assert bool(jnp.allclose(jnp.sum(probability, axis=-1), 1.0, atol=1e-5))
    print("KERNEL_OK")
</pallas_src>

<mosaic_0001>
module attributes {stable_mosaic.version = 11 : i64} {
  func.func @sbert_kernel(%arg0: memref<2x8xi32, #tpu.memory_space<vmem>>, %arg1: memref<2x8xi32, #tpu.memory_space<vmem>>, %arg2: memref<32x1xi32, #tpu.memory_space<vmem>>, %arg3: memref<100x32xf32, #tpu.memory_space<vmem>>, %arg4: memref<32x32xf32, #tpu.memory_space<vmem>>, %arg5: memref<2x32xf32, #tpu.memory_space<vmem>>, %arg6: memref<2x32x96xf32, #tpu.memory_space<vmem>>, %arg7: memref<2x1x96xf32, #tpu.memory_space<vmem>>, %arg8: memref<2x32x32xf32, #tpu.memory_space<vmem>>, %arg9: memref<2x32x64xf32, #tpu.memory_space<vmem>>, %arg10: memref<2x1x64xf32, #tpu.memory_space<vmem>>, %arg11: memref<2x64x32xf32, #tpu.memory_space<vmem>>, %arg12: memref<2x6x32xf32, #tpu.memory_space<vmem>>, %arg13: memref<32x32xf32, #tpu.memory_space<vmem>>, %arg14: memref<1x32xf32, #tpu.memory_space<vmem>>, %arg15: memref<96x48xf32, #tpu.memory_space<vmem>>, %arg16: memref<1x48xf32, #tpu.memory_space<vmem>>, %arg17: memref<1x48xf32, #tpu.memory_space<vmem>>, %arg18: memref<1x48xf32, #tpu.memory_space<vmem>>, %arg19: memref<48x2xf32, #tpu.memory_space<vmem>>, %arg20: memref<1x2xf32, #tpu.memory_space<vmem>>, %arg21: memref<2x2xf32, #tpu.memory_space<vmem>>, %arg22: memref<2x2xf32, #tpu.memory_space<vmem>>) attributes {dimension_semantics = [], scalar_prefetch = 0 : i64, scratch_operands = 0 : i64, tpu.core_type = #tpu.core_type<tc>} {
    %c0 = arith.constant 0 : index
    %c0_0 = arith.constant 0 : index
    %0 = vector.load %arg2[%c0, %c0_0] : memref<32x1xi32, #tpu.memory_space<vmem>>, vector<32x1xi32>
    %1 = tpu.iota {dimensions = array<i32: 1>} : vector<32x100xi32>
    %2 = vector.broadcast %0 : vector<32x1xi32> to vector<32x100xi32>
    %3 = arith.cmpi eq, %1, %2 : vector<32x100xi32>
    %4 = arith.extui %3 : vector<32x100xi1> to vector<32x100xi32>
    %5 = arith.sitofp %4 : vector<32x100xi32> to vector<32x100xf32>
    %c0_1 = arith.constant 0 : index
    %c0_2 = arith.constant 0 : index
    %6 = vector.load %arg3[%c0_1, %c0_2] : memref<100x32xf32, #tpu.memory_space<vmem>>, vector<100x32xf32>
    %cst = arith.constant dense<0.000000e+00> : vector<32x32xf32>
    %7 = tpu.matmul %5, %6, %cst {dimension_numbers = #tpu.dot_dimension_numbers<[1], [0], [0], [1], [0, 0, 1, 1], [], []>} : vector<32x100xf32>, vector<100x32xf32>, vector<32x32xf32> -> vector<32x32xf32>
    %8 = vector.shape_cast %7 : vector<32x32xf32> to vector<4x8x32xf32>
    %c0_3 = arith.constant 0 : index
    %c0_4 = arith.constant 0 : index
    %9 = vector.load %arg4[%c0_3, %c0_4] : memref<32x32xf32, #tpu.memory_space<vmem>>, vector<8x32xf32>
    %10 = vector.shape_cast %9 : vector<8x32xf32> to vector<1x8x32xf32>
    %11 = vector.broadcast %10 : vector<1x8x32xf32> to vector<4x8x32xf32>
    %12 = arith.addf %8, %11 : vector<4x8x32xf32>
    %13 = vector.shape_cast %12 : vector<4x8x32xf32> to vector<32x32xf32>
    %c0_5 = arith.constant 0 : index
    %c0_6 = arith.constant 0 : index
    %14 = vector.load %arg0[%c0_5, %c0_6] : memref<2x8xi32, #tpu.memory_space<vmem>>, vector<2x8xi32>
    %c0_i32 = arith.constant 0 : i32
    %15 = vector.broadcast %c0_i32 : i32 to vector<2x8xi32>
    %16 = arith.cmpi ne, %14, %15 : vector<2x8xi32>
    %cst_7 = arith.constant 0.000000e+00 : f32
    %cst_8 = arith.constant -1.000000e+04 : f32
    %17 = vector.broadcast %cst_7 : f32 to vector<2x8xf32>
    %18 = vector.broadcast %cst_8 : f32 to vector<2x8xf32>
    %19 = arith.select %16, %17, %18 : vector<2x8xi1>, vector<2x8xf32>
    %20 = vector.shape_cast %19 : vector<2x8xf32> to vector<2x1x8xf32>
    %c0_9 = arith.constant 0 : index
    %c0_10 = arith.constant 0 : index
    %21 = vector.load %arg1[%c0_9, %c0_10] : memref<2x8xi32, #tpu.memory_space<vmem>>, vector<2x8xi32>
    %c0_i32_11 = arith.constant 0 : i32
    %22 = vector.broadcast %c0_i32_11 : i32 to vector<2x8xi32>
    %23 = arith.cmpi ne, %21, %22 : vector<2x8xi32>
    %cst_12 = arith.constant 0.000000e+00 : f32
    %cst_13 = arith.constant -1.000000e+04 : f32
    %24 = vector.broadcast %cst_12 : f32 to vector<2x8xf32>
    %25 = vector.broadcast %cst_13 : f32 to vector<2x8xf32>
    %26 = arith.select %23, %24, %25 : vector<2x8xi1>, vector<2x8xf32>
    %27 = vector.shape_cast %26 : vector<2x8xf32> to vector<2x1x8xf32>
    %28 = tpu.concatenate %20, %27 in 0 : vector<2x1x8xf32>, vector<2x1x8xf32> -> vector<4x1x8xf32>
    %c0_14 = arith.constant 0 : index
    %c0_15 = arith.constant 0 : index
    %29 = vector.load %arg5[%c0_14, %c0_15] : memref<2x32xf32, #tpu.memory_space<vmem>>, vector<1x32xf32>
    %c1 = arith.constant 1 : index
    %c0_16 = arith.constant 0 : index
    %30 = vector.load %arg5[%c1, %c0_16] : memref<2x32xf32, #tpu.memory_space<vmem>>, vector<1x32xf32>
    %cst_17 = arith.constant dense<0.000000e+00> : vector<32xf32>
    %31 = vector.multi_reduction <add>, %13, %cst_17 [1] : vector<32x32xf32> to vector<32xf32>
    %32 = vector.shape_cast %31 : vector<32xf32> to vector<32x1xf32>
    %cst_18 = arith.constant 3.200000e+01 : f32
    %33 = vector.broadcast %cst_18 : f32 to vector<32x1xf32>
    %34 = arith.divf %32, %33 : vector<32x1xf32>
    %35 = vector.broadcast %34 : vector<32x1xf32> to vector<32x32xf32>
    %36 = arith.subf %13, %35 : vector<32x32xf32>
    %37 = arith.mulf %36, %36 : vector<32x32xf32>
    %cst_19 = arith.constant dense<0.000000e+00> : vector<32xf32>
    %38 = vector.multi_reduction <add>, %37, %cst_19 [1] : vector<32x32xf32> to vector<32xf32>
    %39 = vector.shape_cast %38 : vector<32xf32> to vector<32x1xf32>
    %cst_20 = arith.constant 3.200000e+01 : f32
    %40 = vector.broadcast %cst_20 : f32 to vector<32x1xf32>
    %41 = arith.divf %39, %40 : vector<32x1xf32>
    %42 = vector.broadcast %34 : vector<32x1xf32> to vector<32x32xf32>
    %43 = arith.subf %13, %42 : vector<32x32xf32>
    %cst_21 = arith.constant 9.99999996E-13 : f32
    %44 = vector.broadcast %cst_21 : f32 to vector<32x1xf32>
    %45 = arith.addf %41, %44 : vector<32x1xf32>
    %46 = math.rsqrt %45 : vector<32x1xf32>
    %47 = vector.broadcast %46 : vector<32x1xf32> to vector<32x32xf32>
    %48 = arith.mulf %43, %47 : vector<32x32xf32>
    %49 = vector.broadcast %29 : vector<1x32xf32> to vector<32x32xf32>
    %50 = arith.mulf %48, %49 : vector<32x32xf32>
    %51 = vector.broadcast %30 : vector<1x32xf32> to vector<32x32xf32>
    %52 = arith.addf %50, %51 : vector<32x32xf32>
    %c0_22 = arith.constant 0 : index
    %c0_23 = arith.constant 0 : index
    %c0_24 = arith.constant 0 : index
    %53 = vector.load %arg12[%c0_22, %c0_23, %c0_24] : memref<2x6x32xf32, #tpu.memory_space<vmem>>, vector<1x6x32xf32>
    %54 = vector.shape_cast %53 : vector<1x6x32xf32> to vector<6x32xf32>
    %c0_25 = arith.constant 0 : index
    %c0_26 = arith.constant 0 : index
    %c0_27 = arith.constant 0 : index
    %55 = vector.load %arg6[%c0_25, %c0_26, %c0_27] : memref<2x32x96xf32, #tpu.memory_space<vmem>>, vector<1x32x96xf32>
    %56 = vector.shape_cast %55 : vector<1x32x96xf32> to vector<32x96xf32>
    %cst_28 = arith.constant dense<0.000000e+00> : vector<32x96xf32>
    %57 = tpu.matmul %52, %56, %cst_28 {dimension_numbers = #tpu.dot_dimension_numbers<[1], [0], [0], [1], [0, 0, 1, 1], [], []>} : vector<32x32xf32>, vector<32x96xf32>, vector<32x96xf32> -> vector<32x96xf32>
    %c0_29 = arith.constant 0 : index
    %c0_30 = arith.constant 0 : index
    %c0_31 = arith.constant 0 : index
    %58 = vector.load %arg7[%c0_29, %c0_30, %c0_31] : memref<2x1x96xf32, #tpu.memory_space<vmem>>, vector<1x1x96xf32>
    %59 = vector.shape_cast %58 : vector<1x1x96xf32> to vector<1x96xf32>
    %60 = vector.broadcast %59 : vector<1x96xf32> to vector<32x96xf32>
    %61 = arith.addf %57, %60 : vector<32x96xf32>
    %62 = vector.extract_strided_slice %61 {offsets = [0, 0], sizes = [32, 32], strides = [1, 1]} : vector<32x96xf32> to vector<32x32xf32>
    %63 = vector.extract_strided_slice %61 {offsets = [0, 32], sizes = [32, 32], strides = [1, 1]} : vector<32x96xf32> to vector<32x32xf32>
    %64 = vector.extract_strided_slice %61 {offsets = [0, 64], sizes = [32, 32], strides = [1, 1]} : vector<32x96xf32> to vector<32x32xf32>
    %65 = vector.extract_strided_slice %62 {offsets = [0, 0], sizes = [32, 16], strides = [1, 1]} : vector<32x32xf32> to vector<32x16xf32>
    %66 = vector.shape_cast %65 : vector<32x16xf32> to vector<4x8x16xf32>
    %67 = vector.extract_strided_slice %63 {offsets = [0, 0], sizes = [32, 16], strides = [1, 1]} : vector<32x32xf32> to vector<32x16xf32>
    %68 = vector.shape_cast %67 : vector<32x16xf32> to vector<4x8x16xf32>
    %69 = vector.extract_strided_slice %64 {offsets = [0, 0], sizes = [32, 16], strides = [1, 1]} : vector<32x32xf32> to vector<32x16xf32>
    %70 = vector.shape_cast %69 : vector<32x16xf32> to vector<4x8x16xf32>
    "tpu.trace_start"() <{level = 10 : i32, message = "bqd,bkd->bqk"}> : () -> ()
    %cst_32 = arith.constant dense<0.000000e+00> : vector<4x8x8xf32>
    %71 = tpu.matmul %66, %68, %cst_32 {dimension_numbers = #tpu.dot_dimension_numbers<[2], [2], [1], [1], [0, 0, 0, 1, 1, 1], [0], [0]>} : vector<4x8x16xf32>, vector<4x8x16xf32>, vector<4x8x8xf32> -> vector<4x8x8xf32>
    "tpu.trace_stop"() : () -> ()
    %cst_33 = arith.constant 2.500000e-01 : f32
    %72 = vector.broadcast %cst_33 : f32 to vector<4x8x8xf32>
    %73 = arith.mulf %71, %72 : vector<4x8x8xf32>
    %74 = vector.broadcast %28 : vector<4x1x8xf32> to vector<4x8x8xf32>
    %75 = arith.addf %73, %74 : vector<4x8x8xf32>
    %cst_34 = arith.constant dense<0xFF800000> : vector<4x8xf32>
    %76 = vector.multi_reduction <maximumf>, %75, %cst_34 [2] : vector<4x8x8xf32> to vector<4x8xf32>
    %77 = vector.shape_cast %76 : vector<4x8xf32> to vector<4x8x1xf32>
    %78 = vector.broadcast %77 : vector<4x8x1xf32> to vector<4x8x8xf32>
    %79 = arith.subf %75, %78 : vector<4x8x8xf32>
    %80 = math.exp %79 : vector<4x8x8xf32>
    %cst_35 = arith.constant dense<0.000000e+00> : vector<4x8xf32>
    %81 = vector.multi_reduction <add>, %80, %cst_35 [2] : vector<4x8x8xf32> to vector<4x8xf32>
    %82 = vector.shape_cast %81 : vector<4x8xf32> to vector<4x8x1xf32>
    %83 = tpu.reciprocal %82 {approx = true} : vector<4x8x1xf32> -> vector<4x8x1xf32>
    %84 = vector.broadcast %83 : vector<4x8x1xf32> to vector<4x8x8xf32>
    %85 = arith.mulf %80, %84 : vector<4x8x8xf32>
    "tpu.trace_start"() <{level = 10 : i32, message = "bqk,bkd->bqd"}> : () -> ()
    %cst_36 = arith.constant dense<0.000000e+00> : vector<4x8x16xf32>
    %86 = tpu.matmul %85, %70, %cst_36 {dimension_numbers = #tpu.dot_dimension_numbers<[2], [1], [1], [2], [0, 0, 0, 1, 1, 2], [0], [0]>} : vector<4x8x8xf32>, vector<4x8x16xf32>, vector<4x8x16xf32> -> vector<4x8x16xf32>
    "tpu.trace_stop"() : () -> ()
    %87 = vector.shape_cast %86 : vector<4x8x16xf32> to vector<32x16xf32>
    %88 = vector.extract_strided_slice %62 {offsets = [0, 16], sizes = [32, 16], strides = [1, 1]} : vector<32x32xf32> to vector<32x16xf32>
    %89 = vector.shape_cast %88 : vector<32x16xf32> to vector<4x8x16xf32>
    %90 = vector.extract_strided_slice %63 {offsets = [0, 16], sizes = [32, 16], strides = [1, 1]} : vector<32x32xf32> to vector<32x16xf32>
    %91 = vector.shape_cast %90 : vector<32x16xf32> to vector<4x8x16xf32>
    %92 = vector.extract_strided_slice %64 {offsets = [0, 16], sizes = [32, 16], strides = [1, 1]} : vector<32x32xf32> to vector<32x16xf32>
    %93 = vector.shape_cast %92 : vector<32x16xf32> to vector<4x8x16xf32>
    "tpu.trace_start"() <{level = 10 : i32, message = "bqd,bkd->bqk"}> : () -> ()
    %cst_37 = arith.constant dense<0.000000e+00> : vector<4x8x8xf32>
    %94 = tpu.matmul %89, %91, %cst_37 {dimension_numbers = #tpu.dot_dimension_numbers<[2], [2], [1], [1], [0, 0, 0, 1, 1, 1], [0], [0]>} : vector<4x8x16xf32>, vector<4x8x16xf32>, vector<4x8x8xf32> -> vector<4x8x8xf32>
    "tpu.trace_stop"() : () -> ()
    %cst_38 = arith.constant 2.500000e-01 : f32
    %95 = vector.broadcast %cst_38 : f32 to vector<4x8x8xf32>
    %96 = arith.mulf %94, %95 : vector<4x8x8xf32>
    %97 = vector.broadcast %28 : vector<4x1x8xf32> to vector<4x8x8xf32>
    %98 = arith.addf %96, %97 : vector<4x8x8xf32>
    %cst_39 = arith.constant dense<0xFF800000> : vector<4x8xf32>
    %99 = vector.multi_reduction <maximumf>, %98, %cst_39 [2] : vector<4x8x8xf32> to vector<4x8xf32>
    %100 = vector.shape_cast %99 : vector<4x8xf32> to vector<4x8x1xf32>
    %101 = vector.broadcast %100 : vector<4x8x1xf32> to vector<4x8x8xf32>
    %102 = arith.subf %98, %101 : vector<4x8x8xf32>
    %103 = math.exp %102 : vector<4x8x8xf32>
    %cst_40 = arith.constant dense<0.000000e+00> : vector<4x8xf32>
    %104 = vector.multi_reduction <add>, %103, %cst_40 [2] : vector<4x8x8xf32> to vector<4x8xf32>
    %105 = vector.shape_cast %104 : vector<4x8xf32> to vector<4x8x1xf32>
    %106 = tpu.reciprocal %105 {approx = true} : vector<4x8x1xf32> -> vector<4x8x1xf32>
    %107 = vector.broadcast %106 : vector<4x8x1xf32> to vector<4x8x8xf32>
    %108 = arith.mulf %103, %107 : vector<4x8x8xf32>
    "tpu.trace_start"() <{level = 10 : i32, message = "bqk,bkd->bqd"}> : () -> ()
    %cst_41 = arith.constant dense<0.000000e+00> : vector<4x8x16xf32>
    %109 = tpu.matmul %108, %93, %cst_41 {dimension_numbers = #tpu.dot_dimension_numbers<[2], [1], [1], [2], [0, 0, 0, 1, 1, 2], [0], [0]>} : vector<4x8x8xf32>, vector<4x8x16xf32>, vector<4x8x16xf32> -> vector<4x8x16xf32>
    "tpu.trace_stop"() : () -> ()
    %110 = vector.shape_cast %109 : vector<4x8x16xf32> to vector<32x16xf32>
    %111 = tpu.concatenate %87, %110 in 1 : vector<32x16xf32>, vector<32x16xf32> -> vector<32x32xf32>
    %c0_42 = arith.constant 0 : index
    %c0_43 = arith.constant 0 : index
    %c0_44 = arith.constant 0 : index
    %112 = vector.load %arg8[%c0_42, %c0_43, %c0_44] : memref<2x32x32xf32, #tpu.memory_space<vmem>>, vector<1x32x32xf32>
    %113 = vector.shape_cast %112 : vector<1x32x32xf32> to vector<32x32xf32>
    %cst_45 = arith.constant dense<0.000000e+00> : vector<32x32xf32>
    %114 = tpu.matmul %111, %113, %cst_45 {dimension_numbers = #tpu.dot_dimension_numbers<[1], [0], [0], [1], [0, 0, 1, 1], [], []>} : vector<32x32xf32>, vector<32x32xf32>, vector<32x32xf32> -> vector<32x32xf32>
    %115 = vector.extract_strided_slice %54 {offsets = [0, 0], sizes = [1, 32], strides = [1, 1]} : vector<6x32xf32> to vector<1x32xf32>
    %116 = vector.broadcast %115 : vector<1x32xf32> to vector<32x32xf32>
    %117 = arith.addf %114, %116 : vector<32x32xf32>
    %118 = arith.addf %52, %117 : vector<32x32xf32>
    %119 = vector.extract_strided_slice %54 {offsets = [1, 0], sizes = [1, 32], strides = [1, 1]} : vector<6x32xf32> to vector<1x32xf32>
    %120 = vector.extract_strided_slice %54 {offsets = [2, 0], sizes = [1, 32], strides = [1, 1]} : vector<6x32xf32> to vector<1x32xf32>
    %cst_46 = arith.constant dense<0.000000e+00> : vector<32xf32>
    %121 = vector.multi_reduction <add>, %118, %cst_46 [1] : vector<32x32xf32> to vector<32xf32>
    %122 = vector.shape_cast %121 : vector<32xf32> to vector<32x1xf32>
    %cst_47 = arith.constant 3.200000e+01 : f32
    %123 = vector.broadcast %cst_47 : f32 to vector<32x1xf32>
    %124 = arith.divf %122, %123 : vector<32x1xf32>
    %125 = vector.broadcast %124 : vector<32x1xf32> to vector<32x32xf32>
    %126 = arith.subf %118, %125 : vector<32x32xf32>
    %127 = arith.mulf %126, %126 : vector<32x32xf32>
    %cst_48 = arith.constant dense<0.000000e+00> : vector<32xf32>
    %128 = vector.multi_reduction <add>, %127, %cst_48 [1] : vector<32x32xf32> to vector<32xf32>
    %129 = vector.shape_cast %128 : vector<32xf32> to vector<32x1xf32>
    %cst_49 = arith.constant 3.200000e+01 : f32
    %130 = vector.broadcast %cst_49 : f32 to vector<32x1xf32>
    %131 = arith.divf %129, %130 : vector<32x1xf32>
    %132 = vector.broadcast %124 : vector<32x1xf32> to vector<32x32xf32>
    %133 = arith.subf %118, %132 : vector<32x32xf32>
    %cst_50 = arith.constant 9.99999996E-13 : f32
    %134 = vector.broadcast %cst_50 : f32 to vector<32x1xf32>
    %135 = arith.addf %131, %134 : vector<32x1xf32>
    %136 = math.rsqrt %135 : vector<32x1xf32>
    %137 = vector.broadcast %136 : vector<32x1xf32> to vector<32x32xf32>
    %138 = arith.mulf %133, %137 : vector<32x32xf32>
    %139 = vector.broadcast %119 : vector<1x32xf32> to vector<32x32xf32>
    %140 = arith.mulf %138, %139 : vector<32x32xf32>
    %141 = vector.broadcast %120 : vector<1x32xf32> to vector<32x32xf32>
    %142 = arith.addf %140, %141 : vector<32x32xf32>
    %c0_51 = arith.constant 0 : index
    %c0_52 = arith.constant 0 : index
    %c0_53 = arith.constant 0 : index
    %143 = vector.load %arg9[%c0_51, %c0_52, %c0_53] : memref<2x32x64xf32, #tpu.memory_space<vmem>>, vector<1x32x64xf32>
    %144 = vector.shape_cast %143 : vector<1x32x64xf32> to vector<32x64xf32>
    %cst_54 = arith.constant dense<0.000000e+00> : vector<32x64xf32>
    %145 = tpu.matmul %142, %144, %cst_54 {dimension_numbers = #tpu.dot_dimension_numbers<[1], [0], [0], [1], [0, 0, 1, 1], [], []>} : vector<32x32xf32>, vector<32x64xf32>, vector<32x64xf32> -> vector<32x64xf32>
    %c0_55 = arith.constant 0 : index
    %c0_56 = arith.constant 0 : index
    %c0_57 = arith.constant 0 : index
    %146 = vector.load %arg10[%c0_55, %c0_56, %c0_57] : memref<2x1x64xf32, #tpu.memory_space<vmem>>, vector<1x1x64xf32>
    %147 = vector.shape_cast %146 : vector<1x1x64xf32> to vector<1x64xf32>
    %148 = vector.broadcast %147 : vector<1x64xf32> to vector<32x64xf32>
    %149 = arith.addf %145, %148 : vector<32x64xf32>
    %150 = arith.mulf %149, %149 : vector<32x64xf32>
    %151 = arith.mulf %149, %150 : vector<32x64xf32>
    %cst_58 = arith.constant 4.471500e-02 : f32
    %152 = vector.broadcast %cst_58 : f32 to vector<32x64xf32>
    %153 = arith.mulf %152, %151 : vector<32x64xf32>
    %154 = arith.addf %149, %153 : vector<32x64xf32>
    %cst_59 = arith.constant 0.797884583 : f32
    %155 = vector.broadcast %cst_59 : f32 to vector<32x64xf32>
    %156 = arith.mulf %155, %154 : vector<32x64xf32>
    %157 = math.tanh %156 : vector<32x64xf32>
    %cst_60 = arith.constant 1.000000e+00 : f32
    %158 = vector.broadcast %cst_60 : f32 to vector<32x64xf32>
    %159 = arith.addf %158, %157 : vector<32x64xf32>
    %cst_61 = arith.constant 5.000000e-01 : f32
    %160 = vector.broadcast %cst_61 : f32 to vector<32x64xf32>
    %161 = arith.mulf %160, %159 : vector<32x64xf32>
    %162 = arith.mulf %149, %161 : vector<32x64xf32>
    %c0_62 = arith.constant 0 : index
    %c0_63 = arith.constant 0 : index
    %c0_64 = arith.constant 0 : index
    %163 = vector.load %arg11[%c0_62, %c0_63, %c0_64] : memref<2x64x32xf32, #tpu.memory_space<vmem>>, vector<1x64x32xf32>
    %164 = vector.shape_cast %163 : vector<1x64x32xf32> to vector<64x32xf32>
    %cst_65 = arith.constant dense<0.000000e+00> : vector<32x32xf32>
    %165 = tpu.matmul %162, %164, %cst_65 {dimension_numbers = #tpu.dot_dimension_numbers<[1], [0], [0], [1], [0, 0, 1, 1], [], []>} : vector<32x64xf32>, vector<64x32xf32>, vector<32x32xf32> -> vector<32x32xf32>
    %166 = vector.extract_strided_slice %54 {offsets = [5, 0], sizes = [1, 32], strides = [1, 1]} : vector<6x32xf32> to vector<1x32xf32>
    %167 = vector.broadcast %166 : vector<1x32xf32> to vector<32x32xf32>
    %168 = arith.addf %165, %167 : vector<32x32xf32>
    %169 = arith.addf %142, %168 : vector<32x32xf32>
    %170 = vector.extract_strided_slice %54 {offsets = [3, 0], sizes = [1, 32], strides = [1, 1]} : vector<6x32xf32> to vector<1x32xf32>
    %171 = vector.extract_strided_slice %54 {offsets = [4, 0], sizes = [1, 32], strides = [1, 1]} : vector<6x32xf32> to vector<1x32xf32>
    %cst_66 = arith.constant dense<0.000000e+00> : vector<32xf32>
    %172 = vector.multi_reduction <add>, %169, %cst_66 [1] : vector<32x32xf32> to vector<32xf32>
    %173 = vector.shape_cast %172 : vector<32xf32> to vector<32x1xf32>
    %cst_67 = arith.constant 3.200000e+01 : f32
    %174 = vector.broadcast %cst_67 : f32 to vector<32x1xf32>
    %175 = arith.divf %173, %174 : vector<32x1xf32>
    %176 = vector.broadcast %175 : vector<32x1xf32> to vector<32x32xf32>
    %177 = arith.subf %169, %176 : vector<32x32xf32>
    %178 = arith.mulf %177, %177 : vector<32x32xf32>
    %cst_68 = arith.constant dense<0.000000e+00> : vector<32xf32>
    %179 = vector.multi_reduction <add>, %178, %cst_68 [1] : vector<32x32xf32> to vector<32xf32>
    %180 = vector.shape_cast %179 : vector<32xf32> to vector<32x1xf32>
    %cst_69 = arith.constant 3.200000e+01 : f32
    %181 = vector.broadcast %cst_69 : f32 to vector<32x1xf32>
    %182 = arith.divf %180, %181 : vector<32x1xf32>
    %183 = vector.broadcast %175 : vector<32x1xf32> to vector<32x32xf32>
    %184 = arith.subf %169, %183 : vector<32x32xf32>
    %cst_70 = arith.constant 9.99999996E-13 : f32
    %185 = vector.broadcast %cst_70 : f32 to vector<32x1xf32>
    %186 = arith.addf %182, %185 : vector<32x1xf32>
    %187 = math.rsqrt %186 : vector<32x1xf32>
    %188 = vector.broadcast %187 : vector<32x1xf32> to vector<32x32xf32>
    %189 = arith.mulf %184, %188 : vector<32x32xf32>
    %190 = vector.broadcast %170 : vector<1x32xf32> to vector<32x32xf32>
    %191 = arith.mulf %189, %190 : vector<32x32xf32>
    %192 = vector.broadcast %171 : vector<1x32xf32> to vector<32x32xf32>
    %193 = arith.addf %191, %192 : vector<32x32xf32>
    %c1_71 = arith.constant 1 : index
    %c0_72 = arith.constant 0 : index
    %c0_73 = arith.constant 0 : index
    %194 = vector.load %arg12[%c1_71, %c0_72, %c0_73] : memref<2x6x32xf32, #tpu.memory_space<vmem>>, vector<1x6x32xf32>
    %195 = vector.shape_cast %194 : vector<1x6x32xf32> to vector<6x32xf32>
    %c1_74 = arith.constant 1 : index
    %c0_75 = arith.constant 0 : index
    %c0_76 = arith.constant 0 : index
    %196 = vector.load %arg6[%c1_74, %c0_75, %c0_76] : memref<2x32x96xf32, #tpu.memory_space<vmem>>, vector<1x32x96xf32>
    %197 = vector.shape_cast %196 : vector<1x32x96xf32> to vector<32x96xf32>
    %cst_77 = arith.constant dense<0.000000e+00> : vector<32x96xf32>
    %198 = tpu.matmul %193, %197, %cst_77 {dimension_numbers = #tpu.dot_dimension_numbers<[1], [0], [0], [1], [0, 0, 1, 1], [], []>} : vector<32x32xf32>, vector<32x96xf32>, vector<32x96xf32> -> vector<32x96xf32>
    %c1_78 = arith.constant 1 : index
    %c0_79 = arith.constant 0 : index
    %c0_80 = arith.constant 0 : index
    %199 = vector.load %arg7[%c1_78, %c0_79, %c0_80] : memref<2x1x96xf32, #tpu.memory_space<vmem>>, vector<1x1x96xf32>
    %200 = vector.shape_cast %199 : vector<1x1x96xf32> to vector<1x96xf32>
    %201 = vector.broadcast %200 : vector<1x96xf32> to vector<32x96xf32>
    %202 = arith.addf %198, %201 : vector<32x96xf32>
    %203 = vector.extract_strided_slice %202 {offsets = [0, 0], sizes = [32, 32], strides = [1, 1]} : vector<32x96xf32> to vector<32x32xf32>
    %204 = vector.extract_strided_slice %202 {offsets = [0, 32], sizes = [32, 32], strides = [1, 1]} : vector<32x96xf32> to vector<32x32xf32>
    %205 = vector.extract_strided_slice %202 {offsets = [0, 64], sizes = [32, 32], strides = [1, 1]} : vector<32x96xf32> to vector<32x32xf32>
    %206 = vector.extract_strided_slice %203 {offsets = [0, 0], sizes = [32, 16], strides = [1, 1]} : vector<32x32xf32> to vector<32x16xf32>
    %207 = vector.shape_cast %206 : vector<32x16xf32> to vector<4x8x16xf32>
    %208 = vector.extract_strided_slice %204 {offsets = [0, 0], sizes = [32, 16], strides = [1, 1]} : vector<32x32xf32> to vector<32x16xf32>
    %209 = vector.shape_cast %208 : vector<32x16xf32> to vector<4x8x16xf32>
    %210 = vector.extract_strided_slice %205 {offsets = [0, 0], sizes = [32, 16], strides = [1, 1]} : vector<32x32xf32> to vector<32x16xf32>
    %211 = vector.shape_cast %210 : vector<32x16xf32> to vector<4x8x16xf32>
    "tpu.trace_start"() <{level = 10 : i32, message = "bqd,bkd->bqk"}> : () -> ()
    %cst_81 = arith.constant dense<0.000000e+00> : vector<4x8x8xf32>
    %212 = tpu.matmul %207, %209, %cst_81 {dimension_numbers = #tpu.dot_dimension_numbers<[2], [2], [1], [1], [0, 0, 0, 1, 1, 1], [0], [0]>} : vector<4x8x16xf32>, vector<4x8x16xf32>, vector<4x8x8xf32> -> vector<4x8x8xf32>
    "tpu.trace_stop"() : () -> ()
    %cst_82 = arith.constant 2.500000e-01 : f32
    %213 = vector.broadcast %cst_82 : f32 to vector<4x8x8xf32>
    %214 = arith.mulf %212, %213 : vector<4x8x8xf32>
    %215 = vector.broadcast %28 : vector<4x1x8xf32> to vector<4x8x8xf32>
    %216 = arith.addf %214, %215 : vector<4x8x8xf32>
    %cst_83 = arith.constant dense<0xFF800000> : vector<4x8xf32>
    %217 = vector.multi_reduction <maximumf>, %216, %cst_83 [2] : vector<4x8x8xf32> to vector<4x8xf32>
    %218 = vector.shape_cast %217 : vector<4x8xf32> to vector<4x8x1xf32>
    %219 = vector.broadcast %218 : vector<4x8x1xf32> to vector<4x8x8xf32>
    %220 = arith.subf %216, %219 : vector<4x8x8xf32>
    %221 = math.exp %220 : vector<4x8x8xf32>
    %cst_84 = arith.constant dense<0.000000e+00> : vector<4x8xf32>
    %222 = vector.multi_reduction <add>, %221, %cst_84 [2] : vector<4x8x8xf32> to vector<4x8xf32>
    %223 = vector.shape_cast %222 : vector<4x8xf32> to vector<4x8x1xf32>
    %224 = tpu.reciprocal %223 {approx = true} : vector<4x8x1xf32> -> vector<4x8x1xf32>
    %225 = vector.broadcast %224 : vector<4x8x1xf32> to vector<4x8x8xf32>
    %226 = arith.mulf %221, %225 : vector<4x8x8xf32>
    "tpu.trace_start"() <{level = 10 : i32, message = "bqk,bkd->bqd"}> : () -> ()
    %cst_85 = arith.constant dense<0.000000e+00> : vector<4x8x16xf32>
    %227 = tpu.matmul %226, %211, %cst_85 {dimension_numbers = #tpu.dot_dimension_numbers<[2], [1], [1], [2], [0, 0, 0, 1, 1, 2], [0], [0]>} : vector<4x8x8xf32>, vector<4x8x16xf32>, vector<4x8x16xf32> -> vector<4x8x16xf32>
    "tpu.trace_stop"() : () -> ()
    %228 = vector.shape_cast %227 : vector<4x8x16xf32> to vector<32x16xf32>
    %229 = vector.extract_strided_slice %203 {offsets = [0, 16], sizes = [32, 16], strides = [1, 1]} : vector<32x32xf32> to vector<32x16xf32>
    %230 = vector.shape_cast %229 : vector<32x16xf32> to vector<4x8x16xf32>
    %231 = vector.extract_strided_slice %204 {offsets = [0, 16], sizes = [32, 16], strides = [1, 1]} : vector<32x32xf32> to vector<32x16xf32>
    %232 = vector.shape_cast %231 : vector<32x16xf32> to vector<4x8x16xf32>
    %233 = vector.extract_strided_slice %205 {offsets = [0, 16], sizes = [32, 16], strides = [1, 1]} : vector<32x32xf32> to vector<32x16xf32>
    %234 = vector.shape_cast %233 : vector<32x16xf32> to vector<4x8x16xf32>
    "tpu.trace_start"() <{level = 10 : i32, message = "bqd,bkd->bqk"}> : () -> ()
    %cst_86 = arith.constant dense<0.000000e+00> : vector<4x8x8xf32>
    %235 = tpu.matmul %230, %232, %cst_86 {dimension_numbers = #tpu.dot_dimension_numbers<[2], [2], [1], [1], [0, 0, 0, 1, 1, 1], [0], [0]>} : vector<4x8x16xf32>, vector<4x8x16xf32>, vector<4x8x8xf32> -> vector<4x8x8xf32>
    "tpu.trace_stop"() : () -> ()
    %cst_87 = arith.constant 2.500000e-01 : f32
    %236 = vector.broadcast %cst_87 : f32 to vector<4x8x8xf32>
    %237 = arith.mulf %235, %236 : vector<4x8x8xf32>
    %238 = vector.broadcast %28 : vector<4x1x8xf32> to vector<4x8x8xf32>
    %239 = arith.addf %237, %238 : vector<4x8x8xf32>
    %cst_88 = arith.constant dense<0xFF800000> : vector<4x8xf32>
    %240 = vector.multi_reduction <maximumf>, %239, %cst_88 [2] : vector<4x8x8xf32> to vector<4x8xf32>
    %241 = vector.shape_cast %240 : vector<4x8xf32> to vector<4x8x1xf32>
    %242 = vector.broadcast %241 : vector<4x8x1xf32> to vector<4x8x8xf32>
    %243 = arith.subf %239, %242 : vector<4x8x8xf32>
    %244 = math.exp %243 : vector<4x8x8xf32>
    %cst_89 = arith.constant dense<0.000000e+00> : vector<4x8xf32>
    %245 = vector.multi_reduction <add>, %244, %cst_89 [2] : vector<4x8x8xf32> to vector<4x8xf32>
    %246 = vector.shape_cast %245 : vector<4x8xf32> to vector<4x8x1xf32>
    %247 = tpu.reciprocal %246 {approx = true} : vector<4x8x1xf32> -> vector<4x8x1xf32>
    %248 = vector.broadcast %247 : vector<4x8x1xf32> to vector<4x8x8xf32>
    %249 = arith.mulf %244, %248 : vector<4x8x8xf32>
    "tpu.trace_start"() <{level = 10 : i32, message = "bqk,bkd->bqd"}> : () -> ()
    %cst_90 = arith.constant dense<0.000000e+00> : vector<4x8x16xf32>
    %250 = tpu.matmul %249, %234, %cst_90 {dimension_numbers = #tpu.dot_dimension_numbers<[2], [1], [1], [2], [0, 0, 0, 1, 1, 2], [0], [0]>} : vector<4x8x8xf32>, vector<4x8x16xf32>, vector<4x8x16xf32> -> vector<4x8x16xf32>
    "tpu.trace_stop"() : () -> ()
    %251 = vector.shape_cast %250 : vector<4x8x16xf32> to vector<32x16xf32>
    %252 = tpu.concatenate %228, %251 in 1 : vector<32x16xf32>, vector<32x16xf32> -> vector<32x32xf32>
    %c1_91 = arith.constant 1 : index
    %c0_92 = arith.constant 0 : index
    %c0_93 = arith.constant 0 : index
    %253 = vector.load %arg8[%c1_91, %c0_92, %c0_93] : memref<2x32x32xf32, #tpu.memory_space<vmem>>, vector<1x32x32xf32>
    %254 = vector.shape_cast %253 : vector<1x32x32xf32> to vector<32x32xf32>
    %cst_94 = arith.constant dense<0.000000e+00> : vector<32x32xf32>
    %255 = tpu.matmul %252, %254, %cst_94 {dimension_numbers = #tpu.dot_dimension_numbers<[1], [0], [0], [1], [0, 0, 1, 1], [], []>} : vector<32x32xf32>, vector<32x32xf32>, vector<32x32xf32> -> vector<32x32xf32>
    %256 = vector.extract_strided_slice %195 {offsets = [0, 0], sizes = [1, 32], strides = [1, 1]} : vector<6x32xf32> to vector<1x32xf32>
    %257 = vector.broadcast %256 : vector<1x32xf32> to vector<32x32xf32>
    %258 = arith.addf %255, %257 : vector<32x32xf32>
    %259 = arith.addf %193, %258 : vector<32x32xf32>
    %260 = vector.extract_strided_slice %195 {offsets = [1, 0], sizes = [1, 32], strides = [1, 1]} : vector<6x32xf32> to vector<1x32xf32>
    %261 = vector.extract_strided_slice %195 {offsets = [2, 0], sizes = [1, 32], strides = [1, 1]} : vector<6x32xf32> to vector<1x32xf32>
    %cst_95 = arith.constant dense<0.000000e+00> : vector<32xf32>
    %262 = vector.multi_reduction <add>, %259, %cst_95 [1] : vector<32x32xf32> to vector<32xf32>
    %263 = vector.shape_cast %262 : vector<32xf32> to vector<32x1xf32>
    %cst_96 = arith.constant 3.200000e+01 : f32
    %264 = vector.broadcast %cst_96 : f32 to vector<32x1xf32>
    %265 = arith.divf %263, %264 : vector<32x1xf32>
    %266 = vector.broadcast %265 : vector<32x1xf32> to vector<32x32xf32>
    %267 = arith.subf %259, %266 : vector<32x32xf32>
    %268 = arith.mulf %267, %267 : vector<32x32xf32>
    %cst_97 = arith.constant dense<0.000000e+00> : vector<32xf32>
    %269 = vector.multi_reduction <add>, %268, %cst_97 [1] : vector<32x32xf32> to vector<32xf32>
    %270 = vector.shape_cast %269 : vector<32xf32> to vector<32x1xf32>
    %cst_98 = arith.constant 3.200000e+01 : f32
    %271 = vector.broadcast %cst_98 : f32 to vector<32x1xf32>
    %272 = arith.divf %270, %271 : vector<32x1xf32>
    %273 = vector.broadcast %265 : vector<32x1xf32> to vector<32x32xf32>
    %274 = arith.subf %259, %273 : vector<32x32xf32>
    %cst_99 = arith.constant 9.99999996E-13 : f32
    %275 = vector.broadcast %cst_99 : f32 to vector<32x1xf32>
    %276 = arith.addf %272, %275 : vector<32x1xf32>
    %277 = math.rsqrt %276 : vector<32x1xf32>
    %278 = vector.broadcast %277 : vector<32x1xf32> to vector<32x32xf32>
    %279 = arith.mulf %274, %278 : vector<32x32xf32>
    %280 = vector.broadcast %260 : vector<1x32xf32> to vector<32x32xf32>
    %281 = arith.mulf %279, %280 : vector<32x32xf32>
    %282 = vector.broadcast %261 : vector<1x32xf32> to vector<32x32xf32>
    %283 = arith.addf %281, %282 : vector<32x32xf32>
    %c1_100 = arith.constant 1 : index
    %c0_101 = arith.constant 0 : index
    %c0_102 = arith.constant 0 : index
    %284 = vector.load %arg9[%c1_100, %c0_101, %c0_102] : memref<2x32x64xf32, #tpu.memory_space<vmem>>, vector<1x32x64xf32>
    %285 = vector.shape_cast %284 : vector<1x32x64xf32> to vector<32x64xf32>
    %cst_103 = arith.constant dense<0.000000e+00> : vector<32x64xf32>
    %286 = tpu.matmul %283, %285, %cst_103 {dimension_numbers = #tpu.dot_dimension_numbers<[1], [0], [0], [1], [0, 0, 1, 1], [], []>} : vector<32x32xf32>, vector<32x64xf32>, vector<32x64xf32> -> vector<32x64xf32>
    %c1_104 = arith.constant 1 : index
    %c0_105 = arith.constant 0 : index
    %c0_106 = arith.constant 0 : index
    %287 = vector.load %arg10[%c1_104, %c0_105, %c0_106] : memref<2x1x64xf32, #tpu.memory_space<vmem>>, vector<1x1x64xf32>
    %288 = vector.shape_cast %287 : vector<1x1x64xf32> to vector<1x64xf32>
    %289 = vector.broadcast %288 : vector<1x64xf32> to vector<32x64xf32>
    %290 = arith.addf %286, %289 : vector<32x64xf32>
    %291 = arith.mulf %290, %290 : vector<32x64xf32>
    %292 = arith.mulf %290, %291 : vector<32x64xf32>
    %cst_107 = arith.constant 4.471500e-02 : f32
    %293 = vector.broadcast %cst_107 : f32 to vector<32x64xf32>
    %294 = arith.mulf %293, %292 : vector<32x64xf32>
    %295 = arith.addf %290, %294 : vector<32x64xf32>
    %cst_108 = arith.constant 0.797884583 : f32
    %296 = vector.broadcast %cst_108 : f32 to vector<32x64xf32>
    %297 = arith.mulf %296, %295 : vector<32x64xf32>
    %298 = math.tanh %297 : vector<32x64xf32>
    %cst_109 = arith.constant 1.000000e+00 : f32
    %299 = vector.broadcast %cst_109 : f32 to vector<32x64xf32>
    %300 = arith.addf %299, %298 : vector<32x64xf32>
    %cst_110 = arith.constant 5.000000e-01 : f32
    %301 = vector.broadcast %cst_110 : f32 to vector<32x64xf32>
    %302 = arith.mulf %301, %300 : vector<32x64xf32>
    %303 = arith.mulf %290, %302 : vector<32x64xf32>
    %c1_111 = arith.constant 1 : index
    %c0_112 = arith.constant 0 : index
    %c0_113 = arith.constant 0 : index
    %304 = vector.load %arg11[%c1_111, %c0_112, %c0_113] : memref<2x64x32xf32, #tpu.memory_space<vmem>>, vector<1x64x32xf32>
    %305 = vector.shape_cast %304 : vector<1x64x32xf32> to vector<64x32xf32>
    %cst_114 = arith.constant dense<0.000000e+00> : vector<32x32xf32>
    %306 = tpu.matmul %303, %305, %cst_114 {dimension_numbers = #tpu.dot_dimension_numbers<[1], [0], [0], [1], [0, 0, 1, 1], [], []>} : vector<32x64xf32>, vector<64x32xf32>, vector<32x32xf32> -> vector<32x32xf32>
    %307 = vector.extract_strided_slice %195 {offsets = [5, 0], sizes = [1, 32], strides = [1, 1]} : vector<6x32xf32> to vector<1x32xf32>
    %308 = vector.broadcast %307 : vector<1x32xf32> to vector<32x32xf32>
    %309 = arith.addf %306, %308 : vector<32x32xf32>
    %310 = arith.addf %283, %309 : vector<32x32xf32>
    %311 = vector.extract_strided_slice %195 {offsets = [3, 0], sizes = [1, 32], strides = [1, 1]} : vector<6x32xf32> to vector<1x32xf32>
    %312 = vector.extract_strided_slice %195 {offsets = [4, 0], sizes = [1, 32], strides = [1, 1]} : vector<6x32xf32> to vector<1x32xf32>
    %cst_115 = arith.constant dense<0.000000e+00> : vector<32xf32>
    %313 = vector.multi_reduction <add>, %310, %cst_115 [1] : vector<32x32xf32> to vector<32xf32>
    %314 = vector.shape_cast %313 : vector<32xf32> to vector<32x1xf32>
    %cst_116 = arith.constant 3.200000e+01 : f32
    %315 = vector.broadcast %cst_116 : f32 to vector<32x1xf32>
    %316 = arith.divf %314, %315 : vector<32x1xf32>
    %317 = vector.broadcast %316 : vector<32x1xf32> to vector<32x32xf32>
    %318 = arith.subf %310, %317 : vector<32x32xf32>
    %319 = arith.mulf %318, %318 : vector<32x32xf32>
    %cst_117 = arith.constant dense<0.000000e+00> : vector<32xf32>
    %320 = vector.multi_reduction <add>, %319, %cst_117 [1] : vector<32x32xf32> to vector<32xf32>
    %321 = vector.shape_cast %320 : vector<32xf32> to vector<32x1xf32>
    %cst_118 = arith.constant 3.200000e+01 : f32
    %322 = vector.broadcast %cst_118 : f32 to vector<32x1xf32>
    %323 = arith.divf %321, %322 : vector<32x1xf32>
    %324 = vector.broadcast %316 : vector<32x1xf32> to vector<32x32xf32>
    %325 = arith.subf %310, %324 : vector<32x32xf32>
    %cst_119 = arith.constant 9.99999996E-13 : f32
    %326 = vector.broadcast %cst_119 : f32 to vector<32x1xf32>
    %327 = arith.addf %323, %326 : vector<32x1xf32>
    %328 = math.rsqrt %327 : vector<32x1xf32>
    %329 = vector.broadcast %328 : vector<32x1xf32> to vector<32x32xf32>
    %330 = arith.mulf %325, %329 : vector<32x32xf32>
    %331 = vector.broadcast %311 : vector<1x32xf32> to vector<32x32xf32>
    %332 = arith.mulf %330, %331 : vector<32x32xf32>
    %333 = vector.broadcast %312 : vector<1x32xf32> to vector<32x32xf32>
    %334 = arith.addf %332, %333 : vector<32x32xf32>
    %335 = vector.shape_cast %334 : vector<32x32xf32> to vector<4x8x32xf32>
    %336 = vector.extract_strided_slice %335 {offsets = [0, 0, 0], sizes = [4, 1, 32], strides = [1, 1, 1]} : vector<4x8x32xf32> to vector<4x1x32xf32>
    %337 = vector.shape_cast %336 : vector<4x1x32xf32> to vector<4x32xf32>
    %c0_120 = arith.constant 0 : index
    %c0_121 = arith.constant 0 : index
    %338 = vector.load %arg13[%c0_120, %c0_121] : memref<32x32xf32, #tpu.memory_space<vmem>>, vector<32x32xf32>
    %cst_122 = arith.constant dense<0.000000e+00> : vector<4x32xf32>
    %339 = tpu.matmul %337, %338, %cst_122 {dimension_numbers = #tpu.dot_dimension_numbers<[1], [0], [0], [1], [0, 0, 1, 1], [], []>} : vector<4x32xf32>, vector<32x32xf32>, vector<4x32xf32> -> vector<4x32xf32>
    %c0_123 = arith.constant 0 : index
    %c0_124 = arith.constant 0 : index
    %340 = vector.load %arg14[%c0_123, %c0_124] : memref<1x32xf32, #tpu.memory_space<vmem>>, vector<1x32xf32>
    %341 = vector.broadcast %340 : vector<1x32xf32> to vector<4x32xf32>
    %342 = arith.addf %339, %341 : vector<4x32xf32>
    %343 = math.tanh %342 : vector<4x32xf32>
    %344 = vector.extract_strided_slice %343 {offsets = [0, 0], sizes = [2, 32], strides = [1, 1]} : vector<4x32xf32> to vector<2x32xf32>
    %345 = vector.extract_strided_slice %343 {offsets = [2, 0], sizes = [2, 32], strides = [1, 1]} : vector<4x32xf32> to vector<2x32xf32>
    %346 = arith.subf %344, %345 : vector<2x32xf32>
    %347 = math.absf %346 : vector<2x32xf32>
    %c0_125 = arith.constant 0 : index
    %c0_126 = arith.constant 0 : index
    %348 = vector.load %arg15[%c0_125, %c0_126] : memref<96x48xf32, #tpu.memory_space<vmem>>, vector<32x48xf32>
    %cst_127 = arith.constant dense<0.000000e+00> : vector<2x48xf32>
    %349 = tpu.matmul %344, %348, %cst_127 {dimension_numbers = #tpu.dot_dimension_numbers<[1], [0], [0], [1], [0, 0, 1, 1], [], []>} : vector<2x32xf32>, vector<32x48xf32>, vector<2x48xf32> -> vector<2x48xf32>
    %c32 = arith.constant 32 : index
    %c0_128 = arith.constant 0 : index
    %350 = vector.load %arg15[%c32, %c0_128] : memref<96x48xf32, #tpu.memory_space<vmem>>, vector<32x48xf32>
    %cst_129 = arith.constant dense<0.000000e+00> : vector<2x48xf32>
    %351 = tpu.matmul %345, %350, %cst_129 {dimension_numbers = #tpu.dot_dimension_numbers<[1], [0], [0], [1], [0, 0, 1, 1], [], []>} : vector<2x32xf32>, vector<32x48xf32>, vector<2x48xf32> -> vector<2x48xf32>
    %352 = arith.addf %349, %351 : vector<2x48xf32>
    %c64 = arith.constant 64 : index
    %c0_130 = arith.constant 0 : index
    %353 = vector.load %arg15[%c64, %c0_130] : memref<96x48xf32, #tpu.memory_space<vmem>>, vector<32x48xf32>
    %cst_131 = arith.constant dense<0.000000e+00> : vector<2x48xf32>
    %354 = tpu.matmul %347, %353, %cst_131 {dimension_numbers = #tpu.dot_dimension_numbers<[1], [0], [0], [1], [0, 0, 1, 1], [], []>} : vector<2x32xf32>, vector<32x48xf32>, vector<2x48xf32> -> vector<2x48xf32>
    %355 = arith.addf %352, %354 : vector<2x48xf32>
    %c0_132 = arith.constant 0 : index
    %c0_133 = arith.constant 0 : index
    %356 = vector.load %arg16[%c0_132, %c0_133] : memref<1x48xf32, #tpu.memory_space<vmem>>, vector<1x48xf32>
    %357 = vector.broadcast %356 : vector<1x48xf32> to vector<2x48xf32>
    %358 = arith.addf %355, %357 : vector<2x48xf32>
    %cst_134 = arith.constant dense<0.000000e+00> : vector<48xf32>
    %359 = vector.multi_reduction <add>, %358, %cst_134 [0] : vector<2x48xf32> to vector<48xf32>
    %360 = vector.shape_cast %359 : vector<48xf32> to vector<1x48xf32>
    %cst_135 = arith.constant 2.000000e+00 : f32
    %361 = vector.broadcast %cst_135 : f32 to vector<1x48xf32>
    %362 = arith.divf %360, %361 : vector<1x48xf32>
    %363 = vector.broadcast %362 : vector<1x48xf32> to vector<2x48xf32>
    %364 = arith.subf %358, %363 : vector<2x48xf32>
    %365 = arith.mulf %364, %364 : vector<2x48xf32>
    %cst_136 = arith.constant dense<0.000000e+00> : vector<48xf32>
    %366 = vector.multi_reduction <add>, %365, %cst_136 [0] : vector<2x48xf32> to vector<48xf32>
    %367 = vector.shape_cast %366 : vector<48xf32> to vector<1x48xf32>
    %cst_137 = arith.constant 2.000000e+00 : f32
    %368 = vector.broadcast %cst_137 : f32 to vector<1x48xf32>
    %369 = arith.divf %367, %368 : vector<1x48xf32>
    %370 = vector.broadcast %362 : vector<1x48xf32> to vector<2x48xf32>
    %371 = arith.subf %358, %370 : vector<2x48xf32>
    %cst_138 = arith.constant 9.99999974E-6 : f32
    %372 = vector.broadcast %cst_138 : f32 to vector<1x48xf32>
    %373 = arith.addf %369, %372 : vector<1x48xf32>
    %374 = math.rsqrt %373 : vector<1x48xf32>
    %375 = vector.broadcast %374 : vector<1x48xf32> to vector<2x48xf32>
    %376 = arith.mulf %371, %375 : vector<2x48xf32>
    %c0_139 = arith.constant 0 : index
    %c0_140 = arith.constant 0 : index
    %377 = vector.load %arg17[%c0_139, %c0_140] : memref<1x48xf32, #tpu.memory_space<vmem>>, vector<1x48xf32>
    %378 = vector.broadcast %377 : vector<1x48xf32> to vector<2x48xf32>
    %379 = arith.mulf %376, %378 : vector<2x48xf32>
    %c0_141 = arith.constant 0 : index
    %c0_142 = arith.constant 0 : index
    %380 = vector.load %arg18[%c0_141, %c0_142] : memref<1x48xf32, #tpu.memory_space<vmem>>, vector<1x48xf32>
    %381 = vector.broadcast %380 : vector<1x48xf32> to vector<2x48xf32>
    %382 = arith.addf %379, %381 : vector<2x48xf32>
    %cst_143 = arith.constant 0.000000e+00 : f32
    %383 = vector.broadcast %cst_143 : f32 to vector<2x48xf32>
    %384 = arith.maximumf %382, %383 : vector<2x48xf32>
    %c0_144 = arith.constant 0 : index
    %c0_145 = arith.constant 0 : index
    %385 = vector.load %arg19[%c0_144, %c0_145] : memref<48x2xf32, #tpu.memory_space<vmem>>, vector<48x2xf32>
    %cst_146 = arith.constant dense<0.000000e+00> : vector<2x2xf32>
    %386 = tpu.matmul %384, %385, %cst_146 {dimension_numbers = #tpu.dot_dimension_numbers<[1], [0], [0], [1], [0, 0, 1, 1], [], []>} : vector<2x48xf32>, vector<48x2xf32>, vector<2x2xf32> -> vector<2x2xf32>
    %c0_147 = arith.constant 0 : index
    %c0_148 = arith.constant 0 : index
    %387 = vector.load %arg20[%c0_147, %c0_148] : memref<1x2xf32, #tpu.memory_space<vmem>>, vector<1x2xf32>
    %388 = vector.broadcast %387 : vector<1x2xf32> to vector<2x2xf32>
    %389 = arith.addf %386, %388 : vector<2x2xf32>
    %c0_149 = arith.constant 0 : index
    %c0_150 = arith.constant 0 : index
    %390 = vector.load %arg21[%c0_149, %c0_150] : memref<2x2xf32, #tpu.memory_space<vmem>>, vector<2x2xf32>
    tpu.vector_store %arg21[%c0_149, %c0_150], %389 {strides = array<i32>} : memref<2x2xf32, #tpu.memory_space<vmem>>, vector<2x2xf32>,
    %cst_151 = arith.constant dense<0xFF800000> : vector<2xf32>
    %391 = vector.multi_reduction <maximumf>, %389, %cst_151 [1] : vector<2x2xf32> to vector<2xf32>
    %392 = vector.shape_cast %391 : vector<2xf32> to vector<2x1xf32>
    %393 = vector.broadcast %392 : vector<2x1xf32> to vector<2x2xf32>
    %394 = arith.subf %389, %393 : vector<2x2xf32>
    %395 = math.exp %394 : vector<2x2xf32>
    %cst_152 = arith.constant dense<0.000000e+00> : vector<2xf32>
    %396 = vector.multi_reduction <add>, %395, %cst_152 [1] : vector<2x2xf32> to vector<2xf32>
    %397 = vector.shape_cast %396 : vector<2xf32> to vector<2x1xf32>
    %398 = vector.broadcast %397 : vector<2x1xf32> to vector<2x2xf32>
    %399 = arith.divf %395, %398 : vector<2x2xf32>
    %c0_153 = arith.constant 0 : index
    %c0_154 = arith.constant 0 : index
    %400 = vector.load %arg22[%c0_153, %c0_154] : memref<2x2xf32, #tpu.memory_space<vmem>>, vector<2x2xf32>
    tpu.vector_store %arg22[%c0_153, %c0_154], %399 {strides = array<i32>} : memref<2x2xf32, #tpu.memory_space<vmem>>, vector<2x2xf32>,
    return
  }
}

</mosaic_0001>

<bundles_post_ra>
// kernel: sbert_forward.1
= control target key start
LH: loop header
LB: loop body
LE: loop exit
PB: predicated region body
PF: predicated region fallthrough
CT: control target
= control target key end

     0   :  { %s6691_s0 = inlined_call_operand.vmem [shape: s32[2,8], index: 0, kind: input, shape index: {}]   ;;  %s6692_s1 = inlined_call_operand.vmem [shape: s32[2,8], index: 1, kind: input, shape index: {}]   ;;  %s6693_s2 = inlined_call_operand.vmem [shape: s32[32,1], index: 2, kind: input, shape index: {}]   ;;  %s6694_s3 = inlined_call_operand.vmem [shape: f32[100,32], index: 3, kind: input, shape index: {}]   ;;  %s6695_s4 = inlined_call_operand.vmem [shape: f32[32,32], index: 4, kind: input, shape index: {}]   ;;  %s6696_s5 = inlined_call_operand.vmem [shape: f32[2,32], index: 5, kind: input, shape index: {}]   ;;  %s6697_s6 = inlined_call_operand.vmem [shape: f32[2,32,96], index: 6, kind: input, shape index: {}]   ;;  %s6698_s7 = inlined_call_operand.vmem [shape: f32[2,1,96], index: 7, kind: input, shape index: {}]   ;;  %s6699_s8 = inlined_call_operand.vmem [shape: f32[2,32,32], index: 8, kind: input, shape index: {}]   ;;  %s6700_s9 = inlined_call_operand.vmem [shape: f32[2,32,64], index: 9, kind: input, shape index: {}]   ;;  %s6701_s10 = inlined_call_operand.vmem [shape: f32[2,1,64], index: 10, kind: input, shape index: {}]   ;;  %s6702_s11 = inlined_call_operand.vmem [shape: f32[2,64,32], index: 11, kind: input, shape index: {}]   ;;  %s6703_s12 = inlined_call_operand.vmem [shape: f32[2,6,32], index: 12, kind: input, shape index: {}]   ;;  %s6704_s13 = inlined_call_operand.vmem [shape: f32[32,32], index: 13, kind: input, shape index: {}]   ;;  %s6705_s14 = inlined_call_operand.vmem [shape: f32[1,32], index: 14, kind: input, shape index: {}]   ;;  %s6706_s15 = inlined_call_operand.vmem [shape: f32[96,48], index: 15, kind: input, shape index: {}]   ;;  %s6707_s16 = inlined_call_operand.vmem [shape: f32[1,48], index: 16, kind: input, shape index: {}]   ;;  %s6708_s17 = inlined_call_operand.vmem [shape: f32[1,48], index: 17, kind: input, shape index: {}]   ;;  %s6709_s18 = inlined_call_operand.vmem [shape: f32[1,48], index: 18, kind: input, shape index: {}]   ;;  %s6710_s19 = inlined_call_operand.vmem [shape: f32[48,2], index: 19, kind: input, shape index: {}]   ;;  %s6711_s20 = inlined_call_operand.vmem [shape: f32[1,2], index: 20, kind: input, shape index: {}]   ;;  %s6712_s21 = inlined_call_operand.hbm [shape: f32[2,2], index: 21, kind: output, shape index: {0}]   ;;  %s6713_s22 = inlined_call_operand.hbm [shape: f32[2,2], index: 22, kind: output, shape index: {1}]  }
   0x1   :  { %6718 = sst [smem:[#allocation8_spill]] %s6691_s0 }
   0x2   :  { %6719 = sst [smem:[#allocation9_spill]] %s6692_s1 }
   0x3   :  { %6720 = sst [smem:[#allocation10_spill]] %s6693_s2 }
   0x4   :  { %6721 = sst [smem:[#allocation11_spill]] %s6694_s3 }
   0x5   :  { %6722 = sst [smem:[#allocation12_spill]] %s6695_s4 }
   0x6   :  { %6723 = sst [smem:[#allocation13_spill]] %s6696_s5 }
   0x7   :  { %6724 = sst [smem:[#allocation14_spill]] %s6697_s6 }
   0x8   :  { %28 = vsyncpa [#allocation3], 0  ;;  %s6725_s29 = sld [smem:[#allocation10_spill]]  ;;  %vm128_vm0 = vcmask 1043456   ;;  %v5693_v2 = vmov 0  }
   0x9   :  { %5519 = vset.pattern.permute.xlu0 %v5693_v2  ;;  %5520 = vset.pattern.permute.xlu1 %v5693_v2  ;;  %s6726_s1 = sld [smem:[#allocation11_spill]] }
   0xe   :  { %v72_v0 = vld [vmem:[%s6725_s29] sm:$0xff]  ;;  %v74_v1 = vld [vmem:[%s6725_s29 + $0x10] sm:$0xff]  ;;  %v73_v5 = vld [vmem:[%s6725_s29 + $0x8] sm:$0xff] }
   0xf   :  { %v114_v3 = vld [vmem:[%s6726_s1 + $0x60] sm:$0xf]  ;;  %79 = vperm.xlu0 %5519, %v72_v0   ;;  %85 = vperm.xlu1 %5520, %v74_v1   ;;  %v113_v4 = vld [vmem:[%s6726_s1 + $0x58] sm:$0xff]  ;;  %v112_v7 = vld [vmem:[%s6726_s1 + $0x50] sm:$0xff] }
  0x10   :  { %v75_v6 = vld [vmem:[%s6725_s29 + $0x18] sm:$0xff]  ;;  %5119 = vmatprep.subr.msk.mxu0 %vm128_vm0, %v114_v3 }
  0x11   :  { %5120 = vmatpush3.msk.msra.mxu0 %vm128_vm0, %v114_v3 }
  0x12   :  { %5121 = vmatprep.subr.mxu0 %v113_v4 }
  0x13   :  { %29 = vsyncpa [#allocation5], 0  ;;  %82 = vperm.xlu0 %5519, %v73_v5   ;;  %88 = vperm.xlu1 %5520, %v75_v6   ;;  %v111_v8 = vld [vmem:[%s6726_s1 + $0x48] sm:$0xff]  ;;  %v110_v9 = vld [vmem:[%s6726_s1 + $0x40] sm:$0xff]  ;;  %v76_v18 = vlaneseq  ;;  %vm115_vm1 = vcmask 818176   ;;  %v5694_v22 = vmov 0.0  }
  0x14   :  { %5122 = vmatpush3.msra.mxu0 %v113_v4  ;;  %v109_v10 = vld [vmem:[%s6726_s1 + $0x38] sm:$0xff]  ;;  %v108_v11 = vld [vmem:[%s6726_s1 + $0x30] sm:$0xff]  ;;  %v107_v12 = vld [vmem:[%s6726_s1 + $0x28] sm:$0xff]  ;;  %s6727_s24 = sld [smem:[#allocation12_spill]]  ;;  %vm276_vm6 = vcmask 261120   ;;  %vm5695_vm7 = vmmov 0  }
  0x15   :  { %5123 = vmatprep.subr.mxu0 %v112_v7  ;;  %v106_v13 = vld [vmem:[%s6726_s1 + $0x20] sm:$0xff]  ;;  %v105_v14 = vld [vmem:[%s6726_s1 + $0x18] sm:$0xff]  ;;  %v104_v15 = vld [vmem:[%s6726_s1 + $0x10] sm:$0xff]  ;;  %v77_v19 = vand.u32 127, %v76_v18  ;;  %s6728_s26 = sld [smem:[#allocation14_spill]]  ;;  %s5696_s25 = smov 96  }
  0x16   :  { %5124 = vmatpush3.msra.mxu0 %v112_v7  ;;  %v103_v16 = vld [vmem:[%s6726_s1 + $0x8] sm:$0xff]  ;;  %v102_v17 = vld [vmem:[%s6726_s1] sm:$0xff]  ;;  %s6729_s23 = sld [smem:[#allocation13_spill]]  ;;  %vm458_vm8 = vcmask 130048   ;;  %vm792_vm11 = vcmask 64512   ;;  %s5699_s0 = smov 64  }
  0x17   :  { %5125 = vmatprep.subr.mxu0 %v111_v8  ;;  %s6730_s3 = sld [smem:[#allocation8_spill]]  ;;  %s5700_s29 = smov 80   ;;  %vm2162_vm12 = vcmask 523264   ;;  %vm4318_vm13 = vcmask 1041409   ;;  %vm4321_vm14 = vcmask 1042434   ;;  %vm4324_vm15 = vcmask 1043459  }
  0x18   :  { %5126 = vmatpush3.msra.mxu0 %v111_v8  ;;  %s6731_s4 = sld [smem:[#allocation9_spill]]  ;;  %s5702_s1 = smov 48   ;;  %vm4642_vm0 = vcmask 386048  }
  0x19   :  { %5127 = vmatprep.subr.mxu0 %v110_v9 }
  0x1a   :  { %5128 = vmatpush3.msra.mxu0 %v110_v9  ;;  %v217_v29 = vld [vmem:[%s6727_s24] sm:$0xff] }
  0x1b   :  { %5129 = vmatprep.subr.mxu0 %v109_v10  ;;  %v350_v62 = vld [vmem:[%s6728_s26 + $0x18] sm:$0xff]  ;;  %v349_v63 = vld [vmem:[%s6728_s26 + $0x10] sm:$0xff]  ;;  %v348_v0 = vld [vmem:[%s6728_s26 + $0x8] sm:$0xff] }
  0x1c   :  { %5130 = vmatpush3.msra.mxu0 %v109_v10  ;;  %5498 = vmatprep.subr.mxu1 %v350_v62  ;;  %v347_v1 = vld [vmem:[%s6728_s26] sm:$0xff] }
  0x1d   :  { %5131 = vmatprep.subr.mxu0 %v108_v11  ;;  %5502 = vmatpush3.msra.mxu1 %v350_v62 }
  0x1e   :  { %5132 = vmatpush3.msra.mxu0 %v108_v11  ;;  %5499 = vmatprep.subr.mxu1 %v349_v63 }
  0x1f   :  { %5133 = vmatprep.subr.mxu0 %v107_v12  ;;  %5503 = vmatpush3.msra.mxu1 %v349_v63 }
  0x20   :  { %5134 = vmatpush3.msra.mxu0 %v107_v12  ;;  %5500 = vmatprep.subr.mxu1 %v348_v0 }
  0x21   :  { %5135 = vmatprep.subr.mxu0 %v106_v13  ;;  %5504 = vmatpush3.msra.mxu1 %v348_v0 }
  0x22   :  { %5136 = vmatpush3.msra.mxu0 %v106_v13  ;;  %5501 = vmatprep.subr.mxu1 %v347_v1 }
  0x23   :  { %5137 = vmatprep.subr.mxu0 %v105_v14  ;;  %5505 = vmatpush3.msra.mxu1 %v347_v1 }
  0x24   :  { %5138 = vmatpush3.msra.mxu0 %v105_v14  ;;  %5165 = vmatprep.subr.mxu1 %v5694_v22 }
  0x25   :  { %5139 = vmatprep.subr.mxu0 %v104_v15 }
  0x26   :  { %5140 = vmatpush3.msra.mxu0 %v104_v15 }
  0x27   :  { %5141 = vmatprep.subr.mxu0 %v103_v16 }
  0x28   :  { %5142 = vmatpush3.msra.mxu0 %v103_v16  ;;  %v4820_v16 = vld [vmem:[%s6729_s23] ss:$0 sm:$0xff] }
  0x29   :  { %5143 = vmatprep.subr.mxu0 %v102_v17 }
  0x2a   :  { %5144 = vmatpush3.msra.mxu0 %v102_v17 }
  0x2b   :  { %5151 = vmatprep.subr.mxu0 %v350_v62 }
  0x8a   :  { %v80_v20 = vpop.permute.xlu0 %79  ;;  %v86_v21 = vpop.permute.xlu1 %85 }
  0x8b   :  { %vm90_vm2 = vcmp.eq.s32.totalorder %v77_v19, %v80_v20  ;;  %vm92_vm3 = vcmp.eq.s32.totalorder %v77_v19, %v86_v21  ;;  %v4821_v21 = vld [vmem:[%s6729_s23 + $0x1] ss:$0 sm:$0xff]  ;;  %s5701_s23 = smov 112  }
  0x8c   :  { %v4811_v23 = vsel %vm90_vm2, 1.0, %v5694_v22  ;;  %v4813_v26 = vsel %vm92_vm3, 1.0, %v5694_v22  ;;  %vm4769_vm2 = vcmask 9216  }
  0x8d   :  { %5145 = vmatprep.mubr.msk.f32.mxu0 %vm115_vm1, %v4811_v23 }
  0x8e   :  { %v83_v24 = vpop.permute.xlu0 %82  ;;  %v89_v25 = vpop.permute.xlu1 %88 }
  0x8f   :  { %vm91_vm4 = vcmp.eq.s32.totalorder %v77_v19, %v83_v24  ;;  %vm93_vm5 = vcmp.eq.s32.totalorder %v77_v19, %v89_v25 }
  0x90   :  { %v4812_v27 = vsel %vm91_vm4, 1.0, %v5694_v22  ;;  %v4814_v28 = vsel %vm93_vm5, 1.0, %v5694_v22 }
  0x91   :  { %5146 = vmatmul.mubr.msk.f32.vlgmr.msra.gmra.mxu0 %vm115_vm1, %v4812_v27 }
  0x92   :  { %5148 = vmatprep.mubr.msk.f32.mxu0 %vm115_vm1, %v4813_v26  ;;  %5152 = vmatpush3.msra.mxu0 %v350_v62 }
  0x93   :  { %5153 = vmatprep.subr.mxu0 %v349_v63 }
  0x94   :  { %5154 = vmatpush3.msra.mxu0 %v349_v63 }
  0x95   :  { %5149 = vmatmul.mubr.msk.f32.gmra.mxu0 %vm115_vm1, %v4814_v28  ;;  %5155 = vmatprep.subr.mxu0 %v348_v0  ;;  %vm4695_vm1 = vcmask 392192  }
  0x96   :  { %5156 = vmatpush3.msra.mxu0 %v348_v0 }
  0x97   :  { %5157 = vmatprep.subr.mxu0 %v347_v1 }
  0x98   :  { %5158 = vmatpush3.msra.mxu0 %v347_v1 }
  0x99   :  { %5190 = vmatprep.subr.mxu0 %v5694_v22 }
 0x151   :  { %v5147_v30 = vpop.f32.mrf.mxu0 }
 0x152   :  { %v219_v31 = vadd.f32 %v5147_v30, %v217_v29 }
 0x153   :  { %v198_v32 = vpop.f32.mrf.mxu0 }
 0x154   :  { %v218_v33 = vadd.f32 %v217_v29, %v198_v32  ;;  %v280_v34 = vsel %vm276_vm6, %v219_v31, 0.0 }
 0x155   :  { %281 = vadd.xlane.f32.xlu1 %v280_v34  ;;  %v5150_v35 = vpop.f32.mrf.mxu0  ;;  %v4822_v34 = vld [vmem:[%s6698_s7] ss:$0 sm:$0xff] }
 0x156   :  { %v277_v36 = vsel %vm276_vm6, %v218_v33, 0.0  ;;  %v221_v39 = vadd.f32 %v5150_v35, %v217_v29 }
 0x157   :  { %278 = vadd.xlane.f32.xlu0 %v277_v36  ;;  %v208_v37 = vpop.f32.mrf.mxu0 }
 0x158   :  { %v220_v38 = vadd.f32 %v217_v29, %v208_v37  ;;  %v286_v41 = vsel %vm276_vm6, %v221_v39, 0.0 }
 0x15a   :  { %v283_v40 = vsel %vm276_vm6, %v220_v38, 0.0 }
 0x15b   :  { %284 = vadd.xlane.f32.xlu0 %v283_v40 }
 0x15f   :  { %287 = vadd.xlane.f32.xlu0 %v286_v41 }
 0x1de   :  { %v282_v42 = vpop.xlane.xlu1 %281 }
 0x1df   :  { %v291_v43 = vmul.f32 0.03125, %v282_v42 }
 0x1e0   :  { %v279_v44 = vpop.xlane.xlu0 %278 }
 0x1e1   :  { %v295_v45 = vsub.f32 %v219_v31, %v291_v43  ;;  %v290_v46 = vmul.f32 0.03125, %v279_v44 }
 0x1e3   :  { %v294_v47 = vsub.f32 %v218_v33, %v290_v46  ;;  %v299_v48 = vmul.f32 %v295_v45, %v295_v45 }
 0x1e4   :  { %v285_v49 = vpop.xlane.xlu0 %284 }
 0x1e5   :  { %v292_v50 = vmul.f32 0.03125, %v285_v49  ;;  %v305_v51 = vsel %vm276_vm6, %v299_v48, 0.0  ;;  %v298_v52 = vmul.f32 %v294_v47, %v294_v47  ;;  %v222_v49 = vld [vmem:[%s6730_s3] sm:$0x3] }
 0x1e6   :  { %306 = vadd.xlane.f32.xlu0 %v305_v51  ;;  %vm223_vm9 = vcmp.ne.s32.totalorder %v222_v49, 0 }
 0x1e7   :  { %v296_v53 = vsub.f32 %v220_v38, %v292_v50  ;;  %v302_v54 = vsel %vm276_vm6, %v298_v52, 0.0  ;;  %v5975_v50 = vshrl.u32 %v76_v18, 7 }
 0x1e8   :  { %303 = vadd.xlane.f32.xlu1 %v302_v54  ;;  %v288_v55 = vpop.xlane.xlu0 %287 }
 0x1e9   :  { %v293_v56 = vmul.f32 0.03125, %v288_v55  ;;  %v300_v57 = vmul.f32 %v296_v53, %v296_v53  ;;  %v248_v55 = vld [vmem:[%s6731_s4] sm:$0x3]  ;;  %s5703_s4 = smov 16  }
 0x1ea   :  { %vm249_vm10 = vcmp.ne.s32.totalorder %v248_v55, 0 }
 0x1eb   :  { %v297_v58 = vsub.f32 %v221_v39, %v293_v56  ;;  %v308_v59 = vsel %vm276_vm6, %v300_v57, 0.0 }
 0x1ec   :  { %309 = vadd.xlane.f32.xlu1 %v308_v59 }
 0x1ed   :  { %v301_v60 = vmul.f32 %v297_v58, %v297_v58 }
 0x1ef   :  { %v311_v61 = vsel %vm276_vm6, %v301_v60, 0.0 }
 0x1f0   :  { %312 = vadd.xlane.f32.xlu0 %v311_v61 }
 0x26f   :  { %v307_v2 = vpop.xlane.xlu0 %306 }
 0x270   :  { %v315_v3 = vmul.f32 0.03125, %v307_v2 }
 0x271   :  { %v304_v4 = vpop.xlane.xlu1 %303 }
 0x272   :  { %v319_v5 = vadd.f32 1e-12, %v315_v3  ;;  %v314_v6 = vmul.f32 0.03125, %v304_v4 }
 0x274   :  { %5521 = vrsqrt.f32 %v319_v5  ;;  %v318_v7 = vadd.f32 1e-12, %v314_v6 }
 0x275   :  { %v310_v8 = vpop.xlane.xlu1 %309 }
 0x276   :  { %5523 = vrsqrt.f32 %v318_v7  ;;  %v316_v9 = vmul.f32 0.03125, %v310_v8 }
 0x278   :  { %v320_v10 = vadd.f32 1e-12, %v316_v9 }
 0x279   :  { %v313_v11 = vpop.xlane.xlu0 %312 }
 0x27a   :  { %5525 = vrsqrt.f32 %v320_v10  ;;  %v317_v12 = vmul.f32 0.03125, %v313_v11 }
 0x27c   :  { %v321_v13 = vadd.f32 1e-12, %v317_v12 }
 0x27e   :  { %5527 = vrsqrt.f32 %v321_v13 }
 0x281   :  { %v5522_v14 = vpop.eup %5521 }
 0x282   :  { %v327_v15 = vmul.f32 %v5522_v14, %v295_v45 }
 0x283   :  { %v5524_v17 = vpop.eup %5523 }
 0x284   :  { %v326_v19 = vmul.f32 %v5524_v17, %v294_v47  ;;  %v335_v20 = vmul.f32 %v4820_v16, %v327_v15  ;;  %v5697_v47 = vmov 1966171168  }
 0x285   :  { %v227_v48 = vunpack.c.l.s4 %v5697_v47 }
 0x286   :  { %v334_v23 = vmul.f32 %v4820_v16, %v326_v19  ;;  %v5910_v27 = vadd.f32 %v4821_v21, %v335_v20 }
 0x287   :  { %v5526_v24 = vpop.eup %5525  ;;  %v228_v51 = vunpack.c.0.s8 %v227_v48 }
 0x288   :  { %v5908_v25 = vadd.f32 %v4821_v21, %v334_v23  ;;  %v328_v26 = vmul.f32 %v5526_v24, %v296_v53  ;;  %v5698_v53 = vmov -10000.0  }
 0x289   :  { %v231_v52 = vsub.s32 %v228_v51, %v5975_v50  ;;  %v224_v54 = vsel %vm223_vm9, 0.0, %v5698_v53  ;;  %v250_v60 = vsel %vm249_vm10, 0.0, %v5698_v53 }
 0x28a   :  { %5159 = vmatprep.mubr.msk.f32.mxu0 %vm276_vm6, %v5908_v25  ;;  %v336_v28 = vmul.f32 %v4820_v16, %v328_v26 }
 0x28b   :  { %v5528_v29 = vpop.eup %5527  ;;  %5160 = vmatmul.mubr.msk.f32.vlgmr.msra.gmra.mxu0 %vm276_vm6, %v5910_v27  ;;  %v232_v56 = vrot.slane %v224_v54, %v231_v52  ;;  %v258_v62 = vrot.slane %v250_v60, %v231_v52 }
 0x28c   :  { %v5916_v30 = vadd.f32 %v4821_v21, %v336_v28  ;;  %v329_v31 = vmul.f32 %v5528_v29, %v297_v58  ;;  %5192 = vmatprep.mubr.msk.f32.mxu0 %vm5695_vm7, %v5694_v22  ;;  %v5982_v58 = vsub.s32 0, %v5975_v50 }
 0x28d   :  { %v240_v57 = vrot.slane %v232_v56, %v231_v52  ;;  %v233_v59 = vcombine.high %v232_v56, %v232_v56  ;;  %v266_v4 = vrot.slane %v258_v62, %v231_v52  ;;  %v259_v5 = vcombine.high %v258_v62, %v258_v62 }
 0x28e   :  { %5162 = vmatprep.mubr.msk.f32.mxu1 %vm276_vm6, %v5916_v30  ;;  %v337_v32 = vmul.f32 %v4820_v16, %v329_v31 }
 0x28f   :  { %v5985_v18 = vrot.slane %v240_v57, %v5982_v58  ;;  %v247_v61 = vrot.slane %v233_v59, %v231_v52  ;;  %v5994_v11 = vrot.slane %v266_v4, %v5982_v58  ;;  %v273_v12 = vrot.slane %v259_v5, %v231_v52 }
 0x290   :  { %v5920_v33 = vadd.f32 %v4821_v21, %v337_v32 }
 0x291   :  { %v5989_v3 = vrot.slane %v247_v61, %v5982_v58  ;;  %v5999_v19 = vrot.slane %v273_v12, %v5982_v58 }
 0x292   :  { %5163 = vmatmul.mubr.msk.f32.vlgmr.msra.gmra.mxu1 %vm276_vm6, %v5920_v33 }
 0x293   :  { %5167 = vmatprep.mubr.msk.f32.mxu1 %vm5695_vm7, %v5694_v22 }
 0x34b   :  { %v5161_v35 = vpop.f32.mrf.mxu0 }
 0x34c   :  { %v5931_v36 = vadd.f32 %v5161_v35, %v4822_v34 }
 0x34d   :  { %v436_v37 = vpop.f32.mrf.mxu0 }
 0x34e   :  { %v5933_v38 = vadd.f32 %v4822_v34, %v436_v37  ;;  %534 = vrot.lane.b32.xlu0 %v5931_v36, %s5696_s25 }
 0x350   :  { %456 = vrot.lane.b32.xlu1 %v5933_v38, %s5696_s25 }
 0x352   :  { %v5164_v39 = vpop.f32.mrf.mxu1 }
 0x353   :  { %v5943_v42 = vadd.f32 %v5164_v39, %v4822_v34 }
 0x354   :  { %v446_v40 = vpop.f32.mrf.mxu1 }
 0x355   :  { %v5939_v41 = vadd.f32 %v4822_v34, %v446_v40 }
 0x357   :  { %611 = vrot.lane.b32.xlu1 %v5939_v41, %s5696_s25 }
 0x35b   :  { %688 = vrot.lane.b32.xlu1 %v5943_v42, %s5696_s25 }
 0x3c0   :  { %v535_v44 = vpop.permute.xlu0 %534 }
 0x3c2   :  { %v457_v43 = vpop.permute.xlu1 %456 }
 0x3c3   :  { %5166 = vmatpush3.xpose.msk.msra.mxu1 %vm458_vm8, %v457_v43 }
 0x3c4   :  { %5170 = vmatprep.subr.mxu1 %v5694_v22 }
 0x3c6   :  { %5168 = vmatmul.mubr.msk.f32.vlgmr.msra.gmra.mxu1 %vm458_vm8, %v5933_v38 }
 0x3c7   :  { %5171 = vmatpush3.xpose.msk.msra.mxu1 %vm458_vm8, %v535_v44  ;;  %5172 = vmatprep.mubr.msk.f32.mxu1 %vm5695_vm7, %v5694_v22 }
 0x3c8   :  { %5175 = vmatprep.subr.mxu1 %v5694_v22 }
 0x3c9   :  { %v612_v45 = vpop.permute.xlu1 %611 }
 0x3ca   :  { %5173 = vmatmul.mubr.msk.f32.vlgmr.msra.gmra.mxu1 %vm458_vm8, %v5931_v36 }
 0x3cb   :  { %5176 = vmatpush3.xpose.msk.msra.mxu1 %vm458_vm8, %v612_v45  ;;  %5177 = vmatprep.mubr.msk.f32.mxu1 %vm5695_vm7, %v5694_v22 }
 0x3cc   :  { %5180 = vmatprep.subr.mxu1 %v5694_v22 }
 0x3cd   :  { %v689_v46 = vpop.permute.xlu1 %688 }
 0x3ce   :  { %5178 = vmatmul.mubr.msk.f32.vlgmr.msra.gmra.mxu1 %vm458_vm8, %v5939_v41 }
 0x3cf   :  { %5181 = vmatpush3.xpose.msk.msra.mxu1 %vm458_vm8, %v689_v46  ;;  %5182 = vmatprep.mubr.msk.f32.mxu1 %vm5695_vm7, %v5694_v22 }
 0x3d0   :  { %5185 = vmatprep.subr.mxu1 %v5694_v22 }
 0x3d2   :  { %5183 = vmatmul.mubr.msk.f32.vlgmr.msra.gmra.mxu1 %vm458_vm8, %v5943_v42 }
 0x3d3   :  { %5187 = vmatprep.mubr.msk.f32.mxu1 %vm5695_vm7, %v5694_v22 }
 0x486   :  { %v529_v63 = vpop.f32.mrf.mxu1 }
 0x487   :  { %v764_v0 = vmul.f32 0.25, %v529_v63 }
 0x488   :  { %v5169_v1 = vpop.f32.mrf.mxu1 }
 0x489   :  { %v788_v2 = vadd.f32 %v5985_v18, %v764_v0 }
 0x48a   :  { %v606_v6 = vpop.f32.mrf.mxu1 }
 0x48b   :  { %v765_v7 = vmul.f32 0.25, %v606_v6  ;;  %v793_v8 = vsel %vm792_vm11, %v788_v2, -inf }
 0x48c   :  { %794 = vmax.xlane.f32.xlu0 %v793_v8  ;;  %v5174_v9 = vpop.f32.mrf.mxu1 }
 0x48d   :  { %v789_v10 = vadd.f32 %v5989_v3, %v765_v7 }
 0x48e   :  { %v683_v13 = vpop.f32.mrf.mxu1 }
 0x48f   :  { %v766_v14 = vmul.f32 0.25, %v683_v13  ;;  %v796_v15 = vsel %vm792_vm11, %v789_v10, -inf }
 0x490   :  { %797 = vmax.xlane.f32.xlu1 %v796_v15  ;;  %v5179_v16 = vpop.f32.mrf.mxu1 }
 0x491   :  { %v790_v17 = vadd.f32 %v5994_v11, %v766_v14 }
 0x492   :  { %v760_v20 = vpop.f32.mrf.mxu1 }
 0x493   :  { %v767_v21 = vmul.f32 0.25, %v760_v20  ;;  %v799_v23 = vsel %vm792_vm11, %v790_v17, -inf }
 0x494   :  { %800 = vmax.xlane.f32.xlu0 %v799_v23  ;;  %v5184_v24 = vpop.f32.mrf.mxu1 }
 0x495   :  { %v791_v26 = vadd.f32 %v5999_v19, %v767_v21 }
 0x497   :  { %v802_v28 = vsel %vm792_vm11, %v791_v26, -inf }
 0x498   :  { %803 = vmax.xlane.f32.xlu0 %v802_v28 }
 0x4a1   :  { %837 = vrot.lane.b32.xlu1 %v5933_v38, %s5699_s0 }
 0x4a5   :  { %989 = vrot.lane.b32.xlu1 %v5939_v41, %s5699_s0 }
 0x4a9   :  { %1065 = vrot.lane.b32.xlu1 %v5943_v42, %s5699_s0 }
 0x4ad   :  { %1221 = vrot.lane.b32.xlu1 %v5931_v36, %s5700_s29 }
 0x4ae   :  { %913 = vrot.lane.b32.xlu0 %v5931_v36, %s5699_s0 }
 0x4b2   :  { %1143 = vrot.lane.b32.xlu0 %v5933_v38, %s5700_s29 }
 0x515   :  { %v795_v29 = vpop.xlane.xlu0 %794 }
 0x516   :  { %v805_v31 = vsub.f32 %v788_v2, %v795_v29 }
 0x518   :  { %v809_v32 = vmul.f32 1.442695, %v805_v31 }
 0x519   :  { %v798_v34 = vpop.xlane.xlu1 %797 }
 0x51a   :  { %5529 = vpow2.f32 %v809_v32  ;;  %v806_v35 = vsub.f32 %v789_v10, %v798_v34 }
 0x51c   :  { %v811_v37 = vmul.f32 1.442695, %v806_v35 }
 0x51d   :  { %v838_v39 = vpop.permute.xlu1 %837  ;;  %v801_v40 = vpop.xlane.xlu0 %800 }
 0x51e   :  { %5531 = vpow2.f32 %v811_v37  ;;  %v807_v43 = vsub.f32 %v790_v17, %v801_v40  ;;  %5186 = vmatpush3.msra.mxu1 %v838_v39 }
 0x51f   :  { %5195 = vmatprep.subr.mxu1 %v5694_v22 }
 0x520   :  { %v813_v44 = vmul.f32 1.442695, %v807_v43 }
 0x521   :  { %v804_v45 = vpop.xlane.xlu0 %803  ;;  %v990_v59 = vpop.permute.xlu1 %989 }
 0x522   :  { %5533 = vpow2.f32 %v813_v44  ;;  %v808_v46 = vsub.f32 %v791_v26, %v804_v45 }
 0x524   :  { %v815_v47 = vmul.f32 1.442695, %v808_v46 }
 0x525   :  { %v914_v48 = vpop.permute.xlu0 %913  ;;  %v1066_v60 = vpop.permute.xlu1 %1065 }
 0x526   :  { %5535 = vpow2.f32 %v815_v47  ;;  %5191 = vmatpush3.msra.mxu0 %v914_v48 }
 0x527   :  { %v5530_v49 = vpop.eup %5529  ;;  %5200 = vmatprep.subr.mxu0 %v5694_v22 }
 0x528   :  { %v817_v51 = vsel %vm792_vm11, %v5530_v49, 0.0 }
 0x529   :  { %818 = vadd.xlane.f32.xlu1 %v817_v51  ;;  %v1222_v61 = vpop.permute.xlu1 %1221  ;;  %v1144_v62 = vpop.permute.xlu0 %1143 }
 0x52b   :  { %v5532_v52 = vpop.eup %5531 }
 0x52c   :  { %v820_v53 = vsel %vm792_vm11, %v5532_v52, 0.0 }
 0x52d   :  { %821 = vadd.xlane.f32.xlu0 %v820_v53 }
 0x52f   :  { %v5534_v54 = vpop.eup %5533 }
 0x530   :  { %v823_v55 = vsel %vm792_vm11, %v5534_v54, 0.0 }
 0x531   :  { %824 = vadd.xlane.f32.xlu1 %v823_v55 }
 0x533   :  { %v5536_v56 = vpop.eup %5535 }
 0x534   :  { %v826_v57 = vsel %vm792_vm11, %v5536_v56, 0.0 }
 0x535   :  { %827 = vadd.xlane.f32.xlu0 %v826_v57 }
 0x542   :  { %1219 = vrot.lane.b32.xlu1 %v5931_v36, %s5701_s23 }
 0x546   :  { %1377 = vrot.lane.b32.xlu1 %v5943_v42, %s5700_s29 }
 0x54a   :  { %1375 = vrot.lane.b32.xlu1 %v5943_v42, %s5701_s23 }
 0x54b   :  { %1141 = vrot.lane.b32.xlu0 %v5933_v38, %s5701_s23 }
 0x54f   :  { %1299 = vrot.lane.b32.xlu0 %v5939_v41, %s5700_s29 }
 0x553   :  { %1297 = vrot.lane.b32.xlu0 %v5939_v41, %s5701_s23 }
 0x5b2   :  { %v819_v63 = vpop.xlane.xlu1 %818 }
 0x5b3   :  { %5537 = vrcp.f32 %v819_v63 }
 0x5b6   :  { %v822_v0 = vpop.xlane.xlu0 %821 }
 0x5b7   :  { %5539 = vrcp.f32 %v822_v0 }
 0x5ba   :  { %v825_v1 = vpop.xlane.xlu1 %824 }
 0x5bb   :  { %5541 = vrcp.f32 %v825_v1 }
 0x5be   :  { %v828_v2 = vpop.xlane.xlu0 %827  ;;  %v1220_v12 = vpop.permute.xlu1 %1219 }
 0x5bf   :  { %5543 = vrcp.f32 %v828_v2 }
 0x5c0   :  { %v5538_v4 = vpop.eup %5537 }
 0x5c1   :  { %v833_v5 = vmul.f32 %v5538_v4, %v5530_v49 }
 0x5c2   :  { %v1142_v8 = vpop.permute.xlu0 %1141  ;;  %v1378_v16 = vpop.permute.xlu1 %1377 }
 0x5c3   :  { %5188 = vmatmul.mubr.msk.f32.vlgmr.msra.gmra.mxu1 %vm792_vm11, %v833_v5 }
 0x5c4   :  { %v5540_v6 = vpop.eup %5539  ;;  %5196 = vmatpush3.msra.mxu1 %v990_v59  ;;  %5197 = vmatprep.mubr.msk.f32.mxu1 %vm5695_vm7, %v5694_v22 }
 0x5c5   :  { %v834_v7 = vmul.f32 %v5540_v6, %v5532_v52  ;;  %5205 = vmatprep.subr.mxu1 %v5694_v22 }
 0x5c6   :  { %v1300_v14 = vpop.permute.xlu0 %1299  ;;  %v1376_v20 = vpop.permute.xlu1 %1375 }
 0x5c7   :  { %5193 = vmatmul.mubr.msk.f32.vlgmr.msra.gmra.mxu0 %vm792_vm11, %v834_v7 }
 0x5c8   :  { %v5542_v9 = vpop.eup %5541  ;;  %5201 = vmatpush3.msra.mxu0 %v1066_v60  ;;  %5202 = vmatprep.mubr.msk.f32.mxu0 %vm5695_vm7, %v5694_v22 }
 0x5c9   :  { %v835_v10 = vmul.f32 %v5542_v9, %v5534_v54  ;;  %5210 = vmatprep.subr.mxu0 %v5694_v22 }
 0x5ca   :  { %v1298_v17 = vpop.permute.xlu0 %1297 }
 0x5cb   :  { %5198 = vmatmul.mubr.msk.f32.vlgmr.msra.gmra.mxu1 %vm792_vm11, %v835_v10 }
 0x5cc   :  { %v5544_v13 = vpop.eup %5543  ;;  %5206 = vmatpush3.xpose.msk.msra.mxu1 %vm458_vm8, %v1144_v62  ;;  %5207 = vmatprep.mubr.msk.f32.mxu1 %vm5695_vm7, %v5694_v22 }
 0x5cd   :  { %5215 = vmatprep.subr.mxu1 %v5694_v22  ;;  %v836_v15 = vmul.f32 %v5544_v13, %v5536_v56 }
 0x5cf   :  { %5203 = vmatmul.mubr.msk.f32.vlgmr.msra.gmra.mxu0 %vm792_vm11, %v836_v15  ;;  %5208 = vmatmul.mubr.msk.f32.vlgmr.msra.gmra.mxu1 %vm458_vm8, %v1142_v8 }
 0x5d0   :  { %5211 = vmatpush3.xpose.msk.msra.mxu0 %vm458_vm8, %v1222_v61  ;;  %5216 = vmatpush3.xpose.msk.msra.mxu1 %vm458_vm8, %v1300_v14 }
 0x5d1   :  { %5212 = vmatprep.mubr.msk.f32.mxu0 %vm5695_vm7, %v5694_v22  ;;  %5217 = vmatprep.mubr.msk.f32.mxu1 %vm5695_vm7, %v5694_v22 }
 0x5d2   :  { %5220 = vmatprep.subr.mxu0 %v5694_v22  ;;  %5225 = vmatprep.subr.mxu1 %v5694_v22 }
 0x5d3   :  { %5213 = vmatmul.mubr.msk.f32.vlgmr.msra.gmra.mxu0 %vm458_vm8, %v1220_v12  ;;  %5218 = vmatmul.mubr.msk.f32.vlgmr.msra.gmra.mxu1 %vm458_vm8, %v1298_v17 }
 0x5d4   :  { %5221 = vmatpush3.xpose.msk.msra.mxu0 %vm458_vm8, %v1378_v16  ;;  %5222 = vmatprep.mubr.msk.f32.mxu0 %vm5695_vm7, %v5694_v22 }
 0x5d5   :  { %5230 = vmatprep.subr.mxu0 %v5694_v22  ;;  %5227 = vmatprep.mubr.msk.f32.mxu1 %vm5695_vm7, %v5694_v22 }
 0x5d7   :  { %5223 = vmatmul.mubr.msk.f32.vlgmr.msra.gmra.mxu0 %vm458_vm8, %v1376_v20 }
 0x5d8   :  { %5232 = vmatprep.mubr.msk.f32.mxu0 %vm5695_vm7, %v5694_v22 }
 0x683   :  { %v6068_v21 = vpop.f32.mrf.mxu1 }
 0x685   :  { %v5189_v23 = vpop.f32.mrf.mxu1 }
 0x687   :  { %v6070_v24 = vpop.f32.mrf.mxu0 }
 0x689   :  { %v5194_v26 = vpop.f32.mrf.mxu0 }
 0x68b   :  { %v6072_v28 = vpop.f32.mrf.mxu1 }
 0x68d   :  { %v5199_v29 = vpop.f32.mrf.mxu1 }
 0x68f   :  { %v6074_v31 = vpop.f32.mrf.mxu0  ;;  %v1215_v32 = vpop.f32.mrf.mxu1 }
 0x690   :  { %v1453_v34 = vmul.f32 0.25, %v1215_v32 }
 0x691   :  { %v5204_v35 = vpop.f32.mrf.mxu0  ;;  %v5209_v37 = vpop.f32.mrf.mxu1 }
 0x692   :  { %v1457_v39 = vadd.f32 %v1453_v34, %v5985_v18 }
 0x693   :  { %v1293_v40 = vpop.f32.mrf.mxu0  ;;  %v1371_v43 = vpop.f32.mrf.mxu1 }
 0x694   :  { %v1454_v44 = vmul.f32 0.25, %v1293_v40  ;;  %v1455_v45 = vmul.f32 0.25, %v1371_v43  ;;  %v1461_v46 = vsel %vm792_vm11, %v1457_v39, -inf }
 0x695   :  { %v5214_v47 = vpop.f32.mrf.mxu0  ;;  %1462 = vmax.xlane.f32.xlu0 %v1461_v46  ;;  %v5219_v48 = vpop.f32.mrf.mxu1  ;;  %v1831_v46 = vld [vmem:[%s6699_s8 + $0x10] sm:$0xff] }
 0x696   :  { %v1458_v49 = vadd.f32 %v1454_v44, %v5989_v3  ;;  %v1459_v51 = vadd.f32 %v1455_v45, %v5994_v11  ;;  %v1832_v45 = vld [vmem:[%s6699_s8 + $0x18] sm:$0xff]  ;;  %v1830_v47 = vld [vmem:[%s6699_s8 + $0x8] sm:$0xff]  ;;  %v1829_v48 = vld [vmem:[%s6699_s8] sm:$0xff] }
 0x697   :  { %v1449_v52 = vpop.f32.mrf.mxu0 }
 0x698   :  { %v1456_v53 = vmul.f32 0.25, %v1449_v52  ;;  %v1464_v54 = vsel %vm792_vm11, %v1458_v49, -inf  ;;  %v1467_v55 = vsel %vm792_vm11, %v1459_v51, -inf }
 0x699   :  { %1465 = vmax.xlane.f32.xlu1 %v1464_v54  ;;  %v5224_v56 = vpop.f32.mrf.mxu0  ;;  %1468 = vmax.xlane.f32.xlu0 %v1467_v55 }
 0x69a   :  { %v1460_v57 = vadd.f32 %v1456_v53, %v5999_v19 }
 0x69c   :  { %v1470_v59 = vsel %vm792_vm11, %v1460_v57, -inf }
 0x69d   :  { %1471 = vmax.xlane.f32.xlu0 %v1470_v59 }
 0x6aa   :  { %1505 = vrot.lane.b32.xlu1 %v5933_v38, %s5702_s1 }
 0x71e   :  { %v1463_v60 = vpop.xlane.xlu0 %1462 }
 0x71f   :  { %v1473_v61 = vsub.f32 %v1457_v39, %v1463_v60 }
 0x721   :  { %v1477_v62 = vmul.f32 1.442695, %v1473_v61 }
 0x722   :  { %v1466_v63 = vpop.xlane.xlu1 %1465  ;;  %v1469_v0 = vpop.xlane.xlu0 %1468 }
 0x723   :  { %5545 = vpow2.f32 %v1477_v62  ;;  %v1474_v1 = vsub.f32 %v1458_v49, %v1466_v63  ;;  %v1475_v2 = vsub.f32 %v1459_v51, %v1469_v0 }
 0x725   :  { %v1479_v4 = vmul.f32 1.442695, %v1474_v1  ;;  %v1481_v5 = vmul.f32 1.442695, %v1475_v2 }
 0x726   :  { %v1506_v6 = vpop.permute.xlu1 %1505  ;;  %v1472_v7 = vpop.xlane.xlu0 %1471 }
 0x727   :  { %5547 = vpow2.f32 %v1479_v4  ;;  %v1476_v8 = vsub.f32 %v1460_v57, %v1472_v7  ;;  %5226 = vmatpush3.msra.mxu1 %v1506_v6 }
 0x728   :  { %5549 = vpow2.f32 %v1481_v5  ;;  %5235 = vmatprep.subr.mxu1 %v5694_v22 }
 0x729   :  { %v1483_v9 = vmul.f32 1.442695, %v1476_v8 }
 0x72b   :  { %5551 = vpow2.f32 %v1483_v9 }
 0x730   :  { %v5546_v38 = vpop.eup %5545 }
 0x731   :  { %v1485_v10 = vsel %vm792_vm11, %v5546_v38, 0.0 }
 0x732   :  { %1486 = vadd.xlane.f32.xlu1 %v1485_v10 }
 0x734   :  { %v5548_v12 = vpop.eup %5547 }
 0x735   :  { %v5550_v13 = vpop.eup %5549  ;;  %v1488_v14 = vsel %vm792_vm11, %v5548_v12, 0.0 }
 0x736   :  { %1489 = vadd.xlane.f32.xlu0 %v1488_v14  ;;  %v1491_v15 = vsel %vm792_vm11, %v5550_v13, 0.0 }
 0x737   :  { %1492 = vadd.xlane.f32.xlu1 %v1491_v15 }
 0x738   :  { %v5552_v16 = vpop.eup %5551 }
 0x739   :  { %v1494_v17 = vsel %vm792_vm11, %v5552_v16, 0.0 }
 0x73a   :  { %1495 = vadd.xlane.f32.xlu0 %v1494_v17 }
 0x748   :  { %1657 = vrot.lane.b32.xlu1 %v5939_v41, %s5702_s1 }
 0x74c   :  { %1733 = vrot.lane.b32.xlu1 %v5943_v42, %s5702_s1 }
 0x750   :  { %1581 = vrot.lane.b32.xlu0 %v5931_v36, %s5702_s1 }
 0x7bb   :  { %v1487_v20 = vpop.xlane.xlu1 %1486 }
 0x7bc   :  { %5553 = vrcp.f32 %v1487_v20 }
 0x7bf   :  { %v1490_v23 = vpop.xlane.xlu0 %1489 }
 0x7c0   :  { %v1493_v26 = vpop.xlane.xlu1 %1492  ;;  %5555 = vrcp.f32 %v1490_v23 }
 0x7c1   :  { %5557 = vrcp.f32 %v1493_v26 }
 0x7c3   :  { %v1496_v29 = vpop.xlane.xlu0 %1495 }
 0x7c4   :  { %5559 = vrcp.f32 %v1496_v29  ;;  %v1658_v41 = vpop.permute.xlu1 %1657 }
 0x7c7   :  { %v1582_v32 = vpop.permute.xlu0 %1581 }
 0x7c8   :  { %5231 = vmatpush3.msra.mxu0 %v1582_v32  ;;  %v1734_v40 = vpop.permute.xlu1 %1733 }
 0x7c9   :  { %v5554_v34 = vpop.eup %5553  ;;  %5240 = vmatprep.subr.mxu0 %v5694_v22 }
 0x7ca   :  { %v1501_v35 = vmul.f32 %v5554_v34, %v5546_v38 }
 0x7cc   :  { %5228 = vmatmul.mubr.msk.f32.vlgmr.msra.gmra.mxu1 %vm792_vm11, %v1501_v35 }
 0x7cd   :  { %v5556_v42 = vpop.eup %5555  ;;  %5236 = vmatpush3.msra.mxu1 %v1658_v41  ;;  %5237 = vmatprep.mubr.msk.f32.mxu1 %vm5695_vm7, %v5694_v22 }
 0x7ce   :  { %v5558_v36 = vpop.eup %5557  ;;  %v1502_v37 = vmul.f32 %v5556_v42, %v5548_v12  ;;  %5245 = vmatprep.subr.mxu1 %v1832_v45 }
 0x7cf   :  { %v1503_v39 = vmul.f32 %v5558_v36, %v5550_v13 }
 0x7d0   :  { %5233 = vmatmul.mubr.msk.f32.vlgmr.msra.gmra.mxu0 %vm792_vm11, %v1502_v37 }
 0x7d1   :  { %v5560_v43 = vpop.eup %5559  ;;  %5238 = vmatmul.mubr.msk.f32.vlgmr.msra.gmra.mxu1 %vm792_vm11, %v1503_v39  ;;  %5241 = vmatpush3.msra.mxu0 %v1734_v40 }
 0x7d2   :  { %5242 = vmatprep.mubr.msk.f32.mxu0 %vm5695_vm7, %v5694_v22  ;;  %v1504_v44 = vmul.f32 %v5560_v43, %v5552_v16  ;;  %5246 = vmatpush3.msra.mxu1 %v1832_v45 }
 0x7d3   :  { %5247 = vmatprep.subr.mxu1 %v1831_v46 }
 0x7d4   :  { %5243 = vmatmul.mubr.msk.f32.vlgmr.msra.gmra.mxu0 %vm792_vm11, %v1504_v44  ;;  %5248 = vmatpush3.msra.mxu1 %v1831_v46  ;;  %v2009_v46 = vld [vmem:[%s6700_s9 + $0x18] sm:$0xff] }
 0x7d5   :  { %5249 = vmatprep.subr.mxu1 %v1830_v47  ;;  %5259 = vmatprep.subr.mxu0 %v2009_v46 }
 0x7d6   :  { %5250 = vmatpush3.msra.mxu1 %v1830_v47  ;;  %v2008_v47 = vld [vmem:[%s6700_s9 + $0x10] sm:$0xff]  ;;  %5260 = vmatpush3.msra.mxu0 %v2009_v46 }
 0x7d7   :  { %5251 = vmatprep.subr.mxu1 %v1829_v48  ;;  %5261 = vmatprep.subr.mxu0 %v2008_v47 }
 0x7d8   :  { %5252 = vmatpush3.msra.mxu1 %v1829_v48  ;;  %v2007_v48 = vld [vmem:[%s6700_s9 + $0x8] sm:$0xff]  ;;  %5262 = vmatpush3.msra.mxu0 %v2008_v47 }
 0x7d9   :  { %5263 = vmatprep.subr.mxu0 %v2007_v48 }
 0x7da   :  { %5264 = vmatpush3.msra.mxu0 %v2007_v48 }
 0x88c   :  { %v1577_v49 = vpop.f32.mrf.mxu1 }
 0x88d   :  { %1813 = vrot.lane.b32.xlu0 %v1577_v49, %s5703_s4  ;;  %v2006_v49 = vld [vmem:[%s6700_s9] sm:$0xff] }
 0x88e   :  { %v5229_v51 = vpop.f32.mrf.mxu1  ;;  %5265 = vmatprep.subr.mxu0 %v2006_v49 }
 0x88f   :  { %5266 = vmatpush3.msra.mxu0 %v2006_v49 }
 0x890   :  { %v1653_v52 = vpop.f32.mrf.mxu0 }
 0x891   :  { %v1729_v53 = vpop.f32.mrf.mxu1  ;;  %1815 = vrot.lane.b32.xlu1 %v1653_v52, %s5703_s4 }
 0x892   :  { %1817 = vrot.lane.b32.xlu0 %v1729_v53, %s5703_s4  ;;  %v5234_v54 = vpop.f32.mrf.mxu0 }
 0x893   :  { %v5239_v55 = vpop.f32.mrf.mxu1 }
 0x894   :  { %v1805_v56 = vpop.f32.mrf.mxu0 }
 0x895   :  { %1819 = vrot.lane.b32.xlu1 %v1805_v56, %s5703_s4 }
 0x896   :  { %v5244_v57 = vpop.f32.mrf.mxu0 }
 0x8ff   :  { %v1814_v59 = vpop.permute.xlu0 %1813 }
 0x900   :  { %v1825_v60 = vsel %vm458_vm8, %v6068_v21, %v1814_v59  ;;  %v6137_v21 = vld [vmem:[%s6703_s12] sm:$0x3f] }
 0x901   :  { %5253 = vmatprep.mubr.msk.f32.mxu1 %vm276_vm6, %v1825_v60 }
 0x903   :  { %v1816_v61 = vpop.permute.xlu1 %1815 }
 0x904   :  { %v1826_v62 = vsel %vm458_vm8, %v6070_v24, %v1816_v61  ;;  %v1818_v63 = vpop.permute.xlu0 %1817  ;;  %v1836_v24 = vrot.slane %v6137_v21, %v5982_v58 }
 0x905   :  { %v1827_v0 = vsel %vm458_vm8, %v6072_v28, %v1818_v63  ;;  %5254 = vmatmul.mubr.msk.f32.vlgmr.msra.gmra.mxu1 %vm276_vm6, %v1826_v62 }
 0x906   :  { %5256 = vmatprep.mubr.msk.f32.mxu1 %vm276_vm6, %v1827_v0  ;;  %v1992_v0 = vsub.s32 1, %v5975_v50 }
 0x907   :  { %v1820_v1 = vpop.permute.xlu1 %1819 }
 0x908   :  { %v1828_v2 = vsel %vm458_vm8, %v6074_v31, %v1820_v1 }
 0x909   :  { %5257 = vmatmul.mubr.msk.f32.gmra.mxu1 %vm276_vm6, %v1828_v2  ;;  %v1993_v2 = vrot.slane %v6137_v21, %v1992_v0 }
 0x9c5   :  { %v5255_v4 = vpop.f32.mrf.mxu1 }
 0x9c6   :  { %v1921_v28 = vadd.f32 %v5255_v4, %v1836_v24 }
 0x9c7   :  { %v1915_v5 = vpop.f32.mrf.mxu1 }
 0x9c8   :  { %v1916_v6 = vadd.f32 %v1915_v5, %v1836_v24  ;;  %v1935_v7 = vadd.f32 %v1921_v28, %v5910_v27 }
 0x9c9   :  { %v5258_v8 = vpop.f32.mrf.mxu1 }
 0x9ca   :  { %v1941_v9 = vsel %vm276_vm6, %v1935_v7, 0.0  ;;  %v1934_v31 = vadd.f32 %v1916_v6, %v5908_v25  ;;  %v1931_v10 = vadd.f32 %v5258_v8, %v1836_v24 }
 0x9cb   :  { %1942 = vadd.xlane.f32.xlu1 %v1941_v9  ;;  %v1925_v38 = vpop.f32.mrf.mxu1 }
 0x9cc   :  { %v1926_v12 = vadd.f32 %v1925_v38, %v1836_v24  ;;  %v1938_v13 = vsel %vm276_vm6, %v1934_v31, 0.0  ;;  %v1937_v16 = vadd.f32 %v1931_v10, %v5920_v33  ;;  %v2000_v24 = vsub.s32 2, %v5975_v50 }
 0x9cd   :  { %1939 = vadd.xlane.f32.xlu0 %v1938_v13 }
 0x9ce   :  { %v1936_v14 = vadd.f32 %v1926_v12, %v5916_v30  ;;  %v1947_v27 = vsel %vm276_vm6, %v1937_v16, 0.0  ;;  %v2001_v6 = vrot.slane %v6137_v21, %v2000_v24 }
 0x9d0   :  { %v1944_v15 = vsel %vm276_vm6, %v1936_v14, 0.0 }
 0x9d1   :  { %1945 = vadd.xlane.f32.xlu0 %v1944_v15 }
 0x9d5   :  { %1948 = vadd.xlane.f32.xlu0 %v1947_v27 }
 0xa54   :  { %v1943_v17 = vpop.xlane.xlu1 %1942 }
 0xa55   :  { %v1951_v20 = vmul.f32 0.03125, %v1943_v17  ;;  %v2157_v17 = vld [vmem:[%s6702_s11 + $0x38] sm:$0xff] }
 0xa56   :  { %v1940_v25 = vpop.xlane.xlu0 %1939  ;;  %5273 = vmatprep.subr.mxu1 %v2157_v17 }
 0xa57   :  { %v1955_v23 = vsub.f32 %v1935_v7, %v1951_v20  ;;  %v1950_v26 = vmul.f32 0.03125, %v1940_v25  ;;  %5274 = vmatpush3.msra.mxu1 %v2157_v17  ;;  %v2156_v20 = vld [vmem:[%s6702_s11 + $0x30] sm:$0xff]  ;;  %v2155_v25 = vld [vmem:[%s6702_s11 + $0x28] sm:$0xff] }
 0xa58   :  { %5275 = vmatprep.subr.mxu1 %v2156_v20 }
 0xa59   :  { %v1954_v29 = vsub.f32 %v1934_v31, %v1950_v26  ;;  %v1959_v32 = vmul.f32 %v1955_v23, %v1955_v23  ;;  %5276 = vmatpush3.msra.mxu1 %v2156_v20  ;;  %v2153_v26 = vld [vmem:[%s6702_s11 + $0x18] sm:$0xff] }
 0xa5a   :  { %v1946_v34 = vpop.xlane.xlu0 %1945  ;;  %5277 = vmatprep.subr.mxu1 %v2155_v25 }
 0xa5b   :  { %v1952_v41 = vmul.f32 0.03125, %v1946_v34  ;;  %v1965_v35 = vsel %vm276_vm6, %v1959_v32, 0.0  ;;  %v1958_v30 = vmul.f32 %v1954_v29, %v1954_v29  ;;  %5278 = vmatpush3.msra.mxu1 %v2155_v25  ;;  %v2151_v32 = vld [vmem:[%s6702_s11 + $0x8] sm:$0xff]  ;;  %v2150_v34 = vld [vmem:[%s6702_s11] sm:$0xff] }
 0xa5c   :  { %1966 = vadd.xlane.f32.xlu0 %v1965_v35 }
 0xa5d   :  { %v1956_v42 = vsub.f32 %v1936_v14, %v1952_v41  ;;  %v1962_v33 = vsel %vm276_vm6, %v1958_v30, 0.0  ;;  %v4855_v41 = vld [vmem:[%s6701_s10] ss:$0 sm:$0xff] }
 0xa5e   :  { %1963 = vadd.xlane.f32.xlu1 %v1962_v33  ;;  %v1949_v36 = vpop.xlane.xlu0 %1948 }
 0xa5f   :  { %v1953_v37 = vmul.f32 0.03125, %v1949_v36  ;;  %v1960_v39 = vmul.f32 %v1956_v42, %v1956_v42 }
 0xa61   :  { %v1957_v40 = vsub.f32 %v1937_v16, %v1953_v37  ;;  %v1968_v43 = vsel %vm276_vm6, %v1960_v39, 0.0 }
 0xa62   :  { %1969 = vadd.xlane.f32.xlu1 %v1968_v43 }
 0xa63   :  { %v1961_v44 = vmul.f32 %v1957_v40, %v1957_v40 }
 0xa65   :  { %v1971_v45 = vsel %vm276_vm6, %v1961_v44, 0.0 }
 0xa66   :  { %1972 = vadd.xlane.f32.xlu0 %v1971_v45 }
 0xae5   :  { %v1967_v51 = vpop.xlane.xlu0 %1966 }
 0xae6   :  { %v1975_v52 = vmul.f32 0.03125, %v1967_v51 }
 0xae7   :  { %v1964_v53 = vpop.xlane.xlu1 %1963 }
 0xae8   :  { %v1979_v54 = vadd.f32 1e-12, %v1975_v52  ;;  %v1974_v55 = vmul.f32 0.03125, %v1964_v53 }
 0xaea   :  { %5561 = vrsqrt.f32 %v1979_v54  ;;  %v1978_v56 = vadd.f32 1e-12, %v1974_v55 }
 0xaeb   :  { %v1970_v57 = vpop.xlane.xlu1 %1969 }
 0xaec   :  { %5563 = vrsqrt.f32 %v1978_v56  ;;  %v1976_v59 = vmul.f32 0.03125, %v1970_v57 }
 0xaee   :  { %v1980_v60 = vadd.f32 1e-12, %v1976_v59 }
 0xaef   :  { %v1973_v61 = vpop.xlane.xlu0 %1972 }
 0xaf0   :  { %5565 = vrsqrt.f32 %v1980_v60  ;;  %v1977_v62 = vmul.f32 0.03125, %v1973_v61 }
 0xaf2   :  { %v1981_v63 = vadd.f32 1e-12, %v1977_v62 }
 0xaf4   :  { %5567 = vrsqrt.f32 %v1981_v63 }
 0xaf7   :  { %v5562_v1 = vpop.eup %5561 }
 0xaf8   :  { %v1987_v4 = vmul.f32 %v5562_v1, %v1955_v23  ;;  %v2154_v23 = vld [vmem:[%s6702_s11 + $0x20] sm:$0xff] }
 0xaf9   :  { %v5564_v28 = vpop.eup %5563  ;;  %5279 = vmatprep.subr.mxu1 %v2154_v23 }
 0xafa   :  { %v1986_v5 = vmul.f32 %v5564_v28, %v1954_v29  ;;  %v1995_v7 = vmul.f32 %v1993_v2, %v1987_v4  ;;  %5280 = vmatpush3.msra.mxu1 %v2154_v23  ;;  %v2152_v29 = vld [vmem:[%s6702_s11 + $0x10] sm:$0xff]  ;;  %v2160_v23 = vsub.s32 5, %v5975_v50 }
 0xafb   :  { %5281 = vmatprep.subr.mxu1 %v2153_v26 }
 0xafc   :  { %v1994_v8 = vmul.f32 %v1993_v2, %v1986_v5  ;;  %v6175_v10 = vadd.f32 %v2001_v6, %v1995_v7  ;;  %5282 = vmatpush3.msra.mxu1 %v2153_v26  ;;  %v2161_v26 = vrot.slane %v6137_v21, %v2160_v23 }
 0xafd   :  { %v5566_v9 = vpop.eup %5565  ;;  %5283 = vmatprep.subr.mxu1 %v2152_v29 }
 0xafe   :  { %v6173_v31 = vadd.f32 %v2001_v6, %v1994_v8  ;;  %v1988_v38 = vmul.f32 %v5566_v9, %v1956_v42  ;;  %5284 = vmatpush3.msra.mxu1 %v2152_v29 }
 0xaff   :  { %5285 = vmatprep.subr.mxu1 %v2151_v32 }
 0xb00   :  { %5267 = vmatprep.mubr.msk.f32.mxu0 %vm276_vm6, %v6173_v31  ;;  %v1996_v12 = vmul.f32 %v1993_v2, %v1988_v38  ;;  %5286 = vmatpush3.msra.mxu1 %v2151_v32 }
 0xb01   :  { %v5568_v13 = vpop.eup %5567  ;;  %5268 = vmatmul.mubr.msk.f32.vlgmr.msra.gmra.mxu0 %vm276_vm6, %v6175_v10  ;;  %5287 = vmatprep.subr.mxu1 %v2150_v34 }
 0xb02   :  { %v6181_v14 = vadd.f32 %v2001_v6, %v1996_v12  ;;  %v1989_v15 = vmul.f32 %v5568_v13, %v1957_v40  ;;  %5288 = vmatpush3.msra.mxu1 %v2150_v34 }
 0xb03   :  { %5319 = vmatprep.subr.mxu1 %v5694_v22 }
 0xb04   :  { %5270 = vmatprep.mubr.msk.f32.mxu0 %vm276_vm6, %v6181_v14  ;;  %v1997_v16 = vmul.f32 %v1993_v2, %v1989_v15 }
 0xb06   :  { %v6185_v27 = vadd.f32 %v2001_v6, %v1997_v16 }
 0xb08   :  { %5271 = vmatmul.mubr.msk.f32.gmra.mxu0 %vm276_vm6, %v6185_v27 }
 0xbc1   :  { %v5269_v35 = vpop.f32.mrf.mxu0 }
 0xbc2   :  { %v2101_v30 = vadd.f32 %v5269_v35, %v4855_v41 }
 0xbc3   :  { %v2095_v42 = vpop.f32.mrf.mxu0 }
 0xbc4   :  { %v2115_v33 = vmul.f32 %v2101_v30, %v2101_v30  ;;  %v2096_v36 = vadd.f32 %v4855_v41, %v2095_v42 }
 0xbc6   :  { %v2119_v37 = vmul.f32 %v2115_v33, %v2101_v30  ;;  %v2114_v39 = vmul.f32 %v2096_v36, %v2096_v36 }
 0xbc8   :  { %v2123_v40 = vmul.f32 0.044715, %v2119_v37  ;;  %v2118_v43 = vmul.f32 %v2114_v39, %v2096_v36  ;;  %v5272_v44 = vpop.f32.mrf.mxu0 }
 0xbc9   :  { %v2111_v45 = vadd.f32 %v5272_v44, %v4855_v41 }
 0xbca   :  { %v2127_v46 = vadd.f32 %v2123_v40, %v2101_v30  ;;  %v2122_v47 = vmul.f32 0.044715, %v2118_v43  ;;  %v2105_v48 = vpop.f32.mrf.mxu0 }
 0xbcb   :  { %v2117_v49 = vmul.f32 %v2111_v45, %v2111_v45  ;;  %v2106_v51 = vadd.f32 %v4855_v41, %v2105_v48 }
 0xbcc   :  { %v2131_v52 = vmul.f32 0.7978846, %v2127_v46  ;;  %v2126_v53 = vadd.f32 %v2122_v47, %v2096_v36 }
 0xbcd   :  { %v2121_v54 = vmul.f32 %v2117_v49, %v2111_v45  ;;  %v2116_v55 = vmul.f32 %v2106_v51, %v2106_v51 }
 0xbce   :  { %5569 = vtanh.f32 %v2131_v52  ;;  %v2130_v56 = vmul.f32 0.7978846, %v2126_v53 }
 0xbcf   :  { %v2125_v57 = vmul.f32 0.044715, %v2121_v54  ;;  %v2120_v59 = vmul.f32 %v2116_v55, %v2106_v51 }
 0xbd0   :  { %5571 = vtanh.f32 %v2130_v56 }
 0xbd1   :  { %v2129_v60 = vadd.f32 %v2125_v57, %v2111_v45  ;;  %v2124_v61 = vmul.f32 0.044715, %v2120_v59 }
 0xbd3   :  { %v2133_v62 = vmul.f32 0.7978846, %v2129_v60  ;;  %v2128_v63 = vadd.f32 %v2124_v61, %v2106_v51 }
 0xbd5   :  { %5573 = vtanh.f32 %v2133_v62  ;;  %v2132_v1 = vmul.f32 0.7978846, %v2128_v63 }
 0xbd7   :  { %5575 = vtanh.f32 %v2132_v1 }
 0xbdb   :  { %v5570_v2 = vpop.eup %5569 }
 0xbdc   :  { %v2139_v4 = vadd.f32 1.0, %v5570_v2  ;;  %v4868_v2 = vld [vmem:[%s6728_s26 + $0x38] sm:$0xff] }
 0xbdd   :  { %v5572_v28 = vpop.eup %5571  ;;  %5295 = vmatprep.subr.mxu0 %v4868_v2 }
 0xbde   :  { %v2138_v5 = vadd.f32 1.0, %v5572_v28  ;;  %v2143_v6 = vmul.f32 0.5, %v2139_v4  ;;  %v4867_v4 = vld [vmem:[%s6728_s26 + $0x30] sm:$0xff]  ;;  %5296 = vmatpush3.msra.mxu0 %v4868_v2  ;;  %v4866_v28 = vld [vmem:[%s6728_s26 + $0x28] sm:$0xff] }
 0xbdf   :  { %5297 = vmatprep.subr.mxu0 %v4867_v4 }
 0xbe0   :  { %v2142_v7 = vmul.f32 0.5, %v2138_v5  ;;  %v2147_v38 = vmul.f32 %v2143_v6, %v2101_v30  ;;  %5298 = vmatpush3.msra.mxu0 %v4867_v4  ;;  %v4865_v5 = vld [vmem:[%s6728_s26 + $0x20] sm:$0xff] }
 0xbe1   :  { %5299 = vmatprep.subr.mxu0 %v4866_v28 }
 0xbe2   :  { %v5574_v8 = vpop.eup %5573  ;;  %v2146_v9 = vmul.f32 %v2142_v7, %v2096_v36  ;;  %5300 = vmatpush3.msra.mxu0 %v4866_v28 }
 0xbe3   :  { %v2141_v12 = vadd.f32 1.0, %v5574_v8  ;;  %5301 = vmatprep.subr.mxu0 %v4865_v5 }
 0xbe4   :  { %v5576_v13 = vpop.eup %5575  ;;  %5289 = vmatprep.mubr.msk.f32.mxu1 %vm2162_vm12, %v2146_v9  ;;  %5302 = vmatpush3.msra.mxu0 %v4865_v5 }
 0xbe5   :  { %5290 = vmatmul.mubr.msk.f32.vlgmr.msra.gmra.mxu1 %vm2162_vm12, %v2147_v38  ;;  %v2140_v15 = vadd.f32 1.0, %v5576_v13  ;;  %v2145_v16 = vmul.f32 0.5, %v2141_v12  ;;  %5309 = vmatprep.subr.mxu0 %v5694_v22 }
 0xbe7   :  { %v2144_v17 = vmul.f32 0.5, %v2140_v15  ;;  %v2149_v25 = vmul.f32 %v2145_v16, %v2111_v45 }
 0xbe9   :  { %v2148_v20 = vmul.f32 %v2144_v17, %v2106_v51 }
 0xbeb   :  { %5292 = vmatprep.mubr.msk.f32.mxu1 %vm2162_vm12, %v2148_v20 }
 0xbec   :  { %5293 = vmatmul.mubr.msk.f32.gmra.mxu1 %vm2162_vm12, %v2149_v25 }
 0xbed   :  { %5321 = vmatprep.mubr.msk.f32.mxu1 %vm5695_vm7, %v5694_v22 }
 0xca5   :  { %v5291_v29 = vpop.f32.mrf.mxu1 }
 0xca6   :  { %v2247_v32 = vadd.f32 %v5291_v29, %v2161_v26 }
 0xca7   :  { %v2241_v34 = vpop.f32.mrf.mxu1 }
 0xca8   :  { %v2242_v41 = vadd.f32 %v2241_v34, %v2161_v26  ;;  %v2261_v35 = vadd.f32 %v2247_v32, %v6175_v10  ;;  %v2326_v34 = vsub.s32 4, %v5975_v50 }
 0xcaa   :  { %v2267_v30 = vsel %vm276_vm6, %v2261_v35, 0.0  ;;  %v2260_v42 = vadd.f32 %v2242_v41, %v6173_v31 }
 0xcab   :  { %2268 = vadd.xlane.f32.xlu0 %v2267_v30 }
 0xcac   :  { %v5294_v33 = vpop.f32.mrf.mxu1  ;;  %v2264_v36 = vsel %vm276_vm6, %v2260_v42, 0.0 }
 0xcad   :  { %v2257_v37 = vadd.f32 %v5294_v33, %v2161_v26  ;;  %2265 = vadd.xlane.f32.xlu1 %v2264_v36  ;;  %v2327_v33 = vrot.slane %v6137_v21, %v2326_v34 }
 0xcae   :  { %v2251_v39 = vpop.f32.mrf.mxu1 }
 0xcaf   :  { %v2252_v40 = vadd.f32 %v2251_v39, %v2161_v26  ;;  %v2263_v43 = vadd.f32 %v2257_v37, %v6185_v27  ;;  %v2318_v26 = vsub.s32 3, %v5975_v50 }
 0xcb1   :  { %v2273_v44 = vsel %vm276_vm6, %v2263_v43, 0.0  ;;  %v2262_v45 = vadd.f32 %v2252_v40, %v6181_v14  ;;  %v2319_v32 = vrot.slane %v6137_v21, %v2318_v26 }
 0xcb2   :  { %2274 = vadd.xlane.f32.xlu0 %v2273_v44 }
 0xcb3   :  { %v2270_v10 = vsel %vm276_vm6, %v2262_v45, 0.0 }
 0xcb4   :  { %2271 = vadd.xlane.f32.xlu1 %v2270_v10 }
 0xd34   :  { %v2269_v46 = vpop.xlane.xlu0 %2268 }
 0xd35   :  { %v2277_v31 = vmul.f32 0.03125, %v2269_v46 }
 0xd36   :  { %v2266_v47 = vpop.xlane.xlu1 %2265 }
 0xd37   :  { %v2281_v48 = vsub.f32 %v2261_v35, %v2277_v31  ;;  %v2276_v49 = vmul.f32 0.03125, %v2266_v47  ;;  %v4870_v47 = vld [vmem:[%s6698_s7 + $0x1] ss:$0 sm:$0xff] }
 0xd39   :  { %v2280_v51 = vsub.f32 %v2260_v42, %v2276_v49  ;;  %v2285_v52 = vmul.f32 %v2281_v48, %v2281_v48 }
 0xd3b   :  { %v2275_v53 = vpop.xlane.xlu0 %2274  ;;  %v2291_v54 = vsel %vm276_vm6, %v2285_v52, 0.0  ;;  %v2284_v55 = vmul.f32 %v2280_v51, %v2280_v51 }
 0xd3c   :  { %v2279_v27 = vmul.f32 0.03125, %v2275_v53  ;;  %2292 = vadd.xlane.f32.xlu0 %v2291_v54 }
 0xd3d   :  { %v2272_v56 = vpop.xlane.xlu1 %2271  ;;  %v2288_v14 = vsel %vm276_vm6, %v2284_v55, 0.0 }
 0xd3e   :  { %v2283_v57 = vsub.f32 %v2263_v43, %v2279_v27  ;;  %v2278_v59 = vmul.f32 0.03125, %v2272_v56  ;;  %2289 = vadd.xlane.f32.xlu1 %v2288_v14 }
 0xd40   :  { %v2282_v60 = vsub.f32 %v2262_v45, %v2278_v59  ;;  %v2287_v61 = vmul.f32 %v2283_v57, %v2283_v57 }
 0xd42   :  { %v2297_v62 = vsel %vm276_vm6, %v2287_v61, 0.0  ;;  %v2286_v63 = vmul.f32 %v2282_v60, %v2282_v60 }
 0xd43   :  { %2298 = vadd.xlane.f32.xlu0 %v2297_v62 }
 0xd44   :  { %v2294_v1 = vsel %vm276_vm6, %v2286_v63, 0.0 }
 0xd45   :  { %2295 = vadd.xlane.f32.xlu1 %v2294_v1 }
 0xdc5   :  { %v2293_v6 = vpop.xlane.xlu0 %2292 }
 0xdc6   :  { %v2301_v7 = vmul.f32 0.03125, %v2293_v6 }
 0xdc7   :  { %v2290_v8 = vpop.xlane.xlu1 %2289 }
 0xdc8   :  { %v2305_v9 = vadd.f32 1e-12, %v2301_v7  ;;  %v2300_v38 = vmul.f32 0.03125, %v2290_v8 }
 0xdca   :  { %5577 = vrsqrt.f32 %v2305_v9  ;;  %v2304_v12 = vadd.f32 1e-12, %v2300_v38 }
 0xdcc   :  { %5579 = vrsqrt.f32 %v2304_v12  ;;  %v2299_v13 = vpop.xlane.xlu0 %2298 }
 0xdcd   :  { %v2303_v15 = vmul.f32 0.03125, %v2299_v13 }
 0xdce   :  { %v2296_v16 = vpop.xlane.xlu1 %2295 }
 0xdcf   :  { %v2307_v17 = vadd.f32 1e-12, %v2303_v15  ;;  %v2302_v20 = vmul.f32 0.03125, %v2296_v16 }
 0xdd1   :  { %5581 = vrsqrt.f32 %v2307_v17  ;;  %v2306_v25 = vadd.f32 1e-12, %v2302_v20 }
 0xdd3   :  { %5583 = vrsqrt.f32 %v2306_v25 }
 0xdd7   :  { %v5578_v29 = vpop.eup %5577 }
 0xdd8   :  { %v2313_v41 = vmul.f32 %v5578_v29, %v2281_v48 }
 0xdd9   :  { %v5580_v35 = vpop.eup %5579 }
 0xdda   :  { %v2312_v30 = vmul.f32 %v5580_v35, %v2280_v51  ;;  %v2321_v42 = vmul.f32 %v2319_v32, %v2313_v41 }
 0xddc   :  { %v2320_v36 = vmul.f32 %v2319_v32, %v2312_v30  ;;  %v6262_v40 = vadd.f32 %v2327_v33, %v2321_v42 }
 0xdde   :  { %v5582_v37 = vpop.eup %5581  ;;  %v6260_v39 = vadd.f32 %v2327_v33, %v2320_v36 }
 0xddf   :  { %v2315_v43 = vmul.f32 %v5582_v37, %v2283_v57 }
 0xde0   :  { %v5584_v44 = vpop.eup %5583  ;;  %5303 = vmatprep.mubr.msk.f32.mxu0 %vm276_vm6, %v6260_v39 }
 0xde1   :  { %5304 = vmatmul.mubr.msk.f32.vlgmr.msra.gmra.mxu0 %vm276_vm6, %v6262_v40  ;;  %v2314_v45 = vmul.f32 %v5584_v44, %v2282_v60  ;;  %v2323_v10 = vmul.f32 %v2319_v32, %v2315_v43 }
 0xde3   :  { %v2322_v46 = vmul.f32 %v2319_v32, %v2314_v45  ;;  %v6270_v21 = vadd.f32 %v2327_v33, %v2323_v10 }
 0xde5   :  { %v6268_v31 = vadd.f32 %v2327_v33, %v2322_v46 }
 0xde7   :  { %5306 = vmatprep.mubr.msk.f32.mxu0 %vm276_vm6, %v6268_v31 }
 0xde8   :  { %5307 = vmatmul.mubr.msk.f32.gmra.mxu0 %vm276_vm6, %v6270_v21 }
 0xde9   :  { %5311 = vmatprep.mubr.msk.f32.mxu0 %vm5695_vm7, %v5694_v22 }
 0xea1   :  { %v5305_v48 = vpop.f32.mrf.mxu0 }
 0xea2   :  { %v6281_v49 = vadd.f32 %v5305_v48, %v4870_v47 }
 0xea3   :  { %v2425_v51 = vpop.f32.mrf.mxu0 }
 0xea4   :  { %v6283_v52 = vadd.f32 %v4870_v47, %v2425_v51  ;;  %2522 = vrot.lane.b32.xlu0 %v6281_v49, %s5696_s25 }
 0xea6   :  { %2445 = vrot.lane.b32.xlu1 %v6283_v52, %s5696_s25 }
 0xea8   :  { %v5308_v53 = vpop.f32.mrf.mxu0 }
 0xea9   :  { %v6293_v27 = vadd.f32 %v5308_v53, %v4870_v47 }
 0xeaa   :  { %v2435_v54 = vpop.f32.mrf.mxu0 }
 0xeab   :  { %v6289_v55 = vadd.f32 %v4870_v47, %v2435_v54 }
 0xead   :  { %2599 = vrot.lane.b32.xlu1 %v6289_v55, %s5696_s25 }
 0xeb1   :  { %2676 = vrot.lane.b32.xlu1 %v6293_v27, %s5696_s25 }
 0xf16   :  { %v2523_v14 = vpop.permute.xlu0 %2522 }
 0xf18   :  { %v2446_v56 = vpop.permute.xlu1 %2445 }
 0xf19   :  { %5310 = vmatpush3.xpose.msk.msra.mxu0 %vm458_vm8, %v2446_v56 }
 0xf1a   :  { %5314 = vmatprep.subr.mxu0 %v5694_v22 }
 0xf1c   :  { %5312 = vmatmul.mubr.msk.f32.vlgmr.msra.gmra.mxu0 %vm458_vm8, %v6283_v52 }
 0xf1d   :  { %5315 = vmatpush3.xpose.msk.msra.mxu0 %vm458_vm8, %v2523_v14  ;;  %5316 = vmatprep.mubr.msk.f32.mxu0 %vm5695_vm7, %v5694_v22 }
 0xf1e   :  { %5324 = vmatprep.subr.mxu0 %v5694_v22 }
 0xf1f   :  { %v2600_v57 = vpop.permute.xlu1 %2599 }
 0xf20   :  { %5317 = vmatmul.mubr.msk.f32.vlgmr.msra.gmra.mxu0 %vm458_vm8, %v6281_v49  ;;  %5320 = vmatpush3.xpose.msk.msra.mxu1 %vm458_vm8, %v2600_v57 }
 0xf21   :  { %5326 = vmatprep.mubr.msk.f32.mxu0 %vm5695_vm7, %v5694_v22  ;;  %5329 = vmatprep.subr.mxu1 %v5694_v22 }
 0xf23   :  { %5322 = vmatmul.mubr.msk.f32.vlgmr.msra.gmra.mxu1 %vm458_vm8, %v6289_v55  ;;  %v2677_v59 = vpop.permute.xlu1 %2676 }
 0xf24   :  { %5325 = vmatpush3.xpose.msk.msra.mxu0 %vm458_vm8, %v2677_v59  ;;  %5331 = vmatprep.mubr.msk.f32.mxu1 %vm5695_vm7, %v5694_v22 }
 0xf25   :  { %5334 = vmatprep.subr.mxu0 %v5694_v22 }
 0xf27   :  { %5327 = vmatmul.mubr.msk.f32.vlgmr.msra.gmra.mxu0 %vm458_vm8, %v6293_v27 }
 0xf28   :  { %5336 = vmatprep.mubr.msk.f32.mxu0 %vm5695_vm7, %v5694_v22 }
 0xfdc   :  { %v2517_v60 = vpop.f32.mrf.mxu0 }
 0xfdd   :  { %v2752_v61 = vmul.f32 0.25, %v2517_v60 }
 0xfde   :  { %v5313_v62 = vpop.f32.mrf.mxu0 }
 0xfdf   :  { %v2756_v63 = vadd.f32 %v2752_v61, %v5985_v18 }
 0xfe0   :  { %v2594_v1 = vpop.f32.mrf.mxu0 }
 0xfe1   :  { %v2753_v2 = vmul.f32 0.25, %v2594_v1  ;;  %v2760_v4 = vsel %vm792_vm11, %v2756_v63, -inf }
 0xfe2   :  { %2761 = vmax.xlane.f32.xlu0 %v2760_v4  ;;  %v5318_v28 = vpop.f32.mrf.mxu0 }
 0xfe3   :  { %v2671_v5 = vpop.f32.mrf.mxu1  ;;  %v2757_v6 = vadd.f32 %v2753_v2, %v5989_v3 }
 0xfe4   :  { %v2754_v7 = vmul.f32 0.25, %v2671_v5 }
 0xfe5   :  { %v5323_v8 = vpop.f32.mrf.mxu1  ;;  %v2763_v9 = vsel %vm792_vm11, %v2757_v6, -inf }
 0xfe6   :  { %2764 = vmax.xlane.f32.xlu1 %v2763_v9  ;;  %v2758_v38 = vadd.f32 %v2754_v7, %v5994_v11 }
 0xfe7   :  { %v2748_v12 = vpop.f32.mrf.mxu0 }
 0xfe8   :  { %v2755_v13 = vmul.f32 0.25, %v2748_v12  ;;  %v2766_v15 = vsel %vm792_vm11, %v2758_v38, -inf }
 0xfe9   :  { %2767 = vmax.xlane.f32.xlu0 %v2766_v15  ;;  %v5328_v16 = vpop.f32.mrf.mxu0 }
 0xfea   :  { %v2759_v17 = vadd.f32 %v2755_v13, %v5999_v19 }
 0xfec   :  { %v2769_v20 = vsel %vm792_vm11, %v2759_v17, -inf }
 0xfed   :  { %2770 = vmax.xlane.f32.xlu0 %v2769_v20 }
 0xff7   :  { %2804 = vrot.lane.b32.xlu1 %v6283_v52, %s5699_s0 }
 0xffb   :  { %2956 = vrot.lane.b32.xlu1 %v6289_v55, %s5699_s0 }
 0xfff   :  { %3032 = vrot.lane.b32.xlu1 %v6293_v27, %s5699_s0 }
0x1003   :  { %3188 = vrot.lane.b32.xlu1 %v6281_v49, %s5700_s29  ;;  %2880 = vrot.lane.b32.xlu0 %v6281_v49, %s5699_s0 }
0x1007   :  { %3186 = vrot.lane.b32.xlu1 %v6281_v49, %s5701_s23  ;;  %3110 = vrot.lane.b32.xlu0 %v6283_v52, %s5700_s29 }
0x100b   :  { %3108 = vrot.lane.b32.xlu0 %v6283_v52, %s5701_s23 }
0x106b   :  { %v2762_v25 = vpop.xlane.xlu0 %2761 }
0x106c   :  { %v2772_v29 = vsub.f32 %v2756_v63, %v2762_v25 }
0x106e   :  { %v2776_v32 = vmul.f32 1.442695, %v2772_v29 }
0x106f   :  { %v2765_v41 = vpop.xlane.xlu1 %2764 }
0x1070   :  { %5585 = vpow2.f32 %v2776_v32  ;;  %v2773_v35 = vsub.f32 %v2757_v6, %v2765_v41 }
0x1072   :  { %v2778_v30 = vmul.f32 1.442695, %v2773_v35  ;;  %v2768_v42 = vpop.xlane.xlu0 %2767 }
0x1073   :  { %v2774_v33 = vsub.f32 %v2758_v38, %v2768_v42  ;;  %v2805_v36 = vpop.permute.xlu1 %2804 }
0x1074   :  { %5587 = vpow2.f32 %v2778_v30  ;;  %5330 = vmatpush3.msra.mxu1 %v2805_v36 }
0x1075   :  { %v2780_v37 = vmul.f32 1.442695, %v2774_v33  ;;  %5339 = vmatprep.subr.mxu1 %v5694_v22 }
0x1076   :  { %v2771_v43 = vpop.xlane.xlu0 %2770 }
0x1077   :  { %5589 = vpow2.f32 %v2780_v37  ;;  %v2775_v44 = vsub.f32 %v2759_v17, %v2771_v43  ;;  %v2957_v57 = vpop.permute.xlu1 %2956 }
0x1079   :  { %v2782_v45 = vmul.f32 1.442695, %v2775_v44 }
0x107a   :  { %v2881_v10 = vpop.permute.xlu0 %2880 }
0x107b   :  { %5591 = vpow2.f32 %v2782_v45  ;;  %5335 = vmatpush3.msra.mxu0 %v2881_v10  ;;  %v3033_v59 = vpop.permute.xlu1 %3032 }
0x107c   :  { %5344 = vmatprep.subr.mxu0 %v5694_v22 }
0x107d   :  { %v5586_v46 = vpop.eup %5585 }
0x107e   :  { %v2784_v47 = vsel %vm792_vm11, %v5586_v46, 0.0  ;;  %v3111_v61 = vpop.permute.xlu0 %3110 }
0x107f   :  { %2785 = vadd.xlane.f32.xlu1 %v2784_v47  ;;  %v3189_v60 = vpop.permute.xlu1 %3188 }
0x1081   :  { %v5588_v48 = vpop.eup %5587 }
0x1082   :  { %v2787_v51 = vsel %vm792_vm11, %v5588_v48, 0.0  ;;  %v3109_v63 = vpop.permute.xlu0 %3108 }
0x1083   :  { %2788 = vadd.xlane.f32.xlu0 %v2787_v51  ;;  %v3187_v62 = vpop.permute.xlu1 %3186 }
0x1084   :  { %v5590_v53 = vpop.eup %5589 }
0x1085   :  { %v2790_v54 = vsel %vm792_vm11, %v5590_v53, 0.0 }
0x1086   :  { %2791 = vadd.xlane.f32.xlu1 %v2790_v54 }
0x1088   :  { %v5592_v56 = vpop.eup %5591 }
0x1089   :  { %v2793_v14 = vsel %vm792_vm11, %v5592_v56, 0.0 }
0x108a   :  { %2794 = vadd.xlane.f32.xlu0 %v2793_v14 }
0x1097   :  { %3344 = vrot.lane.b32.xlu1 %v6293_v27, %s5700_s29 }
0x109b   :  { %3342 = vrot.lane.b32.xlu1 %v6293_v27, %s5701_s23 }
0x10a0   :  { %3266 = vrot.lane.b32.xlu0 %v6289_v55, %s5700_s29 }
0x10a4   :  { %3264 = vrot.lane.b32.xlu0 %v6289_v55, %s5701_s23 }
0x1108   :  { %v2786_v1 = vpop.xlane.xlu1 %2785 }
0x1109   :  { %5593 = vrcp.f32 %v2786_v1 }
0x110c   :  { %v2789_v2 = vpop.xlane.xlu0 %2788 }
0x110d   :  { %5595 = vrcp.f32 %v2789_v2 }
0x110f   :  { %v2792_v4 = vpop.xlane.xlu1 %2791 }
0x1110   :  { %5597 = vrcp.f32 %v2792_v4 }
0x1113   :  { %v2795_v28 = vpop.xlane.xlu0 %2794  ;;  %v3345_v16 = vpop.permute.xlu1 %3344 }
0x1114   :  { %5599 = vrcp.f32 %v2795_v28 }
0x1116   :  { %v5594_v5 = vpop.eup %5593 }
0x1117   :  { %v2800_v6 = vmul.f32 %v5594_v5, %v5586_v46  ;;  %v3267_v13 = vpop.permute.xlu0 %3266  ;;  %v3343_v20 = vpop.permute.xlu1 %3342 }
0x1119   :  { %5332 = vmatmul.mubr.msk.f32.vlgmr.msra.gmra.mxu1 %vm792_vm11, %v2800_v6 }
0x111a   :  { %v5596_v7 = vpop.eup %5595  ;;  %5340 = vmatpush3.msra.mxu1 %v2957_v57  ;;  %5341 = vmatprep.mubr.msk.f32.mxu1 %vm5695_vm7, %v5694_v22 }
0x111b   :  { %v2801_v8 = vmul.f32 %v5596_v7, %v5588_v48  ;;  %5349 = vmatprep.subr.mxu1 %v5694_v22  ;;  %v3265_v17 = vpop.permute.xlu0 %3264 }
0x111d   :  { %v5598_v9 = vpop.eup %5597  ;;  %5337 = vmatmul.mubr.msk.f32.vlgmr.msra.gmra.mxu0 %vm792_vm11, %v2801_v8 }
0x111e   :  { %5345 = vmatpush3.msra.mxu0 %v3033_v59  ;;  %v2802_v38 = vmul.f32 %v5598_v9, %v5590_v53  ;;  %5346 = vmatprep.mubr.msk.f32.mxu0 %vm5695_vm7, %v5694_v22 }
0x111f   :  { %5354 = vmatprep.subr.mxu0 %v5694_v22 }
0x1120   :  { %5342 = vmatmul.mubr.msk.f32.vlgmr.msra.gmra.mxu1 %vm792_vm11, %v2802_v38 }
0x1121   :  { %v5600_v12 = vpop.eup %5599  ;;  %5350 = vmatpush3.xpose.msk.msra.mxu1 %vm458_vm8, %v3111_v61  ;;  %5351 = vmatprep.mubr.msk.f32.mxu1 %vm5695_vm7, %v5694_v22 }
0x1122   :  { %5359 = vmatprep.subr.mxu1 %v5694_v22  ;;  %v2803_v15 = vmul.f32 %v5600_v12, %v5592_v56 }
0x1124   :  { %5347 = vmatmul.mubr.msk.f32.vlgmr.msra.gmra.mxu0 %vm792_vm11, %v2803_v15  ;;  %5352 = vmatmul.mubr.msk.f32.vlgmr.msra.gmra.mxu1 %vm458_vm8, %v3109_v63 }
0x1125   :  { %5355 = vmatpush3.xpose.msk.msra.mxu0 %vm458_vm8, %v3189_v60  ;;  %5360 = vmatpush3.xpose.msk.msra.mxu1 %vm458_vm8, %v3267_v13 }
0x1126   :  { %5356 = vmatprep.mubr.msk.f32.mxu0 %vm5695_vm7, %v5694_v22  ;;  %5361 = vmatprep.mubr.msk.f32.mxu1 %vm5695_vm7, %v5694_v22 }
0x1127   :  { %5364 = vmatprep.subr.mxu0 %v5694_v22  ;;  %5369 = vmatprep.subr.mxu1 %v5694_v22 }
0x1128   :  { %5357 = vmatmul.mubr.msk.f32.vlgmr.msra.gmra.mxu0 %vm458_vm8, %v3187_v62  ;;  %5362 = vmatmul.mubr.msk.f32.vlgmr.msra.gmra.mxu1 %vm458_vm8, %v3265_v17 }
0x1129   :  { %5365 = vmatpush3.xpose.msk.msra.mxu0 %vm458_vm8, %v3345_v16  ;;  %5366 = vmatprep.mubr.msk.f32.mxu0 %vm5695_vm7, %v5694_v22 }
0x112a   :  { %5374 = vmatprep.subr.mxu0 %v5694_v22  ;;  %5371 = vmatprep.mubr.msk.f32.mxu1 %vm5695_vm7, %v5694_v22 }
0x112c   :  { %5367 = vmatmul.mubr.msk.f32.vlgmr.msra.gmra.mxu0 %vm458_vm8, %v3343_v20 }
0x112d   :  { %5376 = vmatprep.mubr.msk.f32.mxu0 %vm5695_vm7, %v5694_v22 }
0x11d9   :  { %v6393_v25 = vpop.f32.mrf.mxu1 }
0x11db   :  { %v5333_v29 = vpop.f32.mrf.mxu1 }
0x11dd   :  { %v6395_v32 = vpop.f32.mrf.mxu0 }
0x11df   :  { %v5338_v41 = vpop.f32.mrf.mxu0 }
0x11e0   :  { %v6397_v35 = vpop.f32.mrf.mxu1 }
0x11e2   :  { %v5343_v30 = vpop.f32.mrf.mxu1 }
0x11e4   :  { %v6399_v42 = vpop.f32.mrf.mxu0  ;;  %v3182_v33 = vpop.f32.mrf.mxu1 }
0x11e5   :  { %v3420_v36 = vmul.f32 0.25, %v3182_v33 }
0x11e6   :  { %v5348_v37 = vpop.f32.mrf.mxu0  ;;  %v5353_v43 = vpop.f32.mrf.mxu1 }
0x11e7   :  { %v3424_v44 = vadd.f32 %v3420_v36, %v5985_v18 }
0x11e8   :  { %v3260_v45 = vpop.f32.mrf.mxu0  ;;  %v3338_v10 = vpop.f32.mrf.mxu1 }
0x11e9   :  { %v3421_v46 = vmul.f32 0.25, %v3260_v45  ;;  %v3422_v47 = vmul.f32 0.25, %v3338_v10  ;;  %v3428_v48 = vsel %vm792_vm11, %v3424_v44, -inf }
0x11ea   :  { %3429 = vmax.xlane.f32.xlu0 %v3428_v48  ;;  %v5358_v51 = vpop.f32.mrf.mxu0  ;;  %v5363_v53 = vpop.f32.mrf.mxu1  ;;  %v4902_v48 = vld [vmem:[%s6699_s8 + $0x38] sm:$0xff] }
0x11eb   :  { %v3425_v54 = vadd.f32 %v3421_v46, %v5989_v3  ;;  %v3426_v56 = vadd.f32 %v3422_v47, %v5994_v11  ;;  %v4901_v51 = vld [vmem:[%s6699_s8 + $0x30] sm:$0xff]  ;;  %v4900_v53 = vld [vmem:[%s6699_s8 + $0x28] sm:$0xff] }
0x11ec   :  { %v3416_v14 = vpop.f32.mrf.mxu0 }
0x11ed   :  { %v3423_v57 = vmul.f32 0.25, %v3416_v14  ;;  %v3431_v59 = vsel %vm792_vm11, %v3425_v54, -inf  ;;  %v3434_v60 = vsel %vm792_vm11, %v3426_v56, -inf }
0x11ee   :  { %3432 = vmax.xlane.f32.xlu1 %v3431_v59  ;;  %v5368_v18 = vpop.f32.mrf.mxu0  ;;  %3435 = vmax.xlane.f32.xlu0 %v3434_v60 }
0x11ef   :  { %v3427_v61 = vadd.f32 %v3423_v57, %v5999_v19 }
0x11f1   :  { %v3437_v62 = vsel %vm792_vm11, %v3427_v61, -inf }
0x11f2   :  { %3438 = vmax.xlane.f32.xlu0 %v3437_v62 }
0x11ff   :  { %3472 = vrot.lane.b32.xlu1 %v6283_v52, %s5702_s1 }
0x1273   :  { %v3430_v3 = vpop.xlane.xlu0 %3429 }
0x1274   :  { %v3440_v63 = vsub.f32 %v3424_v44, %v3430_v3 }
0x1276   :  { %v3444_v11 = vmul.f32 1.442695, %v3440_v63 }
0x1277   :  { %v3433_v1 = vpop.xlane.xlu1 %3432  ;;  %v3436_v2 = vpop.xlane.xlu0 %3435 }
0x1278   :  { %5601 = vpow2.f32 %v3444_v11  ;;  %v3441_v4 = vsub.f32 %v3425_v54, %v3433_v1  ;;  %v3442_v28 = vsub.f32 %v3426_v56, %v3436_v2  ;;  %v4899_v54 = vld [vmem:[%s6699_s8 + $0x20] sm:$0xff] }
0x127a   :  { %v3446_v5 = vmul.f32 1.442695, %v3441_v4  ;;  %v3448_v6 = vmul.f32 1.442695, %v3442_v28 }
0x127b   :  { %v3473_v7 = vpop.permute.xlu1 %3472  ;;  %v3439_v8 = vpop.xlane.xlu0 %3438 }
0x127c   :  { %5603 = vpow2.f32 %v3446_v5  ;;  %v3443_v19 = vsub.f32 %v3427_v61, %v3439_v8  ;;  %5370 = vmatpush3.msra.mxu1 %v3473_v7 }
0x127d   :  { %5605 = vpow2.f32 %v3448_v6  ;;  %5379 = vmatprep.subr.mxu1 %v5694_v22 }
0x127e   :  { %v3450_v9 = vmul.f32 1.442695, %v3443_v19 }
0x1280   :  { %5607 = vpow2.f32 %v3450_v9 }
0x1285   :  { %v5602_v52 = vpop.eup %5601 }
0x1286   :  { %v3452_v38 = vsel %vm792_vm11, %v5602_v52, 0.0 }
0x1287   :  { %3453 = vadd.xlane.f32.xlu1 %v3452_v38 }
0x1289   :  { %v5604_v12 = vpop.eup %5603 }
0x128a   :  { %v5606_v13 = vpop.eup %5605  ;;  %v3455_v15 = vsel %vm792_vm11, %v5604_v12, 0.0 }
0x128b   :  { %3456 = vadd.xlane.f32.xlu0 %v3455_v15  ;;  %v3458_v16 = vsel %vm792_vm11, %v5606_v13, 0.0 }
0x128c   :  { %3459 = vadd.xlane.f32.xlu1 %v3458_v16 }
0x128d   :  { %v5608_v17 = vpop.eup %5607 }
0x128e   :  { %v3461_v20 = vsel %vm792_vm11, %v5608_v17, 0.0 }
0x128f   :  { %3462 = vadd.xlane.f32.xlu0 %v3461_v20 }
0x129d   :  { %3624 = vrot.lane.b32.xlu1 %v6289_v55, %s5702_s1 }
0x12a1   :  { %3700 = vrot.lane.b32.xlu1 %v6293_v27, %s5702_s1 }
0x12a5   :  { %3548 = vrot.lane.b32.xlu0 %v6281_v49, %s5702_s1 }
0x1310   :  { %v3454_v29 = vpop.xlane.xlu1 %3453 }
0x1311   :  { %5609 = vrcp.f32 %v3454_v29 }
0x1314   :  { %v3457_v41 = vpop.xlane.xlu0 %3456 }
0x1315   :  { %v3460_v30 = vpop.xlane.xlu1 %3459  ;;  %5611 = vrcp.f32 %v3457_v41 }
0x1316   :  { %5613 = vrcp.f32 %v3460_v30 }
0x1318   :  { %v3463_v33 = vpop.xlane.xlu0 %3462 }
0x1319   :  { %5615 = vrcp.f32 %v3463_v33  ;;  %v3625_v55 = vpop.permute.xlu1 %3624 }
0x131c   :  { %v3549_v36 = vpop.permute.xlu0 %3548 }
0x131d   :  { %5375 = vmatpush3.msra.mxu0 %v3549_v36  ;;  %v3701_v10 = vpop.permute.xlu1 %3700 }
0x131e   :  { %v5610_v37 = vpop.eup %5609  ;;  %5384 = vmatprep.subr.mxu0 %v5694_v22 }
0x131f   :  { %v3468_v43 = vmul.f32 %v5610_v37, %v5602_v52 }
0x1321   :  { %5372 = vmatmul.mubr.msk.f32.vlgmr.msra.gmra.mxu1 %vm792_vm11, %v3468_v43 }
0x1322   :  { %v5612_v27 = vpop.eup %5611  ;;  %5380 = vmatpush3.msra.mxu1 %v3625_v55  ;;  %5381 = vmatprep.mubr.msk.f32.mxu1 %vm5695_vm7, %v5694_v22 }
0x1323   :  { %v5614_v49 = vpop.eup %5613  ;;  %v3469_v44 = vmul.f32 %v5612_v27, %v5604_v12  ;;  %5389 = vmatprep.subr.mxu1 %v4902_v48 }
0x1324   :  { %v3470_v45 = vmul.f32 %v5614_v49, %v5606_v13 }
0x1325   :  { %5377 = vmatmul.mubr.msk.f32.vlgmr.msra.gmra.mxu0 %vm792_vm11, %v3469_v44 }
0x1326   :  { %v5616_v46 = vpop.eup %5615  ;;  %5382 = vmatmul.mubr.msk.f32.vlgmr.msra.gmra.mxu1 %vm792_vm11, %v3470_v45  ;;  %5385 = vmatpush3.msra.mxu0 %v3701_v10 }
0x1327   :  { %5386 = vmatprep.mubr.msk.f32.mxu0 %vm5695_vm7, %v5694_v22  ;;  %v3471_v47 = vmul.f32 %v5616_v46, %v5608_v17  ;;  %5390 = vmatpush3.msra.mxu1 %v4902_v48 }
0x1328   :  { %5391 = vmatprep.subr.mxu1 %v4901_v51 }
0x1329   :  { %5387 = vmatmul.mubr.msk.f32.vlgmr.msra.gmra.mxu0 %vm792_vm11, %v3471_v47  ;;  %5392 = vmatpush3.msra.mxu1 %v4901_v51  ;;  %v4910_v51 = vld [vmem:[%s6700_s9 + $0x38] sm:$0xff] }
0x132a   :  { %5393 = vmatprep.subr.mxu1 %v4900_v53  ;;  %5403 = vmatprep.subr.mxu0 %v4910_v51 }
0x132b   :  { %5394 = vmatpush3.msra.mxu1 %v4900_v53  ;;  %v4909_v53 = vld [vmem:[%s6700_s9 + $0x30] sm:$0xff]  ;;  %5404 = vmatpush3.msra.mxu0 %v4910_v51 }
0x132c   :  { %5395 = vmatprep.subr.mxu1 %v4899_v54  ;;  %5405 = vmatprep.subr.mxu0 %v4909_v53 }
0x132d   :  { %5396 = vmatpush3.msra.mxu1 %v4899_v54  ;;  %v4908_v54 = vld [vmem:[%s6700_s9 + $0x28] sm:$0xff]  ;;  %5406 = vmatpush3.msra.mxu0 %v4909_v53 }
0x132e   :  { %5407 = vmatprep.subr.mxu0 %v4908_v54 }
0x132f   :  { %5408 = vmatpush3.msra.mxu0 %v4908_v54 }
0x13e1   :  { %v3544_v56 = vpop.f32.mrf.mxu1 }
0x13e2   :  { %3780 = vrot.lane.b32.xlu0 %v3544_v56, %s5703_s4  ;;  %v4907_v56 = vld [vmem:[%s6700_s9 + $0x20] sm:$0xff] }
0x13e3   :  { %v5373_v14 = vpop.f32.mrf.mxu1  ;;  %5409 = vmatprep.subr.mxu0 %v4907_v56 }
0x13e4   :  { %5410 = vmatpush3.msra.mxu0 %v4907_v56 }
0x13e5   :  { %v3620_v57 = vpop.f32.mrf.mxu0  ;;  %5439 = vmatprep.subr.mxu0 %v5694_v22 }
0x13e6   :  { %v3696_v59 = vpop.f32.mrf.mxu1  ;;  %3782 = vrot.lane.b32.xlu1 %v3620_v57, %s5703_s4 }
0x13e7   :  { %3784 = vrot.lane.b32.xlu0 %v3696_v59, %s5703_s4  ;;  %v5378_v60 = vpop.f32.mrf.mxu0 }
0x13e8   :  { %v5383_v18 = vpop.f32.mrf.mxu1 }
0x13e9   :  { %v3772_v61 = vpop.f32.mrf.mxu0 }
0x13ea   :  { %3786 = vrot.lane.b32.xlu1 %v3772_v61, %s5703_s4 }
0x13eb   :  { %v5388_v62 = vpop.f32.mrf.mxu0 }
0x1454   :  { %v3781_v3 = vpop.permute.xlu0 %3780 }
0x1455   :  { %v3792_v63 = vsel %vm458_vm8, %v6393_v25, %v3781_v3  ;;  %v6462_v25 = vld [vmem:[%s6703_s12 + $0x8] sm:$0x3f] }
0x1456   :  { %5397 = vmatprep.mubr.msk.f32.mxu1 %vm276_vm6, %v3792_v63 }
0x1458   :  { %v3783_v11 = vpop.permute.xlu1 %3782 }
0x1459   :  { %v3793_v1 = vsel %vm458_vm8, %v6395_v32, %v3783_v11  ;;  %v3785_v2 = vpop.permute.xlu0 %3784  ;;  %v3804_v32 = vrot.slane %v6462_v25, %v5982_v58 }
0x145a   :  { %v3794_v4 = vsel %vm458_vm8, %v6397_v35, %v3785_v2  ;;  %5398 = vmatmul.mubr.msk.f32.vlgmr.msra.gmra.mxu1 %vm276_vm6, %v3793_v1 }
0x145b   :  { %5400 = vmatprep.mubr.msk.f32.mxu1 %vm276_vm6, %v3794_v4 }
0x145c   :  { %v3787_v28 = vpop.permute.xlu1 %3786 }
0x145d   :  { %v3795_v5 = vsel %vm458_vm8, %v6399_v42, %v3787_v28  ;;  %v3961_v28 = vrot.slane %v6462_v25, %v1992_v0 }
0x145e   :  { %5401 = vmatmul.mubr.msk.f32.gmra.mxu1 %vm276_vm6, %v3795_v5 }
0x151a   :  { %v5399_v6 = vpop.f32.mrf.mxu1 }
0x151b   :  { %v3889_v35 = vadd.f32 %v5399_v6, %v3804_v32 }
0x151c   :  { %v3883_v7 = vpop.f32.mrf.mxu1 }
0x151d   :  { %v3903_v8 = vadd.f32 %v3889_v35, %v6262_v40  ;;  %v3884_v19 = vadd.f32 %v3883_v7, %v3804_v32  ;;  %v3969_v35 = vrot.slane %v6462_v25, %v2000_v24 }
0x151e   :  { %v5402_v9 = vpop.f32.mrf.mxu1 }
0x151f   :  { %v3902_v52 = vadd.f32 %v3884_v19, %v6260_v39  ;;  %v3909_v42 = vsel %vm276_vm6, %v3903_v8, 0.0  ;;  %v3899_v12 = vadd.f32 %v5402_v9, %v3804_v32 }
0x1520   :  { %3910 = vadd.xlane.f32.xlu1 %v3909_v42  ;;  %v3893_v38 = vpop.f32.mrf.mxu1 }
0x1521   :  { %v3894_v13 = vadd.f32 %v3893_v38, %v3804_v32  ;;  %v3906_v15 = vsel %vm276_vm6, %v3902_v52, 0.0  ;;  %v3905_v16 = vadd.f32 %v3899_v12, %v6270_v21 }
0x1522   :  { %3907 = vadd.xlane.f32.xlu0 %v3906_v15 }
0x1523   :  { %v3904_v58 = vadd.f32 %v3894_v13, %v6268_v31  ;;  %v3915_v40 = vsel %vm276_vm6, %v3905_v16, 0.0 }
0x1525   :  { %v3912_v17 = vsel %vm276_vm6, %v3904_v58, 0.0 }
0x1526   :  { %3913 = vadd.xlane.f32.xlu0 %v3912_v17  ;;  %v4922_v17 = vld [vmem:[%s6702_s11 + $0x68] sm:$0xff] }
0x152a   :  { %3916 = vadd.xlane.f32.xlu0 %v3915_v40  ;;  %v4921_v40 = vld [vmem:[%s6702_s11 + $0x60] sm:$0xff] }
0x15a9   :  { %v3911_v39 = vpop.xlane.xlu1 %3910 }
0x15aa   :  { %v3919_v20 = vmul.f32 0.03125, %v3911_v39  ;;  %v4920_v39 = vld [vmem:[%s6702_s11 + $0x58] sm:$0xff] }
0x15ab   :  { %v3908_v29 = vpop.xlane.xlu0 %3907 }
0x15ac   :  { %v3923_v41 = vsub.f32 %v3903_v8, %v3919_v20  ;;  %v3918_v30 = vmul.f32 0.03125, %v3908_v29  ;;  %v4919_v20 = vld [vmem:[%s6702_s11 + $0x50] sm:$0xff]  ;;  %v4918_v29 = vld [vmem:[%s6702_s11 + $0x48] sm:$0xff] }
0x15ae   :  { %v3922_v33 = vsub.f32 %v3902_v52, %v3918_v30  ;;  %v3927_v36 = vmul.f32 %v3923_v41, %v3923_v41  ;;  %v4912_v30 = vld [vmem:[%s6701_s10 + $0x1] ss:$0 sm:$0xff] }
0x15af   :  { %v3914_v37 = vpop.xlane.xlu0 %3913 }
0x15b0   :  { %v3920_v55 = vmul.f32 0.03125, %v3914_v37  ;;  %v3933_v43 = vsel %vm276_vm6, %v3927_v36, 0.0  ;;  %v3926_v31 = vmul.f32 %v3922_v33, %v3922_v33 }
0x15b1   :  { %3934 = vadd.xlane.f32.xlu0 %v3933_v43 }
0x15b2   :  { %v3924_v21 = vsub.f32 %v3904_v58, %v3920_v55  ;;  %v3930_v27 = vsel %vm276_vm6, %v3926_v31, 0.0  ;;  %v4924_v58 = vld [vmem:[%s6702_s11 + $0x78] sm:$0xff] }
0x15b3   :  { %3931 = vadd.xlane.f32.xlu1 %v3930_v27  ;;  %v3917_v49 = vpop.xlane.xlu0 %3916  ;;  %5417 = vmatprep.subr.mxu1 %v4924_v58 }
0x15b4   :  { %v3921_v44 = vmul.f32 0.03125, %v3917_v49  ;;  %v3928_v45 = vmul.f32 %v3924_v21, %v3924_v21  ;;  %5418 = vmatpush3.msra.mxu1 %v4924_v58 }
0x15b6   :  { %v3925_v10 = vsub.f32 %v3905_v16, %v3921_v44  ;;  %v3936_v46 = vsel %vm276_vm6, %v3928_v45, 0.0  ;;  %v4923_v16 = vld [vmem:[%s6702_s11 + $0x70] sm:$0xff] }
0x15b7   :  { %3937 = vadd.xlane.f32.xlu1 %v3936_v46  ;;  %5419 = vmatprep.subr.mxu1 %v4923_v16 }
0x15b8   :  { %v3929_v47 = vmul.f32 %v3925_v10, %v3925_v10  ;;  %5420 = vmatpush3.msra.mxu1 %v4923_v16 }
0x15b9   :  { %5421 = vmatprep.subr.mxu1 %v4922_v17 }
0x15ba   :  { %v3939_v48 = vsel %vm276_vm6, %v3929_v47, 0.0  ;;  %5422 = vmatpush3.msra.mxu1 %v4922_v17 }
0x15bb   :  { %3940 = vadd.xlane.f32.xlu0 %v3939_v48  ;;  %5423 = vmatprep.subr.mxu1 %v4921_v40 }
0x15bc   :  { %5424 = vmatpush3.msra.mxu1 %v4921_v40 }
0x15bd   :  { %5425 = vmatprep.subr.mxu1 %v4920_v39 }
0x15be   :  { %5426 = vmatpush3.msra.mxu1 %v4920_v39 }
0x15bf   :  { %5427 = vmatprep.subr.mxu1 %v4919_v20 }
0x15c0   :  { %5428 = vmatpush3.msra.mxu1 %v4919_v20 }
0x15c1   :  { %5429 = vmatprep.subr.mxu1 %v4918_v29 }
0x15c2   :  { %5430 = vmatpush3.msra.mxu1 %v4918_v29 }
0x163a   :  { %v3935_v14 = vpop.xlane.xlu0 %3934 }
0x163b   :  { %v3943_v57 = vmul.f32 0.03125, %v3935_v14 }
0x163c   :  { %v3932_v59 = vpop.xlane.xlu1 %3931 }
0x163d   :  { %v3947_v60 = vadd.f32 1e-12, %v3943_v57  ;;  %v3942_v18 = vmul.f32 0.03125, %v3932_v59 }
0x163f   :  { %5617 = vrsqrt.f32 %v3947_v60  ;;  %v3946_v61 = vadd.f32 1e-12, %v3942_v18 }
0x1640   :  { %v3938_v62 = vpop.xlane.xlu1 %3937 }
0x1641   :  { %5619 = vrsqrt.f32 %v3946_v61  ;;  %v3944_v3 = vmul.f32 0.03125, %v3938_v62 }
0x1643   :  { %v3948_v63 = vadd.f32 1e-12, %v3944_v3 }
0x1644   :  { %v3941_v11 = vpop.xlane.xlu0 %3940 }
0x1645   :  { %5621 = vrsqrt.f32 %v3948_v63  ;;  %v3945_v1 = vmul.f32 0.03125, %v3941_v11 }
0x1647   :  { %v3949_v2 = vadd.f32 1e-12, %v3945_v1 }
0x1649   :  { %5623 = vrsqrt.f32 %v3949_v2 }
0x164c   :  { %v5618_v4 = vpop.eup %5617 }
0x164d   :  { %v3955_v5 = vmul.f32 %v5618_v4, %v3923_v41  ;;  %v4917_v41 = vld [vmem:[%s6702_s11 + $0x40] sm:$0xff] }
0x164e   :  { %v5620_v32 = vpop.eup %5619  ;;  %5431 = vmatprep.subr.mxu1 %v4917_v41 }
0x164f   :  { %v3954_v6 = vmul.f32 %v5620_v32, %v3922_v33  ;;  %v3963_v7 = vmul.f32 %v3961_v28, %v3955_v5  ;;  %5432 = vmatpush3.msra.mxu1 %v4917_v41 }
0x1650   :  { %5461 = vmatprep.subr.mxu1 %v5694_v22 }
0x1651   :  { %v3962_v8 = vmul.f32 %v3961_v28, %v3954_v6  ;;  %v6499_v42 = vadd.f32 %v3969_v35, %v3963_v7 }
0x1652   :  { %v5622_v19 = vpop.eup %5621 }
0x1653   :  { %v6497_v9 = vadd.f32 %v3969_v35, %v3962_v8  ;;  %v3956_v52 = vmul.f32 %v5622_v19, %v3924_v21 }
0x1655   :  { %5411 = vmatprep.mubr.msk.f32.mxu0 %vm276_vm6, %v6497_v9  ;;  %v3964_v38 = vmul.f32 %v3961_v28, %v3956_v52 }
0x1656   :  { %v5624_v0 = vpop.eup %5623  ;;  %5412 = vmatmul.mubr.msk.f32.vlgmr.msra.gmra.mxu0 %vm276_vm6, %v6499_v42 }
0x1657   :  { %v6505_v12 = vadd.f32 %v3969_v35, %v3964_v38  ;;  %v3957_v13 = vmul.f32 %v5624_v0, %v3925_v10 }
0x1659   :  { %5414 = vmatprep.mubr.msk.f32.mxu0 %vm276_vm6, %v6505_v12  ;;  %v3965_v24 = vmul.f32 %v3961_v28, %v3957_v13 }
0x165b   :  { %v6509_v15 = vadd.f32 %v3969_v35, %v3965_v24  ;;  %v4132_v24 = vrot.slane %v6462_v25, %v2160_v23 }
0x165d   :  { %5415 = vmatmul.mubr.msk.f32.gmra.mxu0 %vm276_vm6, %v6509_v15 }
0x165e   :  { %5447 = vmatprep.mubr.msk.f32.mxu0 %vm5695_vm7, %v5694_v22 }
0x1716   :  { %v5413_v33 = vpop.f32.mrf.mxu0 }
0x1717   :  { %v4071_v36 = vadd.f32 %v5413_v33, %v4912_v30 }
0x1718   :  { %v4065_v37 = vpop.f32.mrf.mxu0 }
0x1719   :  { %v4085_v55 = vmul.f32 %v4071_v36, %v4071_v36  ;;  %v4066_v43 = vadd.f32 %v4912_v30, %v4065_v37 }
0x171b   :  { %v4089_v31 = vmul.f32 %v4085_v55, %v4071_v36  ;;  %v4084_v21 = vmul.f32 %v4066_v43, %v4066_v43 }
0x171d   :  { %v4093_v27 = vmul.f32 0.044715, %v4089_v31  ;;  %v4088_v49 = vmul.f32 %v4084_v21, %v4066_v43  ;;  %v5416_v44 = vpop.f32.mrf.mxu0 }
0x171e   :  { %v4081_v45 = vadd.f32 %v5416_v44, %v4912_v30 }
0x171f   :  { %v4097_v10 = vadd.f32 %v4093_v27, %v4071_v36  ;;  %v4092_v46 = vmul.f32 0.044715, %v4088_v49  ;;  %v4075_v47 = vpop.f32.mrf.mxu0 }
0x1720   :  { %v4087_v48 = vmul.f32 %v4081_v45, %v4081_v45  ;;  %v4076_v51 = vadd.f32 %v4912_v30, %v4075_v47 }
0x1721   :  { %v4101_v53 = vmul.f32 0.7978846, %v4097_v10  ;;  %v4096_v54 = vadd.f32 %v4092_v46, %v4066_v43 }
0x1722   :  { %v4091_v56 = vmul.f32 %v4087_v48, %v4081_v45  ;;  %v4086_v14 = vmul.f32 %v4076_v51, %v4076_v51 }
0x1723   :  { %5625 = vtanh.f32 %v4101_v53  ;;  %v4100_v57 = vmul.f32 0.7978846, %v4096_v54 }
0x1724   :  { %v4095_v59 = vmul.f32 0.044715, %v4091_v56  ;;  %v4090_v60 = vmul.f32 %v4086_v14, %v4076_v51 }
0x1725   :  { %5627 = vtanh.f32 %v4100_v57 }
0x1726   :  { %v4099_v18 = vadd.f32 %v4095_v59, %v4081_v45  ;;  %v4094_v61 = vmul.f32 0.044715, %v4090_v60  ;;  %v4305_v60 = vld [vmem:[%s6704_s13 + $0x18] sm:$0xff] }
0x1727   :  { %5440 = vmatpush3.msra.mxu0 %v4305_v60  ;;  %v4684_v60 = vld [vmem:[%s6710_s19 + $0x10] sm:$0xff] }
0x1728   :  { %v4103_v62 = vmul.f32 0.7978846, %v4099_v18  ;;  %v4098_v3 = vadd.f32 %v4094_v61, %v4076_v51  ;;  %v4304_v18 = vld [vmem:[%s6704_s13 + $0x10] sm:$0xff]  ;;  %5441 = vmatprep.subr.mxu0 %v5694_v22  ;;  %v4303_v61 = vld [vmem:[%s6704_s13 + $0x8] sm:$0xff] }
0x1729   :  { %5442 = vmatpush3.msra.mxu0 %v4304_v18  ;;  %v4683_v18 = vld [vmem:[%s6710_s19 + $0x8] sm:$0xff] }
0x172a   :  { %5629 = vtanh.f32 %v4103_v62  ;;  %v4102_v63 = vmul.f32 0.7978846, %v4098_v3  ;;  %5443 = vmatprep.subr.mxu0 %v5694_v22  ;;  %v4302_v62 = vld [vmem:[%s6704_s13] sm:$0xff] }
0x172b   :  { %5444 = vmatpush3.msra.mxu0 %v4303_v61  ;;  %v4682_v61 = vld [vmem:[%s6710_s19] sm:$0xff] }
0x172c   :  { %5631 = vtanh.f32 %v4102_v63  ;;  %5445 = vmatprep.subr.mxu0 %v5694_v22 }
0x172d   :  { %5446 = vmatpush3.msra.mxu0 %v4302_v62 }
0x172e   :  { %5450 = vmatprep.subr.mxu0 %v5694_v22 }
0x1730   :  { %v5626_v11 = vpop.eup %5625 }
0x1731   :  { %v4109_v1 = vadd.f32 1.0, %v5626_v11 }
0x1732   :  { %v5628_v2 = vpop.eup %5627 }
0x1733   :  { %v4108_v4 = vadd.f32 1.0, %v5628_v2  ;;  %v4113_v28 = vmul.f32 0.5, %v4109_v1 }
0x1735   :  { %v4112_v5 = vmul.f32 0.5, %v4108_v4  ;;  %v4117_v35 = vmul.f32 %v4113_v28, %v4071_v36 }
0x1737   :  { %v5630_v32 = vpop.eup %5629  ;;  %v4116_v6 = vmul.f32 %v4112_v5, %v4066_v43 }
0x1738   :  { %v4111_v7 = vadd.f32 1.0, %v5630_v32 }
0x1739   :  { %v5632_v8 = vpop.eup %5631  ;;  %5433 = vmatprep.mubr.msk.f32.mxu1 %vm2162_vm12, %v4116_v6 }
0x173a   :  { %5434 = vmatmul.mubr.msk.f32.vlgmr.msra.gmra.mxu1 %vm2162_vm12, %v4117_v35  ;;  %v4110_v19 = vadd.f32 1.0, %v5632_v8  ;;  %v4115_v52 = vmul.f32 0.5, %v4111_v7 }
0x173c   :  { %v4114_v38 = vmul.f32 0.5, %v4110_v19  ;;  %v4119_v13 = vmul.f32 %v4115_v52, %v4081_v45  ;;  %v4289_v52 = vrot.slane %v6462_v25, %v2318_v26 }
0x173e   :  { %v4118_v0 = vmul.f32 %v4114_v38, %v4076_v51 }
0x1740   :  { %5436 = vmatprep.mubr.msk.f32.mxu1 %vm2162_vm12, %v4118_v0 }
0x1741   :  { %5437 = vmatmul.mubr.msk.f32.gmra.mxu1 %vm2162_vm12, %v4119_v13 }
0x1742   :  { %5469 = vmatprep.mubr.msk.f32.mxu1 %vm5695_vm7, %v5694_v22 }
0x17fa   :  { %v5435_v58 = vpop.f32.mrf.mxu1 }
0x17fb   :  { %v4217_v16 = vadd.f32 %v5435_v58, %v4132_v24 }
0x17fc   :  { %v4211_v17 = vpop.f32.mrf.mxu1 }
0x17fd   :  { %v4231_v40 = vadd.f32 %v4217_v16, %v6499_v42  ;;  %v4212_v39 = vadd.f32 %v4211_v17, %v4132_v24  ;;  %v4297_v16 = vrot.slane %v6462_v25, %v2326_v34  ;;  %v4407_v34 = vld [vmem:[%s6706_s15 + $0x18] sm:$0xff] }
0x17fe   :  { %v4411_v25 = vld [vmem:[%s6706_s15 + $0x38] sm:$0xff]  ;;  %5462 = vmatpush3.msra.mxu1 %v4407_v34 }
0x17ff   :  { %v4230_v20 = vadd.f32 %v4212_v39, %v6497_v9  ;;  %v4237_v29 = vsel %vm276_vm6, %v4231_v40, 0.0  ;;  %5463 = vmatprep.subr.mxu1 %v5694_v22 }
0x1800   :  { %4238 = vadd.xlane.f32.xlu1 %v4237_v29 }
0x1801   :  { %v5438_v41 = vpop.f32.mrf.mxu1  ;;  %v4234_v33 = vsel %vm276_vm6, %v4230_v20, 0.0 }
0x1802   :  { %v4227_v36 = vadd.f32 %v5438_v41, %v4132_v24 }
0x1803   :  { %v4221_v30 = vpop.f32.mrf.mxu1 }
0x1804   :  { %v4222_v37 = vadd.f32 %v4221_v30, %v4132_v24  ;;  %4235 = vadd.xlane.f32.xlu1 %v4234_v33  ;;  %v4233_v55 = vadd.f32 %v4227_v36, %v6509_v15 }
0x1806   :  { %v4232_v23 = vadd.f32 %v4222_v37, %v6505_v12  ;;  %v4243_v42 = vsel %vm276_vm6, %v4233_v55, 0.0 }
0x1808   :  { %v4240_v43 = vsel %vm276_vm6, %v4232_v23, 0.0 }
0x1809   :  { %4241 = vadd.xlane.f32.xlu0 %v4240_v43 }
0x180d   :  { %4244 = vadd.xlane.f32.xlu0 %v4243_v42  ;;  %v4406_v42 = vld [vmem:[%s6706_s15 + $0x10] sm:$0xff] }
0x180e   :  { %5464 = vmatpush3.msra.mxu1 %v4406_v42 }
0x180f   :  { %5465 = vmatprep.subr.mxu1 %v5694_v22 }
0x1889   :  { %v4239_v9 = vpop.xlane.xlu1 %4238 }
0x188a   :  { %v4247_v31 = vmul.f32 0.03125, %v4239_v9  ;;  %v4410_v9 = vld [vmem:[%s6706_s15 + $0x30] sm:$0xff] }
0x188c   :  { %v4251_v21 = vsub.f32 %v4231_v40, %v4247_v31  ;;  %v4405_v31 = vld [vmem:[%s6706_s15 + $0x8] sm:$0xff] }
0x188d   :  { %v4236_v27 = vpop.xlane.xlu1 %4235  ;;  %5466 = vmatpush3.msra.mxu1 %v4405_v31 }
0x188e   :  { %v4246_v49 = vmul.f32 0.03125, %v4236_v27  ;;  %v4255_v44 = vmul.f32 %v4251_v21, %v4251_v21  ;;  %v4404_v27 = vld [vmem:[%s6706_s15] sm:$0xff]  ;;  %5467 = vmatprep.subr.mxu1 %v5694_v22 }
0x188f   :  { %5468 = vmatpush3.msra.mxu1 %v4404_v27 }
0x1890   :  { %v4250_v45 = vsub.f32 %v4230_v20, %v4246_v49  ;;  %v4261_v10 = vsel %vm276_vm6, %v4255_v44, 0.0  ;;  %v4408_v49 = vld [vmem:[%s6706_s15 + $0x20] sm:$0xff]  ;;  %5483 = vmatprep.subr.mxu1 %v5694_v22 }
0x1891   :  { %4262 = vadd.xlane.f32.xlu1 %v4261_v10  ;;  %v4929_v44 = vld [vmem:[%s6705_s14] ss:$0 sm:$0xff] }
0x1892   :  { %v4242_v46 = vpop.xlane.xlu0 %4241  ;;  %v4254_v12 = vmul.f32 %v4250_v45, %v4250_v45 }
0x1893   :  { %v4248_v47 = vmul.f32 0.03125, %v4242_v46 }
0x1894   :  { %v4258_v15 = vsel %vm276_vm6, %v4254_v12, 0.0 }
0x1895   :  { %v4252_v48 = vsub.f32 %v4232_v23, %v4248_v47  ;;  %4259 = vadd.xlane.f32.xlu1 %v4258_v15  ;;  %v4559_v15 = vld [vmem:[%s6706_s15 + $0x58] sm:$0xff] }
0x1896   :  { %v4245_v51 = vpop.xlane.xlu0 %4244 }
0x1897   :  { %v4249_v53 = vmul.f32 0.03125, %v4245_v51  ;;  %v4256_v54 = vmul.f32 %v4252_v48, %v4252_v48  ;;  %v4557_v51 = vld [vmem:[%s6706_s15 + $0x48] sm:$0xff] }
0x1899   :  { %v4253_v56 = vsub.f32 %v4233_v55, %v4249_v53  ;;  %v4264_v14 = vsel %vm276_vm6, %v4256_v54, 0.0  ;;  %v4556_v54 = vld [vmem:[%s6706_s15 + $0x40] sm:$0xff] }
0x189a   :  { %4265 = vadd.xlane.f32.xlu0 %v4264_v14  ;;  %v4687_v14 = vld [vmem:[%s6710_s19 + $0x28] sm:$0xff] }
0x189b   :  { %v4257_v57 = vmul.f32 %v4253_v56, %v4253_v56 }
0x189d   :  { %v4267_v59 = vsel %vm276_vm6, %v4257_v57, 0.0  ;;  %v4686_v57 = vld [vmem:[%s6710_s19 + $0x20] sm:$0xff] }
0x189e   :  { %4268 = vadd.xlane.f32.xlu0 %v4267_v59  ;;  %v4685_v59 = vld [vmem:[%s6710_s19 + $0x18] sm:$0xff] }
0x191a   :  { %v4263_v3 = vpop.xlane.xlu1 %4262 }
0x191b   :  { %v4271_v63 = vmul.f32 0.03125, %v4263_v3 }
0x191d   :  { %v4275_v11 = vadd.f32 1e-12, %v4271_v63 }
0x191e   :  { %v4260_v1 = vpop.xlane.xlu1 %4259 }
0x191f   :  { %v4270_v2 = vmul.f32 0.03125, %v4260_v1  ;;  %5633 = vrsqrt.f32 %v4275_v11 }
0x1921   :  { %v4274_v4 = vadd.f32 1e-12, %v4270_v2 }
0x1923   :  { %v4266_v28 = vpop.xlane.xlu0 %4265  ;;  %5635 = vrsqrt.f32 %v4274_v4  ;;  %v4934_v4 = vld [vmem:[%s6707_s16] ss:$0 sm:$0xff] }
0x1924   :  { %v4272_v5 = vmul.f32 0.03125, %v4266_v28 }
0x1926   :  { %v4276_v32 = vadd.f32 1e-12, %v4272_v5 }
0x1927   :  { %v4269_v6 = vpop.xlane.xlu0 %4268 }
0x1928   :  { %5637 = vrsqrt.f32 %v4276_v32  ;;  %v4273_v35 = vmul.f32 0.03125, %v4269_v6 }
0x192a   :  { %v4277_v7 = vadd.f32 1e-12, %v4273_v35 }
0x192c   :  { %5639 = vrsqrt.f32 %v4277_v7  ;;  %v5634_v8 = vpop.eup %5633 }
0x192d   :  { %v4283_v38 = vmul.f32 %v5634_v8, %v4251_v21  ;;  %v4409_v21 = vld [vmem:[%s6706_s15 + $0x28] sm:$0xff] }
0x192f   :  { %v4291_v24 = vmul.f32 %v4289_v52, %v4283_v38 }
0x1930   :  { %v5636_v19 = vpop.eup %5635 }
0x1931   :  { %v4282_v0 = vmul.f32 %v5636_v19, %v4250_v45  ;;  %v4299_v29 = vadd.f32 %v4297_v16, %v4291_v24 }
0x1933   :  { %v4290_v17 = vmul.f32 %v4289_v52, %v4282_v0  ;;  %v4317_v37 = vrot.slane %v4299_v29, 7 }
0x1935   :  { %v5638_v13 = vpop.eup %5637  ;;  %v4298_v33 = vadd.f32 %v4297_v16, %v4290_v17 }
0x1936   :  { %v4284_v58 = vmul.f32 %v5638_v13, %v4252_v48  ;;  %v4558_v48 = vld [vmem:[%s6706_s15 + $0x50] sm:$0xff] }
0x1937   :  { %v4319_v23 = vsel %vm4318_vm13, %v4317_v37, %v4298_v33  ;;  %v4935_v33 = vld [vmem:[%s6708_s17] ss:$0 sm:$0xff]  ;;  %s5704_s17 = smov [#allocation2]  }
0x1938   :  { %v4292_v40 = vmul.f32 %v4289_v52, %v4284_v58 }
0x1939   :  { %v5640_v39 = vpop.eup %5639 }
0x193a   :  { %v4285_v20 = vmul.f32 %v5640_v39, %v4253_v56  ;;  %v4300_v41 = vadd.f32 %v4297_v16, %v4292_v40 }
0x193c   :  { %v4293_v30 = vmul.f32 %v4289_v52, %v4285_v20  ;;  %v4320_v36 = vrot.slane %v4300_v41, 6 }
0x193e   :  { %v4301_v26 = vadd.f32 %v4297_v16, %v4293_v30  ;;  %v4322_v43 = vsel %vm4321_vm14, %v4320_v36, %v4319_v23 }
0x1940   :  { %v4323_v55 = vrot.slane %v4301_v26, 5  ;;  %v4936_v26 = vld [vmem:[%s6709_s18] ss:$0 sm:$0xff]  ;;  %s4789_s18 = sshll.u32 %s5704_s17, 4  ;;  %s4790_s18 = int_to_ptr.vmem [resolvable:$true] %s4789_s18 }
0x1941   :  { %p5654_p1 = scmp.lt.s32.totalorder %s4790_s18, %s4790_s18 }
0x1942   :  { %v4325_v50 = vsel %vm4324_vm15, %v4323_v55, %v4322_v43  ;;  %v4937_v43 = vld [vmem:[%s6711_s20] ss:$0 sm:$0xff]  ;;  %s5649_s20 = scalar_lea.vmem %s4790_s18, 32 }
0x1943   :  { %5448 = vmatmul.mubr.msk.f32.vlgmr.msra.gmra.mxu0 %vm276_vm6, %v4325_v50  ;;  %p5650_p0 = scmp.ne.s32.totalorder %s4790_s18, %s5649_s20  ;;  %p5655_p2 = scmp.lt.s32.totalorder %s5649_s20, %s5649_s20 }
0x1944   :  { %5458 = vmatprep.mubr.msk.f32.mxu0 %vm5695_vm7, %v5694_v22  ;;  %5451 = vmatpush3.msra.mxu0 %v4411_v25 }
0x1945   :  { %5452 = vmatprep.subr.mxu0 %v5694_v22  ;;  %p5656_p3 = por %p5655_p2, %p5654_p1 }
0x1946   :  { %5453 = vmatpush3.msra.mxu0 %v4410_v9 }
0x1947   :  { %5454 = vmatprep.subr.mxu0 %v5694_v22  ;;  %p5657_p4 = pnand %p5656_p3, %p5650_p0 }
0x1948   :  { %5455 = vmatpush3.msra.mxu0 %v4409_v21 }
0x1949   :  { %5456 = vmatprep.subr.mxu0 %v5694_v22 }
0x194a   :  { %5457 = vmatpush3.msra.mxu0 %v4408_v49 }
0x194b   :  { %5472 = vmatprep.subr.mxu0 %v5694_v22 }
0x1a03   :  { %v4394_v45 = vpop.f32.mrf.mxu0 }
0x1a04   :  { %v4395_v10 = vadd.f32 %v4929_v44, %v4394_v45 }
0x1a05   :  { %v5449_v46 = vpop.f32.mrf.mxu0 }
0x1a06   :  { %5641 = vtanh.f32 %v4395_v10 }
0x1a13   :  { %v5642_v12 = vpop.eup %5641 }
0x1a14   :  { %5470 = vmatmul.mubr.msk.f32.vlgmr.msra.gmra.mxu1 %vm276_vm6, %v5642_v12  ;;  %v4400_v47 = vrot.slane %v5642_v12, 2 }
0x1a15   :  { %5495 = vmatprep.mubr.msk.f32.mxu1 %vm5695_vm7, %v5694_v22  ;;  %5484 = vmatpush3.msra.mxu1 %v4687_v14 }
0x1a16   :  { %5459 = vmatmul.mubr.msk.f32.vlgmr.msra.gmra.mxu0 %vm276_vm6, %v4400_v47  ;;  %v4402_v53 = vsub.f32 %v5642_v12, %v4400_v47  ;;  %5485 = vmatprep.subr.mxu1 %v5694_v22 }
0x1a17   :  { %5473 = vmatpush3.msra.mxu0 %v4559_v15  ;;  %5480 = vmatprep.mubr.msk.f32.mxu0 %vm5695_vm7, %v5694_v22 }
0x1a18   :  { %5474 = vmatprep.subr.mxu0 %v5694_v22  ;;  %v4403_v56 = vand.u32 2147483647, %v4402_v53  ;;  %5486 = vmatpush3.msra.mxu1 %v4686_v57 }
0x1a19   :  { %5475 = vmatpush3.msra.mxu0 %v4558_v48  ;;  %5487 = vmatprep.subr.mxu1 %v5694_v22 }
0x1a1a   :  { %5476 = vmatprep.subr.mxu0 %v5694_v22  ;;  %5488 = vmatpush3.msra.mxu1 %v4685_v59 }
0x1a1b   :  { %5477 = vmatpush3.msra.mxu0 %v4557_v51  ;;  %5489 = vmatprep.subr.mxu1 %v5694_v22 }
0x1a1c   :  { %5478 = vmatprep.subr.mxu0 %v5694_v22  ;;  %5490 = vmatpush3.msra.mxu1 %v4684_v60 }
0x1a1d   :  { %5479 = vmatpush3.msra.mxu0 %v4556_v54  ;;  %5491 = vmatprep.subr.mxu1 %v5694_v22 }
0x1a1e   :  { %5481 = vmatmul.mubr.msk.f32.vlgmr.msra.gmra.mxu0 %vm276_vm6, %v4403_v56  ;;  %5492 = vmatpush3.msra.mxu1 %v4683_v18 }
0x1a1f   :  { %5493 = vmatprep.subr.mxu1 %v5694_v22 }
0x1a20   :  { %5494 = vmatpush3.msra.mxu1 %v4682_v61 }
0x1ad4   :  { %v4552_v62 = vpop.f32.mrf.mxu1 }
0x1ad6   :  { %v4480_v3 = vpop.f32.mrf.mxu0  ;;  %v5471_v63 = vpop.f32.mrf.mxu1 }
0x1ad7   :  { %v4553_v1 = vadd.f32 %v4552_v62, %v4480_v3 }
0x1ad8   :  { %v5460_v11 = vpop.f32.mrf.mxu0 }
0x1ade   :  { %v4629_v2 = vpop.f32.mrf.mxu0 }
0x1adf   :  { %v4633_v28 = vadd.f32 %v4629_v2, %v4553_v1 }
0x1ae0   :  { %v5482_v5 = vpop.f32.mrf.mxu0 }
0x1ae1   :  { %v4641_v32 = vadd.f32 %v4934_v4, %v4633_v28 }
0x1ae3   :  { %v4643_v22 = vsel %vm4642_vm0, %v4641_v32, 0.0 }
0x1ae4   :  { %v4644_v6 = vrot.slane %v4643_v22, 4 }
0x1ae6   :  { %v4645_v35 = vadd.f32 %v4644_v6, %v4643_v22 }
0x1ae8   :  { %v4646_v7 = vrot.slane %v4645_v35, 2 }
0x1aea   :  { %v4647_v8 = vadd.f32 %v4646_v7, %v4645_v35 }
0x1aec   :  { %v4648_v19 = vrot.slane %v4647_v8, 1 }
0x1aee   :  { %v4649_v52 = vadd.f32 %v4648_v19, %v4647_v8 }
0x1af0   :  { %v4651_v38 = vmul.f32 0.5, %v4649_v52 }
0x1af2   :  { %v4652_v0 = vsub.f32 %v4641_v32, %v4651_v38 }
0x1af4   :  { %v4653_v13 = vmul.f32 %v4652_v0, %v4652_v0 }
0x1af6   :  { %v4654_v24 = vsel %vm4642_vm0, %v4653_v13, 0.0 }
0x1af7   :  { %v4655_v58 = vrot.slane %v4654_v24, 4 }
0x1af9   :  { %v4656_v16 = vadd.f32 %v4655_v58, %v4654_v24 }
0x1afb   :  { %v4657_v17 = vrot.slane %v4656_v16, 2 }
0x1afd   :  { %v4658_v40 = vadd.f32 %v4657_v17, %v4656_v16 }
0x1aff   :  { %v4659_v39 = vrot.slane %v4658_v40, 1 }
0x1b01   :  { %v4660_v20 = vadd.f32 %v4659_v39, %v4658_v40 }
0x1b03   :  { %v4661_v29 = vmul.f32 0.5, %v4660_v20 }
0x1b05   :  { %v4662_v41 = vadd.f32 1e-05, %v4661_v29 }
0x1b07   :  { %5643 = vrsqrt.f32 %v4662_v41 }
0x1b14   :  { %v5644_v30 = vpop.eup %5643 }
0x1b15   :  { %v4664_v36 = vmul.f32 %v5644_v30, %v4652_v0 }
0x1b17   :  { %v4672_v37 = vmul.f32 %v4935_v33, %v4664_v36 }
0x1b19   :  { %v4680_v23 = vadd.f32 %v4936_v26, %v4672_v37 }
0x1b1b   :  { %v4681_v55 = vmax.f32 %v4680_v23, 0.0 }
0x1b1d   :  { %5496 = vmatmul.mubr.msk.f32.vlgmr.msra.gmra.mxu1 %vm4695_vm1, %v4681_v55 }
0x1bdd   :  { %v4765_v50 = vpop.f32.mrf.mxu1 }
0x1bde   :  { %v4766_v34 = vadd.f32 %v4937_v43, %v4765_v50 }
0x1bdf   :  { %v5497_v25 = vpop.f32.mrf.mxu1 }
0x1be0   :  { %v4771_v42 = vsel %vm4769_vm2, %v4766_v34, -inf  ;;  %4770 = vst.msk [vmem:[#allocation2] sm:$0x3] %vm4769_vm2, %v4766_v34 }
0x1be1   :  { %4772 = vmax.xlane.f32.xlu1 %v4771_v42 }
0x1c6a   :  { %v4773_v9 = vpop.xlane.xlu1 %4772 }
0x1c6b   :  { %v4774_v31 = vsub.f32 %v4766_v34, %v4773_v9 }
0x1c6d   :  { %v4775_v21 = vmul.f32 1.442695, %v4774_v31 }
0x1c6f   :  { %5645 = vpow2.f32 %v4775_v21 }
0x1c7c   :  { %v5646_v27 = vpop.eup %5645 }
0x1c7d   :  { %v4777_v49 = vsel %vm4769_vm2, %v5646_v27, 0.0 }
0x1c7e   :  { %4778 = vadd.xlane.f32.xlu0 %v4777_v49 }
0x1c7f   :  { %5660 = shalt.err (!%p5657_p4)
}
0x1c80   :  { %4792 = dma.vmem_to_hbm [thread:$0]  %s4790_s18, 32, %s6712_s21, [#allocation3]  }
0x1c81   :  { %s5705_s14 = smov [#allocation4]  }
0x1c82   :  { %s4799_s13 = sshll.u32 %s5705_s14, 4  ;;  %s4800_s13 = int_to_ptr.vmem [resolvable:$true] %s4799_s13 }
0x1c83   :  { %s5669_s23 = scalar_lea.vmem %s4800_s13, 32  ;;  %p5674_p6 = scmp.lt.s32.totalorder %s4800_s13, %s4800_s13 }
0x1c84   :  { %p5670_p5 = scmp.ne.s32.totalorder %s4800_s13, %s5669_s23  ;;  %p5675_p7 = scmp.lt.s32.totalorder %s5669_s23, %s5669_s23 }
0x1c86   :  { %p5676_p8 = por %p5675_p7, %p5674_p6 }
0x1c88   :  { %p5677_p9 = pnand %p5676_p8, %p5670_p5 }
0x1d07   :  { %v4779_v44 = vpop.xlane.xlu0 %4778 }
0x1d08   :  { %5647 = vrcp.f32 %v4779_v44 }
0x1d15   :  { %v5648_v45 = vpop.eup %5647 }
0x1d16   :  { %v4781_v10 = vmul.f32 %v5648_v45, %v5646_v27 }
0x1d18   :  { %4782 = vst.msk [vmem:[#allocation4] sm:$0x3] %vm4769_vm2, %v4781_v10 }
0x1d19   :  { %5680 = shalt.err (!%p5677_p9)
}
0x1d1a   :  { %4802 = dma.vmem_to_hbm [thread:$0]  %s4800_s13, 32, %s6713_s22, [#allocation5]  }
0x1d1b   :  { %5689 = dma.done.wait [#allocation3], 32  }
0x1d1c   :  { %5690 = vsyncadd [#allocation3], 4294967264 }
0x1d1d   :  { %5691 = dma.done.wait [#allocation5], 32  }
0x1d1e   :  { %5692 = vsyncadd [#allocation5], 4294967264 }
0x1d1f   :  { %4809 = vsyncpa [#allocation3], 1 }
0x1d20   :  { %4810 = vsyncpa [#allocation5], 1 }

</bundles_post_ra>
